<compile_context>
chip_gen: v6e
topology: v6e:2x2x1
jax: 0.10.0
libtpu: 0.0.40
codegen_flags: <defaults>
</compile_context>

<pallas_src>
import functools
import math

import jax
import jax.numpy as jnp
import numpy as np
from jax.experimental import pallas as pl
from jax.experimental.pallas import tpu as pltpu  # noqa: F401  (TPU backend)

LANES = 128

CFG = dict(
    batch=2, seq_len=8, input_size=4, d_model=32, n_heads=4, d_ff=64,
    e_layers=2, d_layers=1, c_out=4, pred_len=4, activation="relu",
)


# ----------------------------------------------------------------------------
# Single fused kernel: embedding -> encoder stack -> decoder stack -> projection
# ----------------------------------------------------------------------------
def _fused_transformer_kernel(cfg, layout, xcat_ref, slab_ref, out_ref):
    B = cfg["batch"]
    L = cfg["seq_len"]
    D = cfg["d_model"]
    H = cfg["n_heads"]
    E = D // H
    act = cfg["activation"]
    f32 = jnp.float32

    def get(name, r_off=0, n_rows=None, n_cols=None):
        """Static, sublane-aligned slice of the packed parameter slab."""
        base, rows, cols = layout[name]
        nr = rows if n_rows is None else n_rows
        nc = cols if n_cols is None else n_cols
        r0 = base + r_off
        return slab_ref[r0:r0 + nr, :nc]

    def mm(a, b):
        return jnp.dot(a, b, preferred_element_type=f32)

    def mm_t(a, b_t):
        # a @ b_t.T : contract the last dim of both.  Lets per-head weight blocks be
        # stored transposed + vertically stacked (8-row aligned) in the slab, so the
        # kernel never needs lane-offset slices of activations or weights.
        return jax.lax.dot_general(a, b_t, (((1,), (1,)), ((), ())),
                                   preferred_element_type=f32)

    def layer_norm(x2, name, eps=1e-5):
        g = get(name + "_g")
        b = get(name + "_b")
        mu = jnp.mean(x2, axis=-1, keepdims=True)
        var = jnp.mean(jnp.square(x2 - mu), axis=-1, keepdims=True)
        return (x2 - mu) * jax.lax.rsqrt(var + eps) * g + b

    def ffn(x2, name):
        y = mm(x2, get(name + "_w1")) + get(name + "_b1")
        if act == "relu":
            y = jnp.maximum(y, 0.0)
        else:
            # TODO(synk): PyTorch F.gelu default is the exact erf form; tanh approx here.
            y = jax.nn.gelu(y, approximate=True)
        return mm(y, get(name + "_w2")) + get(name + "_b2")

    def mha(xq2, xkv2, name, causal):
        """Multi-head attention + output projection, all heads handled together."""
        Lq = Lk = L
        scale = 1.0 / math.sqrt(E)
        # Per-head projections from sublane-aligned transposed weight blocks.
        q = jnp.stack([mm_t(xq2, get(name + "_wqkvT", h * E, E)) for h in range(H)])
        k = jnp.stack([mm_t(xkv2, get(name + "_wqkvT", D + h * E, E)) for h in range(H)])
        v = jnp.stack([mm_t(xkv2, get(name + "_wqkvT", 2 * D + h * E, E)) for h in range(H)])
        q = (q + get(name + "_bq_h")[:, None, :]) * scale          # (H, B*Lq, E)
        k = k + get(name + "_bk_h")[:, None, :]
        v = v + get(name + "_bv_h")[:, None, :]
        q = q.reshape(H * B, Lq, E)
        k = k.reshape(H * B, Lk, E)
        v = v.reshape(H * B, Lk, E)

        s = jnp.einsum("nqe,nke->nqk", q, k, preferred_element_type=f32)  # (H*B,Lq,Lk)
        if causal:
            row = jax.lax.broadcasted_iota(jnp.int32, (Lq, Lk), 0)
            col = jax.lax.broadcasted_iota(jnp.int32, (Lq, Lk), 1)
            s = jnp.where((col <= row)[None, :, :], s, -1e30)

        # ONE merged softmax for all (head, batch) tiles; EUP reciprocal for the denom.
        m = jnp.max(s, axis=-1, keepdims=True)
        e = jnp.exp(s - m)
        p = e * pl.reciprocal(jnp.sum(e, axis=-1, keepdims=True), approx=True)

        o = jnp.einsum("nqk,nke->nqe", p, v, preferred_element_type=f32)  # (H*B,Lq,E)
        o = o.reshape(H, B * Lq, E)

        # Head-concat + Wo folded into per-head row-block (8-aligned) accumulation.
        acc = mm(o[0], get(name + "_wo", 0, E)) + get(name + "_bo")
        for h in range(1, H):
            acc = acc + mm(o[h], get(name + "_wo", h * E, E))
        return acc

    # ---- DataEmbedding: fused circular-conv taps ([x_{t-1}|x_t|x_{t+1}] @ W) + PE ----
    h2 = mm(xcat_ref[...], get("tok_w")) + get("pe")               # (B*L, D)

    # ---- Encoder stack ----
    for li in range(cfg["e_layers"]):
        pfx = f"enc{li}"
        a = mha(h2, h2, pfx + "_attn", causal=False)
        h2 = layer_norm(h2 + a, pfx + "_ln1")
        y = ffn(h2, pfx)
        h2 = layer_norm(h2 + y, pfx + "_ln2")
    enc2 = layer_norm(h2, "enc_norm")

    # ---- Decoder stack (reference forward: decoder(enc_out, enc_out)) ----
    d2 = enc2
    for li in range(cfg["d_layers"]):
        pfx = f"dec{li}"
        a = mha(d2, d2, pfx + "_sattn", causal=True)
        d2 = layer_norm(d2 + a, pfx + "_ln1")
        a = mha(d2, enc2, pfx + "_xattn", causal=False)
        d2 = layer_norm(d2 + a, pfx + "_ln2")
        y = ffn(d2, pfx)
        d2 = layer_norm(d2 + y, pfx + "_ln3")
    d2 = layer_norm(d2, "dec_norm")

    # ---- Final projection: lane-dense 128-wide store (cols >= c_out are zero) ----
    out_ref[...] = (mm(d2, get("proj_w")) + get("proj_b")).astype(out_ref.dtype)


# ----------------------------------------------------------------------------
# Parameter init (our own random params; same parameterization as the PyTorch module)
# ----------------------------------------------------------------------------
def _dense(key, shape, scale=0.02):
    return scale * jax.random.normal(key, shape, dtype=jnp.float32)


def init_params(key, cfg):
    C, D, dff, c_out = cfg["input_size"], cfg["d_model"], cfg["d_ff"], cfg["c_out"]
    keys = iter(jax.random.split(key, 512))

    def lin(n_in, n_out):
        return _dense(next(keys), (n_in, n_out)), jnp.zeros((n_out,), jnp.float32)

    def ln():
        return jnp.ones((D,), jnp.float32), jnp.zeros((D,), jnp.float32)

    def attn():
        wq, bq = lin(D, D)
        wk, bk = lin(D, D)
        wv, bv = lin(D, D)
        wo, bo = lin(D, D)
        return dict(wq=wq, bq=bq, wk=wk, bk=bk, wv=wv, bv=bv, wo=wo, bo=bo)

    params = dict(
        tok_w0=_dense(next(keys), (C, D)),
        tok_w1=_dense(next(keys), (C, D)),
        tok_w2=_dense(next(keys), (C, D)),
        proj_w=_dense(next(keys), (D, c_out)),
        proj_b=jnp.zeros((c_out,), jnp.float32),
        enc=[], dec=[],
    )
    params["enc_norm_g"], params["enc_norm_b"] = ln()
    params["dec_norm_g"], params["dec_norm_b"] = ln()

    for _ in range(cfg["e_layers"]):
        w1, b1 = lin(D, dff)
        w2, b2 = lin(dff, D)
        l1g, l1b = ln()
        l2g, l2b = ln()
        params["enc"].append(dict(attn=attn(), w1=w1, b1=b1, w2=w2, b2=b2,
                                  ln1_g=l1g, ln1_b=l1b, ln2_g=l2g, ln2_b=l2b))
    for _ in range(cfg["d_layers"]):
        w1, b1 = lin(D, dff)
        w2, b2 = lin(dff, D)
        l1g, l1b = ln()
        l2g, l2b = ln()
        l3g, l3b = ln()
        params["dec"].append(dict(sattn=attn(), xattn=attn(), w1=w1, b1=b1, w2=w2, b2=b2,
                                  ln1_g=l1g, ln1_b=l1b, ln2_g=l2g, ln2_b=l2b,
                                  ln3_g=l3g, ln3_b=l3b))
    return params


def positional_encoding_np(L, d_model):
    pos = np.arange(L, dtype=np.float32)[:, None]
    div = np.exp(np.arange(0, d_model, 2, dtype=np.float32)
                 * -(math.log(10000.0) / d_model))
    pe = np.zeros((L, d_model), np.float32)
    pe[:, 0::2] = np.sin(pos * div)
    pe[:, 1::2] = np.cos(pos * div)
    return pe


def pack_params(params, cfg):
    """Pack every parameter (plus the PE table) into ONE lane-aligned f32 slab.

    Every logical block starts on an 8-row (sublane) boundary and occupies 128 lanes;
    Q/K/V weights are stored transposed and stacked per head so per-head reads in the
    kernel are 8-row-aligned sublane slices (no lane-offset slicing).
    """
    B, L = cfg["batch"], cfg["seq_len"]
    D, H, c_out = cfg["d_model"], cfg["n_heads"], cfg["c_out"]
    E = D // H
    entries = []

    def to_np(a):
        return np.asarray(jax.device_get(a), np.float32)

    def add(name, arr):
        arr = to_np(arr)
        if arr.ndim == 1:
            arr = arr[None, :]
        entries.append((name, arr))

    def add_attn(name, a):
        wqkv_t = np.concatenate([to_np(a["wq"]).T, to_np(a["wk"]).T, to_np(a["wv"]).T],
                                axis=0)                               # (3D, D)
        add(name + "_wqkvT", wqkv_t)
        add(name + "_bq_h", to_np(a["bq"]).reshape(H, E))
        add(name + "_bk_h", to_np(a["bk"]).reshape(H, E))
        add(name + "_bv_h", to_np(a["bv"]).reshape(H, E))
        add(name + "_wo", a["wo"])                                    # (D, D)
        add(name + "_bo", a["bo"])

    # Embedding: fused circular-conv taps and PE table (tiled over batch).
    add("tok_w", np.concatenate([to_np(params["tok_w0"]), to_np(params["tok_w1"]),
                                 to_np(params["tok_w2"])], axis=0))    # (3C, D)
    add("pe", np.tile(positional_encoding_np(L, D), (B, 1)))          # (B*L, D)

    for li, lp in enumerate(params["enc"]):
        pfx = f"enc{li}"
        add_attn(pfx + "_attn", lp["attn"])
        for k in ("w1", "b1", "w2", "b2", "ln1_g", "ln1_b", "ln2_g", "ln2_b"):
            add(f"{pfx}_{k}", lp[k])
    add("enc_norm_g", params["enc_norm_g"])
    add("enc_norm_b", params["enc_norm_b"])

    for li, lp in enumerate(params["dec"]):
        pfx = f"dec{li}"
        add_attn(pfx + "_sattn", lp["sattn"])
        add_attn(pfx + "_xattn", lp["xattn"])
        for k in ("w1", "b1", "w2", "b2",
                  "ln1_g", "ln1_b", "ln2_g", "ln2_b", "ln3_g", "ln3_b"):
            add(f"{pfx}_{k}", lp[k])
    add("dec_norm_g", params["dec_norm_g"])
    add("dec_norm_b", params["dec_norm_b"])

    # Final projection zero-padded to 128 lanes -> lane-dense output store in-kernel.
    pw = np.zeros((D, LANES), np.float32)
    pw[:, :c_out] = to_np(params["proj_w"])
    pb = np.zeros((1, LANES), np.float32)
    pb[:, :c_out] = to_np(params["proj_b"])
    add("proj_w", pw)
    add("proj_b", pb)

    layout = {}
    blocks = []
    row = 0
    for name, arr in entries:
        r, c = arr.shape
        assert c <= LANES, name
        rp = ((r + 7) // 8) * 8
        blk = np.zeros((rp, LANES), np.float32)
        blk[:r, :c] = arr
        layout[name] = (row, r, c)
        blocks.append(blk)
        row += rp
    slab = np.concatenate(blocks, axis=0)
    return jnp.asarray(slab), layout


# ----------------------------------------------------------------------------
# Forward wrapper: one pallas_call, two inputs (activations + packed slab)
# ----------------------------------------------------------------------------
def transformer_forward(slab, x_enc, x_mark, *, cfg, layout):
    # x_mark is unused by the reference forward (enc_embedding is called with x_enc only).
    del x_mark
    B, L, C = x_enc.shape

    # Circular-conv neighbours fused into ONE operand for a single embedding matmul.
    xm1 = jnp.roll(x_enc, 1, axis=1)
    xp1 = jnp.roll(x_enc, -1, axis=1)
    xcat = jnp.concatenate([xm1, x_enc, xp1], axis=-1).reshape(B * L, 3 * C)

    kern = functools.partial(_fused_transformer_kernel, cfg, layout)
    out_pad = pl.pallas_call(
        kern,
        out_shape=jax.ShapeDtypeStruct((B * L, LANES), jnp.float32),
        in_specs=[
            pl.BlockSpec((B * L, 3 * C), lambda: (0, 0)),
            pl.BlockSpec(slab.shape, lambda: (0, 0)),
        ],
        out_specs=pl.BlockSpec((B * L, LANES), lambda: (0, 0)),
    )(xcat, slab)

    out = out_pad[:, :cfg["c_out"]].reshape(B, L, cfg["c_out"])
    return out[:, -cfg["pred_len"]:, :]


# ----------------------------------------------------------------------------

if __name__ == "__main__":
    cfg = CFG
    key = jax.random.PRNGKey(0)
    k_params, k_x, k_m = jax.random.split(key, 3)

    params = init_params(k_params, cfg)
    slab, layout = pack_params(params, cfg)

    x_enc = jax.random.normal(
        k_x, (cfg["batch"], cfg["seq_len"], cfg["input_size"]), dtype=jnp.float32)
    x_mark = jax.random.normal(
        k_m, (cfg["batch"], cfg["seq_len"], cfg["input_size"]), dtype=jnp.float32)

    fwd = jax.jit(functools.partial(transformer_forward, cfg=cfg, layout=layout))
    out = fwd(slab, x_enc, x_mark)
    out = jax.block_until_ready(out)
    assert out.shape == (cfg["batch"], cfg["pred_len"], cfg["c_out"])
    assert bool(jnp.all(jnp.isfinite(out)))
    print("KERNEL_OK")
</pallas_src>

<mosaic_0001>
module attributes {stable_mosaic.version = 11 : i64} {
  func.func @_fused_transformer_kernel(%arg0: memref<16x12xf32, #tpu.memory_space<vmem>>, %arg1: memref<1192x128xf32, #tpu.memory_space<vmem>>, %arg2: memref<16x128xf32, #tpu.memory_space<vmem>>) attributes {dimension_semantics = [], scalar_prefetch = 0 : i64, scratch_operands = 0 : i64, tpu.core_type = #tpu.core_type<tc>} {
    %c0 = arith.constant 0 : index
    %c0_0 = arith.constant 0 : index
    %0 = vector.load %arg0[%c0, %c0_0] : memref<16x12xf32, #tpu.memory_space<vmem>>, vector<16x12xf32>
    %c0_1 = arith.constant 0 : index
    %c0_2 = arith.constant 0 : index
    %1 = vector.load %arg1[%c0_1, %c0_2] : memref<1192x128xf32, #tpu.memory_space<vmem>>, vector<12x32xf32>
    %cst = arith.constant dense<0.000000e+00> : vector<16x32xf32>
    %2 = tpu.matmul %0, %1, %cst {dimension_numbers = #tpu.dot_dimension_numbers<[1], [0], [0], [1], [0, 0, 1, 1], [], []>} : vector<16x12xf32>, vector<12x32xf32>, vector<16x32xf32> -> vector<16x32xf32>
    %c16 = arith.constant 16 : index
    %c0_3 = arith.constant 0 : index
    %3 = vector.load %arg1[%c16, %c0_3] : memref<1192x128xf32, #tpu.memory_space<vmem>>, vector<16x32xf32>
    %4 = arith.addf %2, %3 : vector<16x32xf32>
    %c32 = arith.constant 32 : index
    %c0_4 = arith.constant 0 : index
    %5 = vector.load %arg1[%c32, %c0_4] : memref<1192x128xf32, #tpu.memory_space<vmem>>, vector<8x32xf32>
    %cst_5 = arith.constant dense<0.000000e+00> : vector<16x8xf32>
    %6 = tpu.matmul %4, %5, %cst_5 {dimension_numbers = #tpu.dot_dimension_numbers<[1], [1], [0], [0], [0, 0, 1, 0], [], []>} : vector<16x32xf32>, vector<8x32xf32>, vector<16x8xf32> -> vector<16x8xf32>
    %c40 = arith.constant 40 : index
    %c0_6 = arith.constant 0 : index
    %7 = vector.load %arg1[%c40, %c0_6] : memref<1192x128xf32, #tpu.memory_space<vmem>>, vector<8x32xf32>
    %cst_7 = arith.constant dense<0.000000e+00> : vector<16x8xf32>
    %8 = tpu.matmul %4, %7, %cst_7 {dimension_numbers = #tpu.dot_dimension_numbers<[1], [1], [0], [0], [0, 0, 1, 0], [], []>} : vector<16x32xf32>, vector<8x32xf32>, vector<16x8xf32> -> vector<16x8xf32>
    %c48 = arith.constant 48 : index
    %c0_8 = arith.constant 0 : index
    %9 = vector.load %arg1[%c48, %c0_8] : memref<1192x128xf32, #tpu.memory_space<vmem>>, vector<8x32xf32>
    %cst_9 = arith.constant dense<0.000000e+00> : vector<16x8xf32>
    %10 = tpu.matmul %4, %9, %cst_9 {dimension_numbers = #tpu.dot_dimension_numbers<[1], [1], [0], [0], [0, 0, 1, 0], [], []>} : vector<16x32xf32>, vector<8x32xf32>, vector<16x8xf32> -> vector<16x8xf32>
    %c56 = arith.constant 56 : index
    %c0_10 = arith.constant 0 : index
    %11 = vector.load %arg1[%c56, %c0_10] : memref<1192x128xf32, #tpu.memory_space<vmem>>, vector<8x32xf32>
    %cst_11 = arith.constant dense<0.000000e+00> : vector<16x8xf32>
    %12 = tpu.matmul %4, %11, %cst_11 {dimension_numbers = #tpu.dot_dimension_numbers<[1], [1], [0], [0], [0, 0, 1, 0], [], []>} : vector<16x32xf32>, vector<8x32xf32>, vector<16x8xf32> -> vector<16x8xf32>
    %13 = vector.shape_cast %6 : vector<16x8xf32> to vector<1x16x8xf32>
    %14 = vector.shape_cast %8 : vector<16x8xf32> to vector<1x16x8xf32>
    %15 = vector.shape_cast %10 : vector<16x8xf32> to vector<1x16x8xf32>
    %16 = vector.shape_cast %12 : vector<16x8xf32> to vector<1x16x8xf32>
    %17 = tpu.concatenate %13, %14, %15, %16 in 0 : vector<1x16x8xf32>, vector<1x16x8xf32>, vector<1x16x8xf32>, vector<1x16x8xf32> -> vector<4x16x8xf32>
    %c64 = arith.constant 64 : index
    %c0_12 = arith.constant 0 : index
    %18 = vector.load %arg1[%c64, %c0_12] : memref<1192x128xf32, #tpu.memory_space<vmem>>, vector<8x32xf32>
    %cst_13 = arith.constant dense<0.000000e+00> : vector<16x8xf32>
    %19 = tpu.matmul %4, %18, %cst_13 {dimension_numbers = #tpu.dot_dimension_numbers<[1], [1], [0], [0], [0, 0, 1, 0], [], []>} : vector<16x32xf32>, vector<8x32xf32>, vector<16x8xf32> -> vector<16x8xf32>
    %c72 = arith.constant 72 : index
    %c0_14 = arith.constant 0 : index
    %20 = vector.load %arg1[%c72, %c0_14] : memref<1192x128xf32, #tpu.memory_space<vmem>>, vector<8x32xf32>
    %cst_15 = arith.constant dense<0.000000e+00> : vector<16x8xf32>
    %21 = tpu.matmul %4, %20, %cst_15 {dimension_numbers = #tpu.dot_dimension_numbers<[1], [1], [0], [0], [0, 0, 1, 0], [], []>} : vector<16x32xf32>, vector<8x32xf32>, vector<16x8xf32> -> vector<16x8xf32>
    %c80 = arith.constant 80 : index
    %c0_16 = arith.constant 0 : index
    %22 = vector.load %arg1[%c80, %c0_16] : memref<1192x128xf32, #tpu.memory_space<vmem>>, vector<8x32xf32>
    %cst_17 = arith.constant dense<0.000000e+00> : vector<16x8xf32>
    %23 = tpu.matmul %4, %22, %cst_17 {dimension_numbers = #tpu.dot_dimension_numbers<[1], [1], [0], [0], [0, 0, 1, 0], [], []>} : vector<16x32xf32>, vector<8x32xf32>, vector<16x8xf32> -> vector<16x8xf32>
    %c88 = arith.constant 88 : index
    %c0_18 = arith.constant 0 : index
    %24 = vector.load %arg1[%c88, %c0_18] : memref<1192x128xf32, #tpu.memory_space<vmem>>, vector<8x32xf32>
    %cst_19 = arith.constant dense<0.000000e+00> : vector<16x8xf32>
    %25 = tpu.matmul %4, %24, %cst_19 {dimension_numbers = #tpu.dot_dimension_numbers<[1], [1], [0], [0], [0, 0, 1, 0], [], []>} : vector<16x32xf32>, vector<8x32xf32>, vector<16x8xf32> -> vector<16x8xf32>
    %26 = vector.shape_cast %19 : vector<16x8xf32> to vector<1x16x8xf32>
    %27 = vector.shape_cast %21 : vector<16x8xf32> to vector<1x16x8xf32>
    %28 = vector.shape_cast %23 : vector<16x8xf32> to vector<1x16x8xf32>
    %29 = vector.shape_cast %25 : vector<16x8xf32> to vector<1x16x8xf32>
    %30 = tpu.concatenate %26, %27, %28, %29 in 0 : vector<1x16x8xf32>, vector<1x16x8xf32>, vector<1x16x8xf32>, vector<1x16x8xf32> -> vector<4x16x8xf32>
    %c96 = arith.constant 96 : index
    %c0_20 = arith.constant 0 : index
    %31 = vector.load %arg1[%c96, %c0_20] : memref<1192x128xf32, #tpu.memory_space<vmem>>, vector<8x32xf32>
    %cst_21 = arith.constant dense<0.000000e+00> : vector<16x8xf32>
    %32 = tpu.matmul %4, %31, %cst_21 {dimension_numbers = #tpu.dot_dimension_numbers<[1], [1], [0], [0], [0, 0, 1, 0], [], []>} : vector<16x32xf32>, vector<8x32xf32>, vector<16x8xf32> -> vector<16x8xf32>
    %c104 = arith.constant 104 : index
    %c0_22 = arith.constant 0 : index
    %33 = vector.load %arg1[%c104, %c0_22] : memref<1192x128xf32, #tpu.memory_space<vmem>>, vector<8x32xf32>
    %cst_23 = arith.constant dense<0.000000e+00> : vector<16x8xf32>
    %34 = tpu.matmul %4, %33, %cst_23 {dimension_numbers = #tpu.dot_dimension_numbers<[1], [1], [0], [0], [0, 0, 1, 0], [], []>} : vector<16x32xf32>, vector<8x32xf32>, vector<16x8xf32> -> vector<16x8xf32>
    %c112 = arith.constant 112 : index
    %c0_24 = arith.constant 0 : index
    %35 = vector.load %arg1[%c112, %c0_24] : memref<1192x128xf32, #tpu.memory_space<vmem>>, vector<8x32xf32>
    %cst_25 = arith.constant dense<0.000000e+00> : vector<16x8xf32>
    %36 = tpu.matmul %4, %35, %cst_25 {dimension_numbers = #tpu.dot_dimension_numbers<[1], [1], [0], [0], [0, 0, 1, 0], [], []>} : vector<16x32xf32>, vector<8x32xf32>, vector<16x8xf32> -> vector<16x8xf32>
    %c120 = arith.constant 120 : index
    %c0_26 = arith.constant 0 : index
    %37 = vector.load %arg1[%c120, %c0_26] : memref<1192x128xf32, #tpu.memory_space<vmem>>, vector<8x32xf32>
    %cst_27 = arith.constant dense<0.000000e+00> : vector<16x8xf32>
    %38 = tpu.matmul %4, %37, %cst_27 {dimension_numbers = #tpu.dot_dimension_numbers<[1], [1], [0], [0], [0, 0, 1, 0], [], []>} : vector<16x32xf32>, vector<8x32xf32>, vector<16x8xf32> -> vector<16x8xf32>
    %39 = vector.shape_cast %32 : vector<16x8xf32> to vector<1x16x8xf32>
    %40 = vector.shape_cast %34 : vector<16x8xf32> to vector<1x16x8xf32>
    %41 = vector.shape_cast %36 : vector<16x8xf32> to vector<1x16x8xf32>
    %42 = vector.shape_cast %38 : vector<16x8xf32> to vector<1x16x8xf32>
    %43 = tpu.concatenate %39, %40, %41, %42 in 0 : vector<1x16x8xf32>, vector<1x16x8xf32>, vector<1x16x8xf32>, vector<1x16x8xf32> -> vector<4x16x8xf32>
    %c128 = arith.constant 128 : index
    %c0_28 = arith.constant 0 : index
    %44 = vector.load %arg1[%c128, %c0_28] : memref<1192x128xf32, #tpu.memory_space<vmem>>, vector<4x8xf32>
    %45 = vector.shape_cast %44 : vector<4x8xf32> to vector<4x1x8xf32>
    %46 = vector.broadcast %45 : vector<4x1x8xf32> to vector<4x16x8xf32>
    %47 = arith.addf %17, %46 : vector<4x16x8xf32>
    %cst_29 = arith.constant 0.353553385 : f32
    %48 = vector.broadcast %cst_29 : f32 to vector<4x16x8xf32>
    %49 = arith.mulf %47, %48 : vector<4x16x8xf32>
    %c136 = arith.constant 136 : index
    %c0_30 = arith.constant 0 : index
    %50 = vector.load %arg1[%c136, %c0_30] : memref<1192x128xf32, #tpu.memory_space<vmem>>, vector<4x8xf32>
    %51 = vector.shape_cast %50 : vector<4x8xf32> to vector<4x1x8xf32>
    %52 = vector.broadcast %51 : vector<4x1x8xf32> to vector<4x16x8xf32>
    %53 = arith.addf %30, %52 : vector<4x16x8xf32>
    %c144 = arith.constant 144 : index
    %c0_31 = arith.constant 0 : index
    %54 = vector.load %arg1[%c144, %c0_31] : memref<1192x128xf32, #tpu.memory_space<vmem>>, vector<4x8xf32>
    %55 = vector.shape_cast %54 : vector<4x8xf32> to vector<4x1x8xf32>
    %56 = vector.broadcast %55 : vector<4x1x8xf32> to vector<4x16x8xf32>
    %57 = arith.addf %43, %56 : vector<4x16x8xf32>
    %58 = vector.shape_cast %49 : vector<4x16x8xf32> to vector<8x8x8xf32>
    %59 = vector.shape_cast %53 : vector<4x16x8xf32> to vector<8x8x8xf32>
    %60 = vector.shape_cast %57 : vector<4x16x8xf32> to vector<8x8x8xf32>
    "tpu.trace_start"() <{level = 10 : i32, message = "nqe,nke->nqk"}> : () -> ()
    %cst_32 = arith.constant dense<0.000000e+00> : vector<8x8x8xf32>
    %61 = tpu.matmul %58, %59, %cst_32 {dimension_numbers = #tpu.dot_dimension_numbers<[2], [2], [1], [1], [0, 0, 0, 1, 1, 1], [0], [0]>} : vector<8x8x8xf32>, vector<8x8x8xf32>, vector<8x8x8xf32> -> vector<8x8x8xf32>
    "tpu.trace_stop"() : () -> ()
    %cst_33 = arith.constant dense<0xFF800000> : vector<8x8xf32>
    %62 = vector.multi_reduction <maximumf>, %61, %cst_33 [2] : vector<8x8x8xf32> to vector<8x8xf32>
    %63 = vector.shape_cast %62 : vector<8x8xf32> to vector<8x8x1xf32>
    %64 = vector.broadcast %63 : vector<8x8x1xf32> to vector<8x8x8xf32>
    %65 = arith.subf %61, %64 : vector<8x8x8xf32>
    %66 = math.exp %65 : vector<8x8x8xf32>
    %cst_34 = arith.constant dense<0.000000e+00> : vector<8x8xf32>
    %67 = vector.multi_reduction <add>, %66, %cst_34 [2] : vector<8x8x8xf32> to vector<8x8xf32>
    %68 = vector.shape_cast %67 : vector<8x8xf32> to vector<8x8x1xf32>
    %69 = tpu.reciprocal %68 {approx = true} : vector<8x8x1xf32> -> vector<8x8x1xf32>
    %70 = vector.broadcast %69 : vector<8x8x1xf32> to vector<8x8x8xf32>
    %71 = arith.mulf %66, %70 : vector<8x8x8xf32>
    "tpu.trace_start"() <{level = 10 : i32, message = "nqk,nke->nqe"}> : () -> ()
    %cst_35 = arith.constant dense<0.000000e+00> : vector<8x8x8xf32>
    %72 = tpu.matmul %71, %60, %cst_35 {dimension_numbers = #tpu.dot_dimension_numbers<[2], [1], [1], [2], [0, 0, 0, 1, 1, 2], [0], [0]>} : vector<8x8x8xf32>, vector<8x8x8xf32>, vector<8x8x8xf32> -> vector<8x8x8xf32>
    "tpu.trace_stop"() : () -> ()
    %73 = vector.shape_cast %72 : vector<8x8x8xf32> to vector<4x16x8xf32>
    %74 = vector.extract_strided_slice %73 {offsets = [0, 0, 0], sizes = [1, 16, 8], strides = [1, 1, 1]} : vector<4x16x8xf32> to vector<1x16x8xf32>
    %75 = vector.shape_cast %74 : vector<1x16x8xf32> to vector<16x8xf32>
    %c152 = arith.constant 152 : index
    %c0_36 = arith.constant 0 : index
    %76 = vector.load %arg1[%c152, %c0_36] : memref<1192x128xf32, #tpu.memory_space<vmem>>, vector<8x32xf32>
    %cst_37 = arith.constant dense<0.000000e+00> : vector<16x32xf32>
    %77 = tpu.matmul %75, %76, %cst_37 {dimension_numbers = #tpu.dot_dimension_numbers<[1], [0], [0], [1], [0, 0, 1, 1], [], []>} : vector<16x8xf32>, vector<8x32xf32>, vector<16x32xf32> -> vector<16x32xf32>
    %c184 = arith.constant 184 : index
    %c0_38 = arith.constant 0 : index
    %78 = vector.load %arg1[%c184, %c0_38] : memref<1192x128xf32, #tpu.memory_space<vmem>>, vector<1x32xf32>
    %79 = vector.broadcast %78 : vector<1x32xf32> to vector<16x32xf32>
    %80 = arith.addf %77, %79 : vector<16x32xf32>
    %81 = vector.extract_strided_slice %73 {offsets = [1, 0, 0], sizes = [1, 16, 8], strides = [1, 1, 1]} : vector<4x16x8xf32> to vector<1x16x8xf32>
    %82 = vector.shape_cast %81 : vector<1x16x8xf32> to vector<16x8xf32>
    %c160 = arith.constant 160 : index
    %c0_39 = arith.constant 0 : index
    %83 = vector.load %arg1[%c160, %c0_39] : memref<1192x128xf32, #tpu.memory_space<vmem>>, vector<8x32xf32>
    %cst_40 = arith.constant dense<0.000000e+00> : vector<16x32xf32>
    %84 = tpu.matmul %82, %83, %cst_40 {dimension_numbers = #tpu.dot_dimension_numbers<[1], [0], [0], [1], [0, 0, 1, 1], [], []>} : vector<16x8xf32>, vector<8x32xf32>, vector<16x32xf32> -> vector<16x32xf32>
    %85 = arith.addf %80, %84 : vector<16x32xf32>
    %86 = vector.extract_strided_slice %73 {offsets = [2, 0, 0], sizes = [1, 16, 8], strides = [1, 1, 1]} : vector<4x16x8xf32> to vector<1x16x8xf32>
    %87 = vector.shape_cast %86 : vector<1x16x8xf32> to vector<16x8xf32>
    %c168 = arith.constant 168 : index
    %c0_41 = arith.constant 0 : index
    %88 = vector.load %arg1[%c168, %c0_41] : memref<1192x128xf32, #tpu.memory_space<vmem>>, vector<8x32xf32>
    %cst_42 = arith.constant dense<0.000000e+00> : vector<16x32xf32>
    %89 = tpu.matmul %87, %88, %cst_42 {dimension_numbers = #tpu.dot_dimension_numbers<[1], [0], [0], [1], [0, 0, 1, 1], [], []>} : vector<16x8xf32>, vector<8x32xf32>, vector<16x32xf32> -> vector<16x32xf32>
    %90 = arith.addf %85, %89 : vector<16x32xf32>
    %91 = vector.extract_strided_slice %73 {offsets = [3, 0, 0], sizes = [1, 16, 8], strides = [1, 1, 1]} : vector<4x16x8xf32> to vector<1x16x8xf32>
    %92 = vector.shape_cast %91 : vector<1x16x8xf32> to vector<16x8xf32>
    %c176 = arith.constant 176 : index
    %c0_43 = arith.constant 0 : index
    %93 = vector.load %arg1[%c176, %c0_43] : memref<1192x128xf32, #tpu.memory_space<vmem>>, vector<8x32xf32>
    %cst_44 = arith.constant dense<0.000000e+00> : vector<16x32xf32>
    %94 = tpu.matmul %92, %93, %cst_44 {dimension_numbers = #tpu.dot_dimension_numbers<[1], [0], [0], [1], [0, 0, 1, 1], [], []>} : vector<16x8xf32>, vector<8x32xf32>, vector<16x32xf32> -> vector<16x32xf32>
    %95 = arith.addf %90, %94 : vector<16x32xf32>
    %96 = arith.addf %4, %95 : vector<16x32xf32>
    %c304 = arith.constant 304 : index
    %c0_45 = arith.constant 0 : index
    %97 = vector.load %arg1[%c304, %c0_45] : memref<1192x128xf32, #tpu.memory_space<vmem>>, vector<1x32xf32>
    %c312 = arith.constant 312 : index
    %c0_46 = arith.constant 0 : index
    %98 = vector.load %arg1[%c312, %c0_46] : memref<1192x128xf32, #tpu.memory_space<vmem>>, vector<1x32xf32>
    %cst_47 = arith.constant dense<0.000000e+00> : vector<16xf32>
    %99 = vector.multi_reduction <add>, %96, %cst_47 [1] : vector<16x32xf32> to vector<16xf32>
    %100 = vector.shape_cast %99 : vector<16xf32> to vector<16x1xf32>
    %cst_48 = arith.constant 3.200000e+01 : f32
    %101 = vector.broadcast %cst_48 : f32 to vector<16x1xf32>
    %102 = arith.divf %100, %101 : vector<16x1xf32>
    %103 = vector.broadcast %102 : vector<16x1xf32> to vector<16x32xf32>
    %104 = arith.subf %96, %103 : vector<16x32xf32>
    %105 = arith.mulf %104, %104 : vector<16x32xf32>
    %cst_49 = arith.constant dense<0.000000e+00> : vector<16xf32>
    %106 = vector.multi_reduction <add>, %105, %cst_49 [1] : vector<16x32xf32> to vector<16xf32>
    %107 = vector.shape_cast %106 : vector<16xf32> to vector<16x1xf32>
    %cst_50 = arith.constant 3.200000e+01 : f32
    %108 = vector.broadcast %cst_50 : f32 to vector<16x1xf32>
    %109 = arith.divf %107, %108 : vector<16x1xf32>
    %110 = vector.broadcast %102 : vector<16x1xf32> to vector<16x32xf32>
    %111 = arith.subf %96, %110 : vector<16x32xf32>
    %cst_51 = arith.constant 9.99999974E-6 : f32
    %112 = vector.broadcast %cst_51 : f32 to vector<16x1xf32>
    %113 = arith.addf %109, %112 : vector<16x1xf32>
    %114 = math.rsqrt %113 : vector<16x1xf32>
    %115 = vector.broadcast %114 : vector<16x1xf32> to vector<16x32xf32>
    %116 = arith.mulf %111, %115 : vector<16x32xf32>
    %117 = vector.broadcast %97 : vector<1x32xf32> to vector<16x32xf32>
    %118 = arith.mulf %116, %117 : vector<16x32xf32>
    %119 = vector.broadcast %98 : vector<1x32xf32> to vector<16x32xf32>
    %120 = arith.addf %118, %119 : vector<16x32xf32>
    %c192 = arith.constant 192 : index
    %c0_52 = arith.constant 0 : index
    %121 = vector.load %arg1[%c192, %c0_52] : memref<1192x128xf32, #tpu.memory_space<vmem>>, vector<32x64xf32>
    %cst_53 = arith.constant dense<0.000000e+00> : vector<16x64xf32>
    %122 = tpu.matmul %120, %121, %cst_53 {dimension_numbers = #tpu.dot_dimension_numbers<[1], [0], [0], [1], [0, 0, 1, 1], [], []>} : vector<16x32xf32>, vector<32x64xf32>, vector<16x64xf32> -> vector<16x64xf32>
    %c224 = arith.constant 224 : index
    %c0_54 = arith.constant 0 : index
    %123 = vector.load %arg1[%c224, %c0_54] : memref<1192x128xf32, #tpu.memory_space<vmem>>, vector<1x64xf32>
    %124 = vector.broadcast %123 : vector<1x64xf32> to vector<16x64xf32>
    %125 = arith.addf %122, %124 : vector<16x64xf32>
    %cst_55 = arith.constant 0.000000e+00 : f32
    %126 = vector.broadcast %cst_55 : f32 to vector<16x64xf32>
    %127 = arith.maximumf %125, %126 : vector<16x64xf32>
    %c232 = arith.constant 232 : index
    %c0_56 = arith.constant 0 : index
    %128 = vector.load %arg1[%c232, %c0_56] : memref<1192x128xf32, #tpu.memory_space<vmem>>, vector<64x32xf32>
    %cst_57 = arith.constant dense<0.000000e+00> : vector<16x32xf32>
    %129 = tpu.matmul %127, %128, %cst_57 {dimension_numbers = #tpu.dot_dimension_numbers<[1], [0], [0], [1], [0, 0, 1, 1], [], []>} : vector<16x64xf32>, vector<64x32xf32>, vector<16x32xf32> -> vector<16x32xf32>
    %c296 = arith.constant 296 : index
    %c0_58 = arith.constant 0 : index
    %130 = vector.load %arg1[%c296, %c0_58] : memref<1192x128xf32, #tpu.memory_space<vmem>>, vector<1x32xf32>
    %131 = vector.broadcast %130 : vector<1x32xf32> to vector<16x32xf32>
    %132 = arith.addf %129, %131 : vector<16x32xf32>
    %133 = arith.addf %120, %132 : vector<16x32xf32>
    %c320 = arith.constant 320 : index
    %c0_59 = arith.constant 0 : index
    %134 = vector.load %arg1[%c320, %c0_59] : memref<1192x128xf32, #tpu.memory_space<vmem>>, vector<1x32xf32>
    %c328 = arith.constant 328 : index
    %c0_60 = arith.constant 0 : index
    %135 = vector.load %arg1[%c328, %c0_60] : memref<1192x128xf32, #tpu.memory_space<vmem>>, vector<1x32xf32>
    %cst_61 = arith.constant dense<0.000000e+00> : vector<16xf32>
    %136 = vector.multi_reduction <add>, %133, %cst_61 [1] : vector<16x32xf32> to vector<16xf32>
    %137 = vector.shape_cast %136 : vector<16xf32> to vector<16x1xf32>
    %cst_62 = arith.constant 3.200000e+01 : f32
    %138 = vector.broadcast %cst_62 : f32 to vector<16x1xf32>
    %139 = arith.divf %137, %138 : vector<16x1xf32>
    %140 = vector.broadcast %139 : vector<16x1xf32> to vector<16x32xf32>
    %141 = arith.subf %133, %140 : vector<16x32xf32>
    %142 = arith.mulf %141, %141 : vector<16x32xf32>
    %cst_63 = arith.constant dense<0.000000e+00> : vector<16xf32>
    %143 = vector.multi_reduction <add>, %142, %cst_63 [1] : vector<16x32xf32> to vector<16xf32>
    %144 = vector.shape_cast %143 : vector<16xf32> to vector<16x1xf32>
    %cst_64 = arith.constant 3.200000e+01 : f32
    %145 = vector.broadcast %cst_64 : f32 to vector<16x1xf32>
    %146 = arith.divf %144, %145 : vector<16x1xf32>
    %147 = vector.broadcast %139 : vector<16x1xf32> to vector<16x32xf32>
    %148 = arith.subf %133, %147 : vector<16x32xf32>
    %cst_65 = arith.constant 9.99999974E-6 : f32
    %149 = vector.broadcast %cst_65 : f32 to vector<16x1xf32>
    %150 = arith.addf %146, %149 : vector<16x1xf32>
    %151 = math.rsqrt %150 : vector<16x1xf32>
    %152 = vector.broadcast %151 : vector<16x1xf32> to vector<16x32xf32>
    %153 = arith.mulf %148, %152 : vector<16x32xf32>
    %154 = vector.broadcast %134 : vector<1x32xf32> to vector<16x32xf32>
    %155 = arith.mulf %153, %154 : vector<16x32xf32>
    %156 = vector.broadcast %135 : vector<1x32xf32> to vector<16x32xf32>
    %157 = arith.addf %155, %156 : vector<16x32xf32>
    %c336 = arith.constant 336 : index
    %c0_66 = arith.constant 0 : index
    %158 = vector.load %arg1[%c336, %c0_66] : memref<1192x128xf32, #tpu.memory_space<vmem>>, vector<8x32xf32>
    %cst_67 = arith.constant dense<0.000000e+00> : vector<16x8xf32>
    %159 = tpu.matmul %157, %158, %cst_67 {dimension_numbers = #tpu.dot_dimension_numbers<[1], [1], [0], [0], [0, 0, 1, 0], [], []>} : vector<16x32xf32>, vector<8x32xf32>, vector<16x8xf32> -> vector<16x8xf32>
    %c344 = arith.constant 344 : index
    %c0_68 = arith.constant 0 : index
    %160 = vector.load %arg1[%c344, %c0_68] : memref<1192x128xf32, #tpu.memory_space<vmem>>, vector<8x32xf32>
    %cst_69 = arith.constant dense<0.000000e+00> : vector<16x8xf32>
    %161 = tpu.matmul %157, %160, %cst_69 {dimension_numbers = #tpu.dot_dimension_numbers<[1], [1], [0], [0], [0, 0, 1, 0], [], []>} : vector<16x32xf32>, vector<8x32xf32>, vector<16x8xf32> -> vector<16x8xf32>
    %c352 = arith.constant 352 : index
    %c0_70 = arith.constant 0 : index
    %162 = vector.load %arg1[%c352, %c0_70] : memref<1192x128xf32, #tpu.memory_space<vmem>>, vector<8x32xf32>
    %cst_71 = arith.constant dense<0.000000e+00> : vector<16x8xf32>
    %163 = tpu.matmul %157, %162, %cst_71 {dimension_numbers = #tpu.dot_dimension_numbers<[1], [1], [0], [0], [0, 0, 1, 0], [], []>} : vector<16x32xf32>, vector<8x32xf32>, vector<16x8xf32> -> vector<16x8xf32>
    %c360 = arith.constant 360 : index
    %c0_72 = arith.constant 0 : index
    %164 = vector.load %arg1[%c360, %c0_72] : memref<1192x128xf32, #tpu.memory_space<vmem>>, vector<8x32xf32>
    %cst_73 = arith.constant dense<0.000000e+00> : vector<16x8xf32>
    %165 = tpu.matmul %157, %164, %cst_73 {dimension_numbers = #tpu.dot_dimension_numbers<[1], [1], [0], [0], [0, 0, 1, 0], [], []>} : vector<16x32xf32>, vector<8x32xf32>, vector<16x8xf32> -> vector<16x8xf32>
    %166 = vector.shape_cast %159 : vector<16x8xf32> to vector<1x16x8xf32>
    %167 = vector.shape_cast %161 : vector<16x8xf32> to vector<1x16x8xf32>
    %168 = vector.shape_cast %163 : vector<16x8xf32> to vector<1x16x8xf32>
    %169 = vector.shape_cast %165 : vector<16x8xf32> to vector<1x16x8xf32>
    %170 = tpu.concatenate %166, %167, %168, %169 in 0 : vector<1x16x8xf32>, vector<1x16x8xf32>, vector<1x16x8xf32>, vector<1x16x8xf32> -> vector<4x16x8xf32>
    %c368 = arith.constant 368 : index
    %c0_74 = arith.constant 0 : index
    %171 = vector.load %arg1[%c368, %c0_74] : memref<1192x128xf32, #tpu.memory_space<vmem>>, vector<8x32xf32>
    %cst_75 = arith.constant dense<0.000000e+00> : vector<16x8xf32>
    %172 = tpu.matmul %157, %171, %cst_75 {dimension_numbers = #tpu.dot_dimension_numbers<[1], [1], [0], [0], [0, 0, 1, 0], [], []>} : vector<16x32xf32>, vector<8x32xf32>, vector<16x8xf32> -> vector<16x8xf32>
    %c376 = arith.constant 376 : index
    %c0_76 = arith.constant 0 : index
    %173 = vector.load %arg1[%c376, %c0_76] : memref<1192x128xf32, #tpu.memory_space<vmem>>, vector<8x32xf32>
    %cst_77 = arith.constant dense<0.000000e+00> : vector<16x8xf32>
    %174 = tpu.matmul %157, %173, %cst_77 {dimension_numbers = #tpu.dot_dimension_numbers<[1], [1], [0], [0], [0, 0, 1, 0], [], []>} : vector<16x32xf32>, vector<8x32xf32>, vector<16x8xf32> -> vector<16x8xf32>
    %c384 = arith.constant 384 : index
    %c0_78 = arith.constant 0 : index
    %175 = vector.load %arg1[%c384, %c0_78] : memref<1192x128xf32, #tpu.memory_space<vmem>>, vector<8x32xf32>
    %cst_79 = arith.constant dense<0.000000e+00> : vector<16x8xf32>
    %176 = tpu.matmul %157, %175, %cst_79 {dimension_numbers = #tpu.dot_dimension_numbers<[1], [1], [0], [0], [0, 0, 1, 0], [], []>} : vector<16x32xf32>, vector<8x32xf32>, vector<16x8xf32> -> vector<16x8xf32>
    %c392 = arith.constant 392 : index
    %c0_80 = arith.constant 0 : index
    %177 = vector.load %arg1[%c392, %c0_80] : memref<1192x128xf32, #tpu.memory_space<vmem>>, vector<8x32xf32>
    %cst_81 = arith.constant dense<0.000000e+00> : vector<16x8xf32>
    %178 = tpu.matmul %157, %177, %cst_81 {dimension_numbers = #tpu.dot_dimension_numbers<[1], [1], [0], [0], [0, 0, 1, 0], [], []>} : vector<16x32xf32>, vector<8x32xf32>, vector<16x8xf32> -> vector<16x8xf32>
    %179 = vector.shape_cast %172 : vector<16x8xf32> to vector<1x16x8xf32>
    %180 = vector.shape_cast %174 : vector<16x8xf32> to vector<1x16x8xf32>
    %181 = vector.shape_cast %176 : vector<16x8xf32> to vector<1x16x8xf32>
    %182 = vector.shape_cast %178 : vector<16x8xf32> to vector<1x16x8xf32>
    %183 = tpu.concatenate %179, %180, %181, %182 in 0 : vector<1x16x8xf32>, vector<1x16x8xf32>, vector<1x16x8xf32>, vector<1x16x8xf32> -> vector<4x16x8xf32>
    %c400 = arith.constant 400 : index
    %c0_82 = arith.constant 0 : index
    %184 = vector.load %arg1[%c400, %c0_82] : memref<1192x128xf32, #tpu.memory_space<vmem>>, vector<8x32xf32>
    %cst_83 = arith.constant dense<0.000000e+00> : vector<16x8xf32>
    %185 = tpu.matmul %157, %184, %cst_83 {dimension_numbers = #tpu.dot_dimension_numbers<[1], [1], [0], [0], [0, 0, 1, 0], [], []>} : vector<16x32xf32>, vector<8x32xf32>, vector<16x8xf32> -> vector<16x8xf32>
    %c408 = arith.constant 408 : index
    %c0_84 = arith.constant 0 : index
    %186 = vector.load %arg1[%c408, %c0_84] : memref<1192x128xf32, #tpu.memory_space<vmem>>, vector<8x32xf32>
    %cst_85 = arith.constant dense<0.000000e+00> : vector<16x8xf32>
    %187 = tpu.matmul %157, %186, %cst_85 {dimension_numbers = #tpu.dot_dimension_numbers<[1], [1], [0], [0], [0, 0, 1, 0], [], []>} : vector<16x32xf32>, vector<8x32xf32>, vector<16x8xf32> -> vector<16x8xf32>
    %c416 = arith.constant 416 : index
    %c0_86 = arith.constant 0 : index
    %188 = vector.load %arg1[%c416, %c0_86] : memref<1192x128xf32, #tpu.memory_space<vmem>>, vector<8x32xf32>
    %cst_87 = arith.constant dense<0.000000e+00> : vector<16x8xf32>
    %189 = tpu.matmul %157, %188, %cst_87 {dimension_numbers = #tpu.dot_dimension_numbers<[1], [1], [0], [0], [0, 0, 1, 0], [], []>} : vector<16x32xf32>, vector<8x32xf32>, vector<16x8xf32> -> vector<16x8xf32>
    %c424 = arith.constant 424 : index
    %c0_88 = arith.constant 0 : index
    %190 = vector.load %arg1[%c424, %c0_88] : memref<1192x128xf32, #tpu.memory_space<vmem>>, vector<8x32xf32>
    %cst_89 = arith.constant dense<0.000000e+00> : vector<16x8xf32>
    %191 = tpu.matmul %157, %190, %cst_89 {dimension_numbers = #tpu.dot_dimension_numbers<[1], [1], [0], [0], [0, 0, 1, 0], [], []>} : vector<16x32xf32>, vector<8x32xf32>, vector<16x8xf32> -> vector<16x8xf32>
    %192 = vector.shape_cast %185 : vector<16x8xf32> to vector<1x16x8xf32>
    %193 = vector.shape_cast %187 : vector<16x8xf32> to vector<1x16x8xf32>
    %194 = vector.shape_cast %189 : vector<16x8xf32> to vector<1x16x8xf32>
    %195 = vector.shape_cast %191 : vector<16x8xf32> to vector<1x16x8xf32>
    %196 = tpu.concatenate %192, %193, %194, %195 in 0 : vector<1x16x8xf32>, vector<1x16x8xf32>, vector<1x16x8xf32>, vector<1x16x8xf32> -> vector<4x16x8xf32>
    %c432 = arith.constant 432 : index
    %c0_90 = arith.constant 0 : index
    %197 = vector.load %arg1[%c432, %c0_90] : memref<1192x128xf32, #tpu.memory_space<vmem>>, vector<4x8xf32>
    %198 = vector.shape_cast %197 : vector<4x8xf32> to vector<4x1x8xf32>
    %199 = vector.broadcast %198 : vector<4x1x8xf32> to vector<4x16x8xf32>
    %200 = arith.addf %170, %199 : vector<4x16x8xf32>
    %cst_91 = arith.constant 0.353553385 : f32
    %201 = vector.broadcast %cst_91 : f32 to vector<4x16x8xf32>
    %202 = arith.mulf %200, %201 : vector<4x16x8xf32>
    %c440 = arith.constant 440 : index
    %c0_92 = arith.constant 0 : index
    %203 = vector.load %arg1[%c440, %c0_92] : memref<1192x128xf32, #tpu.memory_space<vmem>>, vector<4x8xf32>
    %204 = vector.shape_cast %203 : vector<4x8xf32> to vector<4x1x8xf32>
    %205 = vector.broadcast %204 : vector<4x1x8xf32> to vector<4x16x8xf32>
    %206 = arith.addf %183, %205 : vector<4x16x8xf32>
    %c448 = arith.constant 448 : index
    %c0_93 = arith.constant 0 : index
    %207 = vector.load %arg1[%c448, %c0_93] : memref<1192x128xf32, #tpu.memory_space<vmem>>, vector<4x8xf32>
    %208 = vector.shape_cast %207 : vector<4x8xf32> to vector<4x1x8xf32>
    %209 = vector.broadcast %208 : vector<4x1x8xf32> to vector<4x16x8xf32>
    %210 = arith.addf %196, %209 : vector<4x16x8xf32>
    %211 = vector.shape_cast %202 : vector<4x16x8xf32> to vector<8x8x8xf32>
    %212 = vector.shape_cast %206 : vector<4x16x8xf32> to vector<8x8x8xf32>
    %213 = vector.shape_cast %210 : vector<4x16x8xf32> to vector<8x8x8xf32>
    "tpu.trace_start"() <{level = 10 : i32, message = "nqe,nke->nqk"}> : () -> ()
    %cst_94 = arith.constant dense<0.000000e+00> : vector<8x8x8xf32>
    %214 = tpu.matmul %211, %212, %cst_94 {dimension_numbers = #tpu.dot_dimension_numbers<[2], [2], [1], [1], [0, 0, 0, 1, 1, 1], [0], [0]>} : vector<8x8x8xf32>, vector<8x8x8xf32>, vector<8x8x8xf32> -> vector<8x8x8xf32>
    "tpu.trace_stop"() : () -> ()
    %cst_95 = arith.constant dense<0xFF800000> : vector<8x8xf32>
    %215 = vector.multi_reduction <maximumf>, %214, %cst_95 [2] : vector<8x8x8xf32> to vector<8x8xf32>
    %216 = vector.shape_cast %215 : vector<8x8xf32> to vector<8x8x1xf32>
    %217 = vector.broadcast %216 : vector<8x8x1xf32> to vector<8x8x8xf32>
    %218 = arith.subf %214, %217 : vector<8x8x8xf32>
    %219 = math.exp %218 : vector<8x8x8xf32>
    %cst_96 = arith.constant dense<0.000000e+00> : vector<8x8xf32>
    %220 = vector.multi_reduction <add>, %219, %cst_96 [2] : vector<8x8x8xf32> to vector<8x8xf32>
    %221 = vector.shape_cast %220 : vector<8x8xf32> to vector<8x8x1xf32>
    %222 = tpu.reciprocal %221 {approx = true} : vector<8x8x1xf32> -> vector<8x8x1xf32>
    %223 = vector.broadcast %222 : vector<8x8x1xf32> to vector<8x8x8xf32>
    %224 = arith.mulf %219, %223 : vector<8x8x8xf32>
    "tpu.trace_start"() <{level = 10 : i32, message = "nqk,nke->nqe"}> : () -> ()
    %cst_97 = arith.constant dense<0.000000e+00> : vector<8x8x8xf32>
    %225 = tpu.matmul %224, %213, %cst_97 {dimension_numbers = #tpu.dot_dimension_numbers<[2], [1], [1], [2], [0, 0, 0, 1, 1, 2], [0], [0]>} : vector<8x8x8xf32>, vector<8x8x8xf32>, vector<8x8x8xf32> -> vector<8x8x8xf32>
    "tpu.trace_stop"() : () -> ()
    %226 = vector.shape_cast %225 : vector<8x8x8xf32> to vector<4x16x8xf32>
    %227 = vector.extract_strided_slice %226 {offsets = [0, 0, 0], sizes = [1, 16, 8], strides = [1, 1, 1]} : vector<4x16x8xf32> to vector<1x16x8xf32>
    %228 = vector.shape_cast %227 : vector<1x16x8xf32> to vector<16x8xf32>
    %c456 = arith.constant 456 : index
    %c0_98 = arith.constant 0 : index
    %229 = vector.load %arg1[%c456, %c0_98] : memref<1192x128xf32, #tpu.memory_space<vmem>>, vector<8x32xf32>
    %cst_99 = arith.constant dense<0.000000e+00> : vector<16x32xf32>
    %230 = tpu.matmul %228, %229, %cst_99 {dimension_numbers = #tpu.dot_dimension_numbers<[1], [0], [0], [1], [0, 0, 1, 1], [], []>} : vector<16x8xf32>, vector<8x32xf32>, vector<16x32xf32> -> vector<16x32xf32>
    %c488 = arith.constant 488 : index
    %c0_100 = arith.constant 0 : index
    %231 = vector.load %arg1[%c488, %c0_100] : memref<1192x128xf32, #tpu.memory_space<vmem>>, vector<1x32xf32>
    %232 = vector.broadcast %231 : vector<1x32xf32> to vector<16x32xf32>
    %233 = arith.addf %230, %232 : vector<16x32xf32>
    %234 = vector.extract_strided_slice %226 {offsets = [1, 0, 0], sizes = [1, 16, 8], strides = [1, 1, 1]} : vector<4x16x8xf32> to vector<1x16x8xf32>
    %235 = vector.shape_cast %234 : vector<1x16x8xf32> to vector<16x8xf32>
    %c464 = arith.constant 464 : index
    %c0_101 = arith.constant 0 : index
    %236 = vector.load %arg1[%c464, %c0_101] : memref<1192x128xf32, #tpu.memory_space<vmem>>, vector<8x32xf32>
    %cst_102 = arith.constant dense<0.000000e+00> : vector<16x32xf32>
    %237 = tpu.matmul %235, %236, %cst_102 {dimension_numbers = #tpu.dot_dimension_numbers<[1], [0], [0], [1], [0, 0, 1, 1], [], []>} : vector<16x8xf32>, vector<8x32xf32>, vector<16x32xf32> -> vector<16x32xf32>
    %238 = arith.addf %233, %237 : vector<16x32xf32>
    %239 = vector.extract_strided_slice %226 {offsets = [2, 0, 0], sizes = [1, 16, 8], strides = [1, 1, 1]} : vector<4x16x8xf32> to vector<1x16x8xf32>
    %240 = vector.shape_cast %239 : vector<1x16x8xf32> to vector<16x8xf32>
    %c472 = arith.constant 472 : index
    %c0_103 = arith.constant 0 : index
    %241 = vector.load %arg1[%c472, %c0_103] : memref<1192x128xf32, #tpu.memory_space<vmem>>, vector<8x32xf32>
    %cst_104 = arith.constant dense<0.000000e+00> : vector<16x32xf32>
    %242 = tpu.matmul %240, %241, %cst_104 {dimension_numbers = #tpu.dot_dimension_numbers<[1], [0], [0], [1], [0, 0, 1, 1], [], []>} : vector<16x8xf32>, vector<8x32xf32>, vector<16x32xf32> -> vector<16x32xf32>
    %243 = arith.addf %238, %242 : vector<16x32xf32>
    %244 = vector.extract_strided_slice %226 {offsets = [3, 0, 0], sizes = [1, 16, 8], strides = [1, 1, 1]} : vector<4x16x8xf32> to vector<1x16x8xf32>
    %245 = vector.shape_cast %244 : vector<1x16x8xf32> to vector<16x8xf32>
    %c480 = arith.constant 480 : index
    %c0_105 = arith.constant 0 : index
    %246 = vector.load %arg1[%c480, %c0_105] : memref<1192x128xf32, #tpu.memory_space<vmem>>, vector<8x32xf32>
    %cst_106 = arith.constant dense<0.000000e+00> : vector<16x32xf32>
    %247 = tpu.matmul %245, %246, %cst_106 {dimension_numbers = #tpu.dot_dimension_numbers<[1], [0], [0], [1], [0, 0, 1, 1], [], []>} : vector<16x8xf32>, vector<8x32xf32>, vector<16x32xf32> -> vector<16x32xf32>
    %248 = arith.addf %243, %247 : vector<16x32xf32>
    %249 = arith.addf %157, %248 : vector<16x32xf32>
    %c608 = arith.constant 608 : index
    %c0_107 = arith.constant 0 : index
    %250 = vector.load %arg1[%c608, %c0_107] : memref<1192x128xf32, #tpu.memory_space<vmem>>, vector<1x32xf32>
    %c616 = arith.constant 616 : index
    %c0_108 = arith.constant 0 : index
    %251 = vector.load %arg1[%c616, %c0_108] : memref<1192x128xf32, #tpu.memory_space<vmem>>, vector<1x32xf32>
    %cst_109 = arith.constant dense<0.000000e+00> : vector<16xf32>
    %252 = vector.multi_reduction <add>, %249, %cst_109 [1] : vector<16x32xf32> to vector<16xf32>
    %253 = vector.shape_cast %252 : vector<16xf32> to vector<16x1xf32>
    %cst_110 = arith.constant 3.200000e+01 : f32
    %254 = vector.broadcast %cst_110 : f32 to vector<16x1xf32>
    %255 = arith.divf %253, %254 : vector<16x1xf32>
    %256 = vector.broadcast %255 : vector<16x1xf32> to vector<16x32xf32>
    %257 = arith.subf %249, %256 : vector<16x32xf32>
    %258 = arith.mulf %257, %257 : vector<16x32xf32>
    %cst_111 = arith.constant dense<0.000000e+00> : vector<16xf32>
    %259 = vector.multi_reduction <add>, %258, %cst_111 [1] : vector<16x32xf32> to vector<16xf32>
    %260 = vector.shape_cast %259 : vector<16xf32> to vector<16x1xf32>
    %cst_112 = arith.constant 3.200000e+01 : f32
    %261 = vector.broadcast %cst_112 : f32 to vector<16x1xf32>
    %262 = arith.divf %260, %261 : vector<16x1xf32>
    %263 = vector.broadcast %255 : vector<16x1xf32> to vector<16x32xf32>
    %264 = arith.subf %249, %263 : vector<16x32xf32>
    %cst_113 = arith.constant 9.99999974E-6 : f32
    %265 = vector.broadcast %cst_113 : f32 to vector<16x1xf32>
    %266 = arith.addf %262, %265 : vector<16x1xf32>
    %267 = math.rsqrt %266 : vector<16x1xf32>
    %268 = vector.broadcast %267 : vector<16x1xf32> to vector<16x32xf32>
    %269 = arith.mulf %264, %268 : vector<16x32xf32>
    %270 = vector.broadcast %250 : vector<1x32xf32> to vector<16x32xf32>
    %271 = arith.mulf %269, %270 : vector<16x32xf32>
    %272 = vector.broadcast %251 : vector<1x32xf32> to vector<16x32xf32>
    %273 = arith.addf %271, %272 : vector<16x32xf32>
    %c496 = arith.constant 496 : index
    %c0_114 = arith.constant 0 : index
    %274 = vector.load %arg1[%c496, %c0_114] : memref<1192x128xf32, #tpu.memory_space<vmem>>, vector<32x64xf32>
    %cst_115 = arith.constant dense<0.000000e+00> : vector<16x64xf32>
    %275 = tpu.matmul %273, %274, %cst_115 {dimension_numbers = #tpu.dot_dimension_numbers<[1], [0], [0], [1], [0, 0, 1, 1], [], []>} : vector<16x32xf32>, vector<32x64xf32>, vector<16x64xf32> -> vector<16x64xf32>
    %c528 = arith.constant 528 : index
    %c0_116 = arith.constant 0 : index
    %276 = vector.load %arg1[%c528, %c0_116] : memref<1192x128xf32, #tpu.memory_space<vmem>>, vector<1x64xf32>
    %277 = vector.broadcast %276 : vector<1x64xf32> to vector<16x64xf32>
    %278 = arith.addf %275, %277 : vector<16x64xf32>
    %cst_117 = arith.constant 0.000000e+00 : f32
    %279 = vector.broadcast %cst_117 : f32 to vector<16x64xf32>
    %280 = arith.maximumf %278, %279 : vector<16x64xf32>
    %c536 = arith.constant 536 : index
    %c0_118 = arith.constant 0 : index
    %281 = vector.load %arg1[%c536, %c0_118] : memref<1192x128xf32, #tpu.memory_space<vmem>>, vector<64x32xf32>
    %cst_119 = arith.constant dense<0.000000e+00> : vector<16x32xf32>
    %282 = tpu.matmul %280, %281, %cst_119 {dimension_numbers = #tpu.dot_dimension_numbers<[1], [0], [0], [1], [0, 0, 1, 1], [], []>} : vector<16x64xf32>, vector<64x32xf32>, vector<16x32xf32> -> vector<16x32xf32>
    %c600 = arith.constant 600 : index
    %c0_120 = arith.constant 0 : index
    %283 = vector.load %arg1[%c600, %c0_120] : memref<1192x128xf32, #tpu.memory_space<vmem>>, vector<1x32xf32>
    %284 = vector.broadcast %283 : vector<1x32xf32> to vector<16x32xf32>
    %285 = arith.addf %282, %284 : vector<16x32xf32>
    %286 = arith.addf %273, %285 : vector<16x32xf32>
    %c624 = arith.constant 624 : index
    %c0_121 = arith.constant 0 : index
    %287 = vector.load %arg1[%c624, %c0_121] : memref<1192x128xf32, #tpu.memory_space<vmem>>, vector<1x32xf32>
    %c632 = arith.constant 632 : index
    %c0_122 = arith.constant 0 : index
    %288 = vector.load %arg1[%c632, %c0_122] : memref<1192x128xf32, #tpu.memory_space<vmem>>, vector<1x32xf32>
    %cst_123 = arith.constant dense<0.000000e+00> : vector<16xf32>
    %289 = vector.multi_reduction <add>, %286, %cst_123 [1] : vector<16x32xf32> to vector<16xf32>
    %290 = vector.shape_cast %289 : vector<16xf32> to vector<16x1xf32>
    %cst_124 = arith.constant 3.200000e+01 : f32
    %291 = vector.broadcast %cst_124 : f32 to vector<16x1xf32>
    %292 = arith.divf %290, %291 : vector<16x1xf32>
    %293 = vector.broadcast %292 : vector<16x1xf32> to vector<16x32xf32>
    %294 = arith.subf %286, %293 : vector<16x32xf32>
    %295 = arith.mulf %294, %294 : vector<16x32xf32>
    %cst_125 = arith.constant dense<0.000000e+00> : vector<16xf32>
    %296 = vector.multi_reduction <add>, %295, %cst_125 [1] : vector<16x32xf32> to vector<16xf32>
    %297 = vector.shape_cast %296 : vector<16xf32> to vector<16x1xf32>
    %cst_126 = arith.constant 3.200000e+01 : f32
    %298 = vector.broadcast %cst_126 : f32 to vector<16x1xf32>
    %299 = arith.divf %297, %298 : vector<16x1xf32>
    %300 = vector.broadcast %292 : vector<16x1xf32> to vector<16x32xf32>
    %301 = arith.subf %286, %300 : vector<16x32xf32>
    %cst_127 = arith.constant 9.99999974E-6 : f32
    %302 = vector.broadcast %cst_127 : f32 to vector<16x1xf32>
    %303 = arith.addf %299, %302 : vector<16x1xf32>
    %304 = math.rsqrt %303 : vector<16x1xf32>
    %305 = vector.broadcast %304 : vector<16x1xf32> to vector<16x32xf32>
    %306 = arith.mulf %301, %305 : vector<16x32xf32>
    %307 = vector.broadcast %287 : vector<1x32xf32> to vector<16x32xf32>
    %308 = arith.mulf %306, %307 : vector<16x32xf32>
    %309 = vector.broadcast %288 : vector<1x32xf32> to vector<16x32xf32>
    %310 = arith.addf %308, %309 : vector<16x32xf32>
    %c640 = arith.constant 640 : index
    %c0_128 = arith.constant 0 : index
    %311 = vector.load %arg1[%c640, %c0_128] : memref<1192x128xf32, #tpu.memory_space<vmem>>, vector<1x32xf32>
    %c648 = arith.constant 648 : index
    %c0_129 = arith.constant 0 : index
    %312 = vector.load %arg1[%c648, %c0_129] : memref<1192x128xf32, #tpu.memory_space<vmem>>, vector<1x32xf32>
    %cst_130 = arith.constant dense<0.000000e+00> : vector<16xf32>
    %313 = vector.multi_reduction <add>, %310, %cst_130 [1] : vector<16x32xf32> to vector<16xf32>
    %314 = vector.shape_cast %313 : vector<16xf32> to vector<16x1xf32>
    %cst_131 = arith.constant 3.200000e+01 : f32
    %315 = vector.broadcast %cst_131 : f32 to vector<16x1xf32>
    %316 = arith.divf %314, %315 : vector<16x1xf32>
    %317 = vector.broadcast %316 : vector<16x1xf32> to vector<16x32xf32>
    %318 = arith.subf %310, %317 : vector<16x32xf32>
    %319 = arith.mulf %318, %318 : vector<16x32xf32>
    %cst_132 = arith.constant dense<0.000000e+00> : vector<16xf32>
    %320 = vector.multi_reduction <add>, %319, %cst_132 [1] : vector<16x32xf32> to vector<16xf32>
    %321 = vector.shape_cast %320 : vector<16xf32> to vector<16x1xf32>
    %cst_133 = arith.constant 3.200000e+01 : f32
    %322 = vector.broadcast %cst_133 : f32 to vector<16x1xf32>
    %323 = arith.divf %321, %322 : vector<16x1xf32>
    %324 = vector.broadcast %316 : vector<16x1xf32> to vector<16x32xf32>
    %325 = arith.subf %310, %324 : vector<16x32xf32>
    %cst_134 = arith.constant 9.99999974E-6 : f32
    %326 = vector.broadcast %cst_134 : f32 to vector<16x1xf32>
    %327 = arith.addf %323, %326 : vector<16x1xf32>
    %328 = math.rsqrt %327 : vector<16x1xf32>
    %329 = vector.broadcast %328 : vector<16x1xf32> to vector<16x32xf32>
    %330 = arith.mulf %325, %329 : vector<16x32xf32>
    %331 = vector.broadcast %311 : vector<1x32xf32> to vector<16x32xf32>
    %332 = arith.mulf %330, %331 : vector<16x32xf32>
    %333 = vector.broadcast %312 : vector<1x32xf32> to vector<16x32xf32>
    %334 = arith.addf %332, %333 : vector<16x32xf32>
    %c656 = arith.constant 656 : index
    %c0_135 = arith.constant 0 : index
    %335 = vector.load %arg1[%c656, %c0_135] : memref<1192x128xf32, #tpu.memory_space<vmem>>, vector<8x32xf32>
    %cst_136 = arith.constant dense<0.000000e+00> : vector<16x8xf32>
    %336 = tpu.matmul %334, %335, %cst_136 {dimension_numbers = #tpu.dot_dimension_numbers<[1], [1], [0], [0], [0, 0, 1, 0], [], []>} : vector<16x32xf32>, vector<8x32xf32>, vector<16x8xf32> -> vector<16x8xf32>
    %c664 = arith.constant 664 : index
    %c0_137 = arith.constant 0 : index
    %337 = vector.load %arg1[%c664, %c0_137] : memref<1192x128xf32, #tpu.memory_space<vmem>>, vector<8x32xf32>
    %cst_138 = arith.constant dense<0.000000e+00> : vector<16x8xf32>
    %338 = tpu.matmul %334, %337, %cst_138 {dimension_numbers = #tpu.dot_dimension_numbers<[1], [1], [0], [0], [0, 0, 1, 0], [], []>} : vector<16x32xf32>, vector<8x32xf32>, vector<16x8xf32> -> vector<16x8xf32>
    %c672 = arith.constant 672 : index
    %c0_139 = arith.constant 0 : index
    %339 = vector.load %arg1[%c672, %c0_139] : memref<1192x128xf32, #tpu.memory_space<vmem>>, vector<8x32xf32>
    %cst_140 = arith.constant dense<0.000000e+00> : vector<16x8xf32>
    %340 = tpu.matmul %334, %339, %cst_140 {dimension_numbers = #tpu.dot_dimension_numbers<[1], [1], [0], [0], [0, 0, 1, 0], [], []>} : vector<16x32xf32>, vector<8x32xf32>, vector<16x8xf32> -> vector<16x8xf32>
    %c680 = arith.constant 680 : index
    %c0_141 = arith.constant 0 : index
    %341 = vector.load %arg1[%c680, %c0_141] : memref<1192x128xf32, #tpu.memory_space<vmem>>, vector<8x32xf32>
    %cst_142 = arith.constant dense<0.000000e+00> : vector<16x8xf32>
    %342 = tpu.matmul %334, %341, %cst_142 {dimension_numbers = #tpu.dot_dimension_numbers<[1], [1], [0], [0], [0, 0, 1, 0], [], []>} : vector<16x32xf32>, vector<8x32xf32>, vector<16x8xf32> -> vector<16x8xf32>
    %343 = vector.shape_cast %336 : vector<16x8xf32> to vector<1x16x8xf32>
    %344 = vector.shape_cast %338 : vector<16x8xf32> to vector<1x16x8xf32>
    %345 = vector.shape_cast %340 : vector<16x8xf32> to vector<1x16x8xf32>
    %346 = vector.shape_cast %342 : vector<16x8xf32> to vector<1x16x8xf32>
    %347 = tpu.concatenate %343, %344, %345, %346 in 0 : vector<1x16x8xf32>, vector<1x16x8xf32>, vector<1x16x8xf32>, vector<1x16x8xf32> -> vector<4x16x8xf32>
    %c688 = arith.constant 688 : index
    %c0_143 = arith.constant 0 : index
    %348 = vector.load %arg1[%c688, %c0_143] : memref<1192x128xf32, #tpu.memory_space<vmem>>, vector<8x32xf32>
    %cst_144 = arith.constant dense<0.000000e+00> : vector<16x8xf32>
    %349 = tpu.matmul %334, %348, %cst_144 {dimension_numbers = #tpu.dot_dimension_numbers<[1], [1], [0], [0], [0, 0, 1, 0], [], []>} : vector<16x32xf32>, vector<8x32xf32>, vector<16x8xf32> -> vector<16x8xf32>
    %c696 = arith.constant 696 : index
    %c0_145 = arith.constant 0 : index
    %350 = vector.load %arg1[%c696, %c0_145] : memref<1192x128xf32, #tpu.memory_space<vmem>>, vector<8x32xf32>
    %cst_146 = arith.constant dense<0.000000e+00> : vector<16x8xf32>
    %351 = tpu.matmul %334, %350, %cst_146 {dimension_numbers = #tpu.dot_dimension_numbers<[1], [1], [0], [0], [0, 0, 1, 0], [], []>} : vector<16x32xf32>, vector<8x32xf32>, vector<16x8xf32> -> vector<16x8xf32>
    %c704 = arith.constant 704 : index
    %c0_147 = arith.constant 0 : index
    %352 = vector.load %arg1[%c704, %c0_147] : memref<1192x128xf32, #tpu.memory_space<vmem>>, vector<8x32xf32>
    %cst_148 = arith.constant dense<0.000000e+00> : vector<16x8xf32>
    %353 = tpu.matmul %334, %352, %cst_148 {dimension_numbers = #tpu.dot_dimension_numbers<[1], [1], [0], [0], [0, 0, 1, 0], [], []>} : vector<16x32xf32>, vector<8x32xf32>, vector<16x8xf32> -> vector<16x8xf32>
    %c712 = arith.constant 712 : index
    %c0_149 = arith.constant 0 : index
    %354 = vector.load %arg1[%c712, %c0_149] : memref<1192x128xf32, #tpu.memory_space<vmem>>, vector<8x32xf32>
    %cst_150 = arith.constant dense<0.000000e+00> : vector<16x8xf32>
    %355 = tpu.matmul %334, %354, %cst_150 {dimension_numbers = #tpu.dot_dimension_numbers<[1], [1], [0], [0], [0, 0, 1, 0], [], []>} : vector<16x32xf32>, vector<8x32xf32>, vector<16x8xf32> -> vector<16x8xf32>
    %356 = vector.shape_cast %349 : vector<16x8xf32> to vector<1x16x8xf32>
    %357 = vector.shape_cast %351 : vector<16x8xf32> to vector<1x16x8xf32>
    %358 = vector.shape_cast %353 : vector<16x8xf32> to vector<1x16x8xf32>
    %359 = vector.shape_cast %355 : vector<16x8xf32> to vector<1x16x8xf32>
    %360 = tpu.concatenate %356, %357, %358, %359 in 0 : vector<1x16x8xf32>, vector<1x16x8xf32>, vector<1x16x8xf32>, vector<1x16x8xf32> -> vector<4x16x8xf32>
    %c720 = arith.constant 720 : index
    %c0_151 = arith.constant 0 : index
    %361 = vector.load %arg1[%c720, %c0_151] : memref<1192x128xf32, #tpu.memory_space<vmem>>, vector<8x32xf32>
    %cst_152 = arith.constant dense<0.000000e+00> : vector<16x8xf32>
    %362 = tpu.matmul %334, %361, %cst_152 {dimension_numbers = #tpu.dot_dimension_numbers<[1], [1], [0], [0], [0, 0, 1, 0], [], []>} : vector<16x32xf32>, vector<8x32xf32>, vector<16x8xf32> -> vector<16x8xf32>
    %c728 = arith.constant 728 : index
    %c0_153 = arith.constant 0 : index
    %363 = vector.load %arg1[%c728, %c0_153] : memref<1192x128xf32, #tpu.memory_space<vmem>>, vector<8x32xf32>
    %cst_154 = arith.constant dense<0.000000e+00> : vector<16x8xf32>
    %364 = tpu.matmul %334, %363, %cst_154 {dimension_numbers = #tpu.dot_dimension_numbers<[1], [1], [0], [0], [0, 0, 1, 0], [], []>} : vector<16x32xf32>, vector<8x32xf32>, vector<16x8xf32> -> vector<16x8xf32>
    %c736 = arith.constant 736 : index
    %c0_155 = arith.constant 0 : index
    %365 = vector.load %arg1[%c736, %c0_155] : memref<1192x128xf32, #tpu.memory_space<vmem>>, vector<8x32xf32>
    %cst_156 = arith.constant dense<0.000000e+00> : vector<16x8xf32>
    %366 = tpu.matmul %334, %365, %cst_156 {dimension_numbers = #tpu.dot_dimension_numbers<[1], [1], [0], [0], [0, 0, 1, 0], [], []>} : vector<16x32xf32>, vector<8x32xf32>, vector<16x8xf32> -> vector<16x8xf32>
    %c744 = arith.constant 744 : index
    %c0_157 = arith.constant 0 : index
    %367 = vector.load %arg1[%c744, %c0_157] : memref<1192x128xf32, #tpu.memory_space<vmem>>, vector<8x32xf32>
    %cst_158 = arith.constant dense<0.000000e+00> : vector<16x8xf32>
    %368 = tpu.matmul %334, %367, %cst_158 {dimension_numbers = #tpu.dot_dimension_numbers<[1], [1], [0], [0], [0, 0, 1, 0], [], []>} : vector<16x32xf32>, vector<8x32xf32>, vector<16x8xf32> -> vector<16x8xf32>
    %369 = vector.shape_cast %362 : vector<16x8xf32> to vector<1x16x8xf32>
    %370 = vector.shape_cast %364 : vector<16x8xf32> to vector<1x16x8xf32>
    %371 = vector.shape_cast %366 : vector<16x8xf32> to vector<1x16x8xf32>
    %372 = vector.shape_cast %368 : vector<16x8xf32> to vector<1x16x8xf32>
    %373 = tpu.concatenate %369, %370, %371, %372 in 0 : vector<1x16x8xf32>, vector<1x16x8xf32>, vector<1x16x8xf32>, vector<1x16x8xf32> -> vector<4x16x8xf32>
    %c752 = arith.constant 752 : index
    %c0_159 = arith.constant 0 : index
    %374 = vector.load %arg1[%c752, %c0_159] : memref<1192x128xf32, #tpu.memory_space<vmem>>, vector<4x8xf32>
    %375 = vector.shape_cast %374 : vector<4x8xf32> to vector<4x1x8xf32>
    %376 = vector.broadcast %375 : vector<4x1x8xf32> to vector<4x16x8xf32>
    %377 = arith.addf %347, %376 : vector<4x16x8xf32>
    %cst_160 = arith.constant 0.353553385 : f32
    %378 = vector.broadcast %cst_160 : f32 to vector<4x16x8xf32>
    %379 = arith.mulf %377, %378 : vector<4x16x8xf32>
    %c760 = arith.constant 760 : index
    %c0_161 = arith.constant 0 : index
    %380 = vector.load %arg1[%c760, %c0_161] : memref<1192x128xf32, #tpu.memory_space<vmem>>, vector<4x8xf32>
    %381 = vector.shape_cast %380 : vector<4x8xf32> to vector<4x1x8xf32>
    %382 = vector.broadcast %381 : vector<4x1x8xf32> to vector<4x16x8xf32>
    %383 = arith.addf %360, %382 : vector<4x16x8xf32>
    %c768 = arith.constant 768 : index
    %c0_162 = arith.constant 0 : index
    %384 = vector.load %arg1[%c768, %c0_162] : memref<1192x128xf32, #tpu.memory_space<vmem>>, vector<4x8xf32>
    %385 = vector.shape_cast %384 : vector<4x8xf32> to vector<4x1x8xf32>
    %386 = vector.broadcast %385 : vector<4x1x8xf32> to vector<4x16x8xf32>
    %387 = arith.addf %373, %386 : vector<4x16x8xf32>
    %388 = vector.shape_cast %379 : vector<4x16x8xf32> to vector<8x8x8xf32>
    %389 = vector.shape_cast %383 : vector<4x16x8xf32> to vector<8x8x8xf32>
    %390 = vector.shape_cast %387 : vector<4x16x8xf32> to vector<8x8x8xf32>
    "tpu.trace_start"() <{level = 10 : i32, message = "nqe,nke->nqk"}> : () -> ()
    %cst_163 = arith.constant dense<0.000000e+00> : vector<8x8x8xf32>
    %391 = tpu.matmul %388, %389, %cst_163 {dimension_numbers = #tpu.dot_dimension_numbers<[2], [2], [1], [1], [0, 0, 0, 1, 1, 1], [0], [0]>} : vector<8x8x8xf32>, vector<8x8x8xf32>, vector<8x8x8xf32> -> vector<8x8x8xf32>
    "tpu.trace_stop"() : () -> ()
    %392 = tpu.iota {dimensions = array<i32: 0>} : vector<8x8xi32>
    %393 = tpu.iota {dimensions = array<i32: 1>} : vector<8x8xi32>
    %394 = arith.cmpi sle, %393, %392 : vector<8x8xi32>
    %395 = vector.shape_cast %394 : vector<8x8xi1> to vector<1x8x8xi1>
    %cst_164 = arith.constant -1.000000e+30 : f32
    %396 = vector.shape_cast %395 : vector<1x8x8xi1> to vector<1x8x8xi1>
    %397 = vector.broadcast %396 : vector<1x8x8xi1> to vector<8x8x8xi1>
    %398 = vector.broadcast %cst_164 : f32 to vector<8x8x8xf32>
    %399 = arith.select %397, %391, %398 : vector<8x8x8xi1>, vector<8x8x8xf32>
    %cst_165 = arith.constant dense<0xFF800000> : vector<8x8xf32>
    %400 = vector.multi_reduction <maximumf>, %399, %cst_165 [2] : vector<8x8x8xf32> to vector<8x8xf32>
    %401 = vector.shape_cast %400 : vector<8x8xf32> to vector<8x8x1xf32>
    %402 = vector.broadcast %401 : vector<8x8x1xf32> to vector<8x8x8xf32>
    %403 = arith.subf %399, %402 : vector<8x8x8xf32>
    %404 = math.exp %403 : vector<8x8x8xf32>
    %cst_166 = arith.constant dense<0.000000e+00> : vector<8x8xf32>
    %405 = vector.multi_reduction <add>, %404, %cst_166 [2] : vector<8x8x8xf32> to vector<8x8xf32>
    %406 = vector.shape_cast %405 : vector<8x8xf32> to vector<8x8x1xf32>
    %407 = tpu.reciprocal %406 {approx = true} : vector<8x8x1xf32> -> vector<8x8x1xf32>
    %408 = vector.broadcast %407 : vector<8x8x1xf32> to vector<8x8x8xf32>
    %409 = arith.mulf %404, %408 : vector<8x8x8xf32>
    "tpu.trace_start"() <{level = 10 : i32, message = "nqk,nke->nqe"}> : () -> ()
    %cst_167 = arith.constant dense<0.000000e+00> : vector<8x8x8xf32>
    %410 = tpu.matmul %409, %390, %cst_167 {dimension_numbers = #tpu.dot_dimension_numbers<[2], [1], [1], [2], [0, 0, 0, 1, 1, 2], [0], [0]>} : vector<8x8x8xf32>, vector<8x8x8xf32>, vector<8x8x8xf32> -> vector<8x8x8xf32>
    "tpu.trace_stop"() : () -> ()
    %411 = vector.shape_cast %410 : vector<8x8x8xf32> to vector<4x16x8xf32>
    %412 = vector.extract_strided_slice %411 {offsets = [0, 0, 0], sizes = [1, 16, 8], strides = [1, 1, 1]} : vector<4x16x8xf32> to vector<1x16x8xf32>
    %413 = vector.shape_cast %412 : vector<1x16x8xf32> to vector<16x8xf32>
    %c776 = arith.constant 776 : index
    %c0_168 = arith.constant 0 : index
    %414 = vector.load %arg1[%c776, %c0_168] : memref<1192x128xf32, #tpu.memory_space<vmem>>, vector<8x32xf32>
    %cst_169 = arith.constant dense<0.000000e+00> : vector<16x32xf32>
    %415 = tpu.matmul %413, %414, %cst_169 {dimension_numbers = #tpu.dot_dimension_numbers<[1], [0], [0], [1], [0, 0, 1, 1], [], []>} : vector<16x8xf32>, vector<8x32xf32>, vector<16x32xf32> -> vector<16x32xf32>
    %c808 = arith.constant 808 : index
    %c0_170 = arith.constant 0 : index
    %416 = vector.load %arg1[%c808, %c0_170] : memref<1192x128xf32, #tpu.memory_space<vmem>>, vector<1x32xf32>
    %417 = vector.broadcast %416 : vector<1x32xf32> to vector<16x32xf32>
    %418 = arith.addf %415, %417 : vector<16x32xf32>
    %419 = vector.extract_strided_slice %411 {offsets = [1, 0, 0], sizes = [1, 16, 8], strides = [1, 1, 1]} : vector<4x16x8xf32> to vector<1x16x8xf32>
    %420 = vector.shape_cast %419 : vector<1x16x8xf32> to vector<16x8xf32>
    %c784 = arith.constant 784 : index
    %c0_171 = arith.constant 0 : index
    %421 = vector.load %arg1[%c784, %c0_171] : memref<1192x128xf32, #tpu.memory_space<vmem>>, vector<8x32xf32>
    %cst_172 = arith.constant dense<0.000000e+00> : vector<16x32xf32>
    %422 = tpu.matmul %420, %421, %cst_172 {dimension_numbers = #tpu.dot_dimension_numbers<[1], [0], [0], [1], [0, 0, 1, 1], [], []>} : vector<16x8xf32>, vector<8x32xf32>, vector<16x32xf32> -> vector<16x32xf32>
    %423 = arith.addf %418, %422 : vector<16x32xf32>
    %424 = vector.extract_strided_slice %411 {offsets = [2, 0, 0], sizes = [1, 16, 8], strides = [1, 1, 1]} : vector<4x16x8xf32> to vector<1x16x8xf32>
    %425 = vector.shape_cast %424 : vector<1x16x8xf32> to vector<16x8xf32>
    %c792 = arith.constant 792 : index
    %c0_173 = arith.constant 0 : index
    %426 = vector.load %arg1[%c792, %c0_173] : memref<1192x128xf32, #tpu.memory_space<vmem>>, vector<8x32xf32>
    %cst_174 = arith.constant dense<0.000000e+00> : vector<16x32xf32>
    %427 = tpu.matmul %425, %426, %cst_174 {dimension_numbers = #tpu.dot_dimension_numbers<[1], [0], [0], [1], [0, 0, 1, 1], [], []>} : vector<16x8xf32>, vector<8x32xf32>, vector<16x32xf32> -> vector<16x32xf32>
    %428 = arith.addf %423, %427 : vector<16x32xf32>
    %429 = vector.extract_strided_slice %411 {offsets = [3, 0, 0], sizes = [1, 16, 8], strides = [1, 1, 1]} : vector<4x16x8xf32> to vector<1x16x8xf32>
    %430 = vector.shape_cast %429 : vector<1x16x8xf32> to vector<16x8xf32>
    %c800 = arith.constant 800 : index
    %c0_175 = arith.constant 0 : index
    %431 = vector.load %arg1[%c800, %c0_175] : memref<1192x128xf32, #tpu.memory_space<vmem>>, vector<8x32xf32>
    %cst_176 = arith.constant dense<0.000000e+00> : vector<16x32xf32>
    %432 = tpu.matmul %430, %431, %cst_176 {dimension_numbers = #tpu.dot_dimension_numbers<[1], [0], [0], [1], [0, 0, 1, 1], [], []>} : vector<16x8xf32>, vector<8x32xf32>, vector<16x32xf32> -> vector<16x32xf32>
    %433 = arith.addf %428, %432 : vector<16x32xf32>
    %434 = arith.addf %334, %433 : vector<16x32xf32>
    %c1088 = arith.constant 1088 : index
    %c0_177 = arith.constant 0 : index
    %435 = vector.load %arg1[%c1088, %c0_177] : memref<1192x128xf32, #tpu.memory_space<vmem>>, vector<1x32xf32>
    %c1096 = arith.constant 1096 : index
    %c0_178 = arith.constant 0 : index
    %436 = vector.load %arg1[%c1096, %c0_178] : memref<1192x128xf32, #tpu.memory_space<vmem>>, vector<1x32xf32>
    %cst_179 = arith.constant dense<0.000000e+00> : vector<16xf32>
    %437 = vector.multi_reduction <add>, %434, %cst_179 [1] : vector<16x32xf32> to vector<16xf32>
    %438 = vector.shape_cast %437 : vector<16xf32> to vector<16x1xf32>
    %cst_180 = arith.constant 3.200000e+01 : f32
    %439 = vector.broadcast %cst_180 : f32 to vector<16x1xf32>
    %440 = arith.divf %438, %439 : vector<16x1xf32>
    %441 = vector.broadcast %440 : vector<16x1xf32> to vector<16x32xf32>
    %442 = arith.subf %434, %441 : vector<16x32xf32>
    %443 = arith.mulf %442, %442 : vector<16x32xf32>
    %cst_181 = arith.constant dense<0.000000e+00> : vector<16xf32>
    %444 = vector.multi_reduction <add>, %443, %cst_181 [1] : vector<16x32xf32> to vector<16xf32>
    %445 = vector.shape_cast %444 : vector<16xf32> to vector<16x1xf32>
    %cst_182 = arith.constant 3.200000e+01 : f32
    %446 = vector.broadcast %cst_182 : f32 to vector<16x1xf32>
    %447 = arith.divf %445, %446 : vector<16x1xf32>
    %448 = vector.broadcast %440 : vector<16x1xf32> to vector<16x32xf32>
    %449 = arith.subf %434, %448 : vector<16x32xf32>
    %cst_183 = arith.constant 9.99999974E-6 : f32
    %450 = vector.broadcast %cst_183 : f32 to vector<16x1xf32>
    %451 = arith.addf %447, %450 : vector<16x1xf32>
    %452 = math.rsqrt %451 : vector<16x1xf32>
    %453 = vector.broadcast %452 : vector<16x1xf32> to vector<16x32xf32>
    %454 = arith.mulf %449, %453 : vector<16x32xf32>
    %455 = vector.broadcast %435 : vector<1x32xf32> to vector<16x32xf32>
    %456 = arith.mulf %454, %455 : vector<16x32xf32>
    %457 = vector.broadcast %436 : vector<1x32xf32> to vector<16x32xf32>
    %458 = arith.addf %456, %457 : vector<16x32xf32>
    %c816 = arith.constant 816 : index
    %c0_184 = arith.constant 0 : index
    %459 = vector.load %arg1[%c816, %c0_184] : memref<1192x128xf32, #tpu.memory_space<vmem>>, vector<8x32xf32>
    %cst_185 = arith.constant dense<0.000000e+00> : vector<16x8xf32>
    %460 = tpu.matmul %458, %459, %cst_185 {dimension_numbers = #tpu.dot_dimension_numbers<[1], [1], [0], [0], [0, 0, 1, 0], [], []>} : vector<16x32xf32>, vector<8x32xf32>, vector<16x8xf32> -> vector<16x8xf32>
    %c824 = arith.constant 824 : index
    %c0_186 = arith.constant 0 : index
    %461 = vector.load %arg1[%c824, %c0_186] : memref<1192x128xf32, #tpu.memory_space<vmem>>, vector<8x32xf32>
    %cst_187 = arith.constant dense<0.000000e+00> : vector<16x8xf32>
    %462 = tpu.matmul %458, %461, %cst_187 {dimension_numbers = #tpu.dot_dimension_numbers<[1], [1], [0], [0], [0, 0, 1, 0], [], []>} : vector<16x32xf32>, vector<8x32xf32>, vector<16x8xf32> -> vector<16x8xf32>
    %c832 = arith.constant 832 : index
    %c0_188 = arith.constant 0 : index
    %463 = vector.load %arg1[%c832, %c0_188] : memref<1192x128xf32, #tpu.memory_space<vmem>>, vector<8x32xf32>
    %cst_189 = arith.constant dense<0.000000e+00> : vector<16x8xf32>
    %464 = tpu.matmul %458, %463, %cst_189 {dimension_numbers = #tpu.dot_dimension_numbers<[1], [1], [0], [0], [0, 0, 1, 0], [], []>} : vector<16x32xf32>, vector<8x32xf32>, vector<16x8xf32> -> vector<16x8xf32>
    %c840 = arith.constant 840 : index
    %c0_190 = arith.constant 0 : index
    %465 = vector.load %arg1[%c840, %c0_190] : memref<1192x128xf32, #tpu.memory_space<vmem>>, vector<8x32xf32>
    %cst_191 = arith.constant dense<0.000000e+00> : vector<16x8xf32>
    %466 = tpu.matmul %458, %465, %cst_191 {dimension_numbers = #tpu.dot_dimension_numbers<[1], [1], [0], [0], [0, 0, 1, 0], [], []>} : vector<16x32xf32>, vector<8x32xf32>, vector<16x8xf32> -> vector<16x8xf32>
    %467 = vector.shape_cast %460 : vector<16x8xf32> to vector<1x16x8xf32>
    %468 = vector.shape_cast %462 : vector<16x8xf32> to vector<1x16x8xf32>
    %469 = vector.shape_cast %464 : vector<16x8xf32> to vector<1x16x8xf32>
    %470 = vector.shape_cast %466 : vector<16x8xf32> to vector<1x16x8xf32>
    %471 = tpu.concatenate %467, %468, %469, %470 in 0 : vector<1x16x8xf32>, vector<1x16x8xf32>, vector<1x16x8xf32>, vector<1x16x8xf32> -> vector<4x16x8xf32>
    %c848 = arith.constant 848 : index
    %c0_192 = arith.constant 0 : index
    %472 = vector.load %arg1[%c848, %c0_192] : memref<1192x128xf32, #tpu.memory_space<vmem>>, vector<8x32xf32>
    %cst_193 = arith.constant dense<0.000000e+00> : vector<16x8xf32>
    %473 = tpu.matmul %334, %472, %cst_193 {dimension_numbers = #tpu.dot_dimension_numbers<[1], [1], [0], [0], [0, 0, 1, 0], [], []>} : vector<16x32xf32>, vector<8x32xf32>, vector<16x8xf32> -> vector<16x8xf32>
    %c856 = arith.constant 856 : index
    %c0_194 = arith.constant 0 : index
    %474 = vector.load %arg1[%c856, %c0_194] : memref<1192x128xf32, #tpu.memory_space<vmem>>, vector<8x32xf32>
    %cst_195 = arith.constant dense<0.000000e+00> : vector<16x8xf32>
    %475 = tpu.matmul %334, %474, %cst_195 {dimension_numbers = #tpu.dot_dimension_numbers<[1], [1], [0], [0], [0, 0, 1, 0], [], []>} : vector<16x32xf32>, vector<8x32xf32>, vector<16x8xf32> -> vector<16x8xf32>
    %c864 = arith.constant 864 : index
    %c0_196 = arith.constant 0 : index
    %476 = vector.load %arg1[%c864, %c0_196] : memref<1192x128xf32, #tpu.memory_space<vmem>>, vector<8x32xf32>
    %cst_197 = arith.constant dense<0.000000e+00> : vector<16x8xf32>
    %477 = tpu.matmul %334, %476, %cst_197 {dimension_numbers = #tpu.dot_dimension_numbers<[1], [1], [0], [0], [0, 0, 1, 0], [], []>} : vector<16x32xf32>, vector<8x32xf32>, vector<16x8xf32> -> vector<16x8xf32>
    %c872 = arith.constant 872 : index
    %c0_198 = arith.constant 0 : index
    %478 = vector.load %arg1[%c872, %c0_198] : memref<1192x128xf32, #tpu.memory_space<vmem>>, vector<8x32xf32>
    %cst_199 = arith.constant dense<0.000000e+00> : vector<16x8xf32>
    %479 = tpu.matmul %334, %478, %cst_199 {dimension_numbers = #tpu.dot_dimension_numbers<[1], [1], [0], [0], [0, 0, 1, 0], [], []>} : vector<16x32xf32>, vector<8x32xf32>, vector<16x8xf32> -> vector<16x8xf32>
    %480 = vector.shape_cast %473 : vector<16x8xf32> to vector<1x16x8xf32>
    %481 = vector.shape_cast %475 : vector<16x8xf32> to vector<1x16x8xf32>
    %482 = vector.shape_cast %477 : vector<16x8xf32> to vector<1x16x8xf32>
    %483 = vector.shape_cast %479 : vector<16x8xf32> to vector<1x16x8xf32>
    %484 = tpu.concatenate %480, %481, %482, %483 in 0 : vector<1x16x8xf32>, vector<1x16x8xf32>, vector<1x16x8xf32>, vector<1x16x8xf32> -> vector<4x16x8xf32>
    %c880 = arith.constant 880 : index
    %c0_200 = arith.constant 0 : index
    %485 = vector.load %arg1[%c880, %c0_200] : memref<1192x128xf32, #tpu.memory_space<vmem>>, vector<8x32xf32>
    %cst_201 = arith.constant dense<0.000000e+00> : vector<16x8xf32>
    %486 = tpu.matmul %334, %485, %cst_201 {dimension_numbers = #tpu.dot_dimension_numbers<[1], [1], [0], [0], [0, 0, 1, 0], [], []>} : vector<16x32xf32>, vector<8x32xf32>, vector<16x8xf32> -> vector<16x8xf32>
    %c888 = arith.constant 888 : index
    %c0_202 = arith.constant 0 : index
    %487 = vector.load %arg1[%c888, %c0_202] : memref<1192x128xf32, #tpu.memory_space<vmem>>, vector<8x32xf32>
    %cst_203 = arith.constant dense<0.000000e+00> : vector<16x8xf32>
    %488 = tpu.matmul %334, %487, %cst_203 {dimension_numbers = #tpu.dot_dimension_numbers<[1], [1], [0], [0], [0, 0, 1, 0], [], []>} : vector<16x32xf32>, vector<8x32xf32>, vector<16x8xf32> -> vector<16x8xf32>
    %c896 = arith.constant 896 : index
    %c0_204 = arith.constant 0 : index
    %489 = vector.load %arg1[%c896, %c0_204] : memref<1192x128xf32, #tpu.memory_space<vmem>>, vector<8x32xf32>
    %cst_205 = arith.constant dense<0.000000e+00> : vector<16x8xf32>
    %490 = tpu.matmul %334, %489, %cst_205 {dimension_numbers = #tpu.dot_dimension_numbers<[1], [1], [0], [0], [0, 0, 1, 0], [], []>} : vector<16x32xf32>, vector<8x32xf32>, vector<16x8xf32> -> vector<16x8xf32>
    %c904 = arith.constant 904 : index
    %c0_206 = arith.constant 0 : index
    %491 = vector.load %arg1[%c904, %c0_206] : memref<1192x128xf32, #tpu.memory_space<vmem>>, vector<8x32xf32>
    %cst_207 = arith.constant dense<0.000000e+00> : vector<16x8xf32>
    %492 = tpu.matmul %334, %491, %cst_207 {dimension_numbers = #tpu.dot_dimension_numbers<[1], [1], [0], [0], [0, 0, 1, 0], [], []>} : vector<16x32xf32>, vector<8x32xf32>, vector<16x8xf32> -> vector<16x8xf32>
    %493 = vector.shape_cast %486 : vector<16x8xf32> to vector<1x16x8xf32>
    %494 = vector.shape_cast %488 : vector<16x8xf32> to vector<1x16x8xf32>
    %495 = vector.shape_cast %490 : vector<16x8xf32> to vector<1x16x8xf32>
    %496 = vector.shape_cast %492 : vector<16x8xf32> to vector<1x16x8xf32>
    %497 = tpu.concatenate %493, %494, %495, %496 in 0 : vector<1x16x8xf32>, vector<1x16x8xf32>, vector<1x16x8xf32>, vector<1x16x8xf32> -> vector<4x16x8xf32>
    %c912 = arith.constant 912 : index
    %c0_208 = arith.constant 0 : index
    %498 = vector.load %arg1[%c912, %c0_208] : memref<1192x128xf32, #tpu.memory_space<vmem>>, vector<4x8xf32>
    %499 = vector.shape_cast %498 : vector<4x8xf32> to vector<4x1x8xf32>
    %500 = vector.broadcast %499 : vector<4x1x8xf32> to vector<4x16x8xf32>
    %501 = arith.addf %471, %500 : vector<4x16x8xf32>
    %cst_209 = arith.constant 0.353553385 : f32
    %502 = vector.broadcast %cst_209 : f32 to vector<4x16x8xf32>
    %503 = arith.mulf %501, %502 : vector<4x16x8xf32>
    %c920 = arith.constant 920 : index
    %c0_210 = arith.constant 0 : index
    %504 = vector.load %arg1[%c920, %c0_210] : memref<1192x128xf32, #tpu.memory_space<vmem>>, vector<4x8xf32>
    %505 = vector.shape_cast %504 : vector<4x8xf32> to vector<4x1x8xf32>
    %506 = vector.broadcast %505 : vector<4x1x8xf32> to vector<4x16x8xf32>
    %507 = arith.addf %484, %506 : vector<4x16x8xf32>
    %c928 = arith.constant 928 : index
    %c0_211 = arith.constant 0 : index
    %508 = vector.load %arg1[%c928, %c0_211] : memref<1192x128xf32, #tpu.memory_space<vmem>>, vector<4x8xf32>
    %509 = vector.shape_cast %508 : vector<4x8xf32> to vector<4x1x8xf32>
    %510 = vector.broadcast %509 : vector<4x1x8xf32> to vector<4x16x8xf32>
    %511 = arith.addf %497, %510 : vector<4x16x8xf32>
    %512 = vector.shape_cast %503 : vector<4x16x8xf32> to vector<8x8x8xf32>
    %513 = vector.shape_cast %507 : vector<4x16x8xf32> to vector<8x8x8xf32>
    %514 = vector.shape_cast %511 : vector<4x16x8xf32> to vector<8x8x8xf32>
    "tpu.trace_start"() <{level = 10 : i32, message = "nqe,nke->nqk"}> : () -> ()
    %cst_212 = arith.constant dense<0.000000e+00> : vector<8x8x8xf32>
    %515 = tpu.matmul %512, %513, %cst_212 {dimension_numbers = #tpu.dot_dimension_numbers<[2], [2], [1], [1], [0, 0, 0, 1, 1, 1], [0], [0]>} : vector<8x8x8xf32>, vector<8x8x8xf32>, vector<8x8x8xf32> -> vector<8x8x8xf32>
    "tpu.trace_stop"() : () -> ()
    %cst_213 = arith.constant dense<0xFF800000> : vector<8x8xf32>
    %516 = vector.multi_reduction <maximumf>, %515, %cst_213 [2] : vector<8x8x8xf32> to vector<8x8xf32>
    %517 = vector.shape_cast %516 : vector<8x8xf32> to vector<8x8x1xf32>
    %518 = vector.broadcast %517 : vector<8x8x1xf32> to vector<8x8x8xf32>
    %519 = arith.subf %515, %518 : vector<8x8x8xf32>
    %520 = math.exp %519 : vector<8x8x8xf32>
    %cst_214 = arith.constant dense<0.000000e+00> : vector<8x8xf32>
    %521 = vector.multi_reduction <add>, %520, %cst_214 [2] : vector<8x8x8xf32> to vector<8x8xf32>
    %522 = vector.shape_cast %521 : vector<8x8xf32> to vector<8x8x1xf32>
    %523 = tpu.reciprocal %522 {approx = true} : vector<8x8x1xf32> -> vector<8x8x1xf32>
    %524 = vector.broadcast %523 : vector<8x8x1xf32> to vector<8x8x8xf32>
    %525 = arith.mulf %520, %524 : vector<8x8x8xf32>
    "tpu.trace_start"() <{level = 10 : i32, message = "nqk,nke->nqe"}> : () -> ()
    %cst_215 = arith.constant dense<0.000000e+00> : vector<8x8x8xf32>
    %526 = tpu.matmul %525, %514, %cst_215 {dimension_numbers = #tpu.dot_dimension_numbers<[2], [1], [1], [2], [0, 0, 0, 1, 1, 2], [0], [0]>} : vector<8x8x8xf32>, vector<8x8x8xf32>, vector<8x8x8xf32> -> vector<8x8x8xf32>
    "tpu.trace_stop"() : () -> ()
    %527 = vector.shape_cast %526 : vector<8x8x8xf32> to vector<4x16x8xf32>
    %528 = vector.extract_strided_slice %527 {offsets = [0, 0, 0], sizes = [1, 16, 8], strides = [1, 1, 1]} : vector<4x16x8xf32> to vector<1x16x8xf32>
    %529 = vector.shape_cast %528 : vector<1x16x8xf32> to vector<16x8xf32>
    %c936 = arith.constant 936 : index
    %c0_216 = arith.constant 0 : index
    %530 = vector.load %arg1[%c936, %c0_216] : memref<1192x128xf32, #tpu.memory_space<vmem>>, vector<8x32xf32>
    %cst_217 = arith.constant dense<0.000000e+00> : vector<16x32xf32>
    %531 = tpu.matmul %529, %530, %cst_217 {dimension_numbers = #tpu.dot_dimension_numbers<[1], [0], [0], [1], [0, 0, 1, 1], [], []>} : vector<16x8xf32>, vector<8x32xf32>, vector<16x32xf32> -> vector<16x32xf32>
    %c968 = arith.constant 968 : index
    %c0_218 = arith.constant 0 : index
    %532 = vector.load %arg1[%c968, %c0_218] : memref<1192x128xf32, #tpu.memory_space<vmem>>, vector<1x32xf32>
    %533 = vector.broadcast %532 : vector<1x32xf32> to vector<16x32xf32>
    %534 = arith.addf %531, %533 : vector<16x32xf32>
    %535 = vector.extract_strided_slice %527 {offsets = [1, 0, 0], sizes = [1, 16, 8], strides = [1, 1, 1]} : vector<4x16x8xf32> to vector<1x16x8xf32>
    %536 = vector.shape_cast %535 : vector<1x16x8xf32> to vector<16x8xf32>
    %c944 = arith.constant 944 : index
    %c0_219 = arith.constant 0 : index
    %537 = vector.load %arg1[%c944, %c0_219] : memref<1192x128xf32, #tpu.memory_space<vmem>>, vector<8x32xf32>
    %cst_220 = arith.constant dense<0.000000e+00> : vector<16x32xf32>
    %538 = tpu.matmul %536, %537, %cst_220 {dimension_numbers = #tpu.dot_dimension_numbers<[1], [0], [0], [1], [0, 0, 1, 1], [], []>} : vector<16x8xf32>, vector<8x32xf32>, vector<16x32xf32> -> vector<16x32xf32>
    %539 = arith.addf %534, %538 : vector<16x32xf32>
    %540 = vector.extract_strided_slice %527 {offsets = [2, 0, 0], sizes = [1, 16, 8], strides = [1, 1, 1]} : vector<4x16x8xf32> to vector<1x16x8xf32>
    %541 = vector.shape_cast %540 : vector<1x16x8xf32> to vector<16x8xf32>
    %c952 = arith.constant 952 : index
    %c0_221 = arith.constant 0 : index
    %542 = vector.load %arg1[%c952, %c0_221] : memref<1192x128xf32, #tpu.memory_space<vmem>>, vector<8x32xf32>
    %cst_222 = arith.constant dense<0.000000e+00> : vector<16x32xf32>
    %543 = tpu.matmul %541, %542, %cst_222 {dimension_numbers = #tpu.dot_dimension_numbers<[1], [0], [0], [1], [0, 0, 1, 1], [], []>} : vector<16x8xf32>, vector<8x32xf32>, vector<16x32xf32> -> vector<16x32xf32>
    %544 = arith.addf %539, %543 : vector<16x32xf32>
    %545 = vector.extract_strided_slice %527 {offsets = [3, 0, 0], sizes = [1, 16, 8], strides = [1, 1, 1]} : vector<4x16x8xf32> to vector<1x16x8xf32>
    %546 = vector.shape_cast %545 : vector<1x16x8xf32> to vector<16x8xf32>
    %c960 = arith.constant 960 : index
    %c0_223 = arith.constant 0 : index
    %547 = vector.load %arg1[%c960, %c0_223] : memref<1192x128xf32, #tpu.memory_space<vmem>>, vector<8x32xf32>
    %cst_224 = arith.constant dense<0.000000e+00> : vector<16x32xf32>
    %548 = tpu.matmul %546, %547, %cst_224 {dimension_numbers = #tpu.dot_dimension_numbers<[1], [0], [0], [1], [0, 0, 1, 1], [], []>} : vector<16x8xf32>, vector<8x32xf32>, vector<16x32xf32> -> vector<16x32xf32>
    %549 = arith.addf %544, %548 : vector<16x32xf32>
    %550 = arith.addf %458, %549 : vector<16x32xf32>
    %c1104 = arith.constant 1104 : index
    %c0_225 = arith.constant 0 : index
    %551 = vector.load %arg1[%c1104, %c0_225] : memref<1192x128xf32, #tpu.memory_space<vmem>>, vector<1x32xf32>
    %c1112 = arith.constant 1112 : index
    %c0_226 = arith.constant 0 : index
    %552 = vector.load %arg1[%c1112, %c0_226] : memref<1192x128xf32, #tpu.memory_space<vmem>>, vector<1x32xf32>
    %cst_227 = arith.constant dense<0.000000e+00> : vector<16xf32>
    %553 = vector.multi_reduction <add>, %550, %cst_227 [1] : vector<16x32xf32> to vector<16xf32>
    %554 = vector.shape_cast %553 : vector<16xf32> to vector<16x1xf32>
    %cst_228 = arith.constant 3.200000e+01 : f32
    %555 = vector.broadcast %cst_228 : f32 to vector<16x1xf32>
    %556 = arith.divf %554, %555 : vector<16x1xf32>
    %557 = vector.broadcast %556 : vector<16x1xf32> to vector<16x32xf32>
    %558 = arith.subf %550, %557 : vector<16x32xf32>
    %559 = arith.mulf %558, %558 : vector<16x32xf32>
    %cst_229 = arith.constant dense<0.000000e+00> : vector<16xf32>
    %560 = vector.multi_reduction <add>, %559, %cst_229 [1] : vector<16x32xf32> to vector<16xf32>
    %561 = vector.shape_cast %560 : vector<16xf32> to vector<16x1xf32>
    %cst_230 = arith.constant 3.200000e+01 : f32
    %562 = vector.broadcast %cst_230 : f32 to vector<16x1xf32>
    %563 = arith.divf %561, %562 : vector<16x1xf32>
    %564 = vector.broadcast %556 : vector<16x1xf32> to vector<16x32xf32>
    %565 = arith.subf %550, %564 : vector<16x32xf32>
    %cst_231 = arith.constant 9.99999974E-6 : f32
    %566 = vector.broadcast %cst_231 : f32 to vector<16x1xf32>
    %567 = arith.addf %563, %566 : vector<16x1xf32>
    %568 = math.rsqrt %567 : vector<16x1xf32>
    %569 = vector.broadcast %568 : vector<16x1xf32> to vector<16x32xf32>
    %570 = arith.mulf %565, %569 : vector<16x32xf32>
    %571 = vector.broadcast %551 : vector<1x32xf32> to vector<16x32xf32>
    %572 = arith.mulf %570, %571 : vector<16x32xf32>
    %573 = vector.broadcast %552 : vector<1x32xf32> to vector<16x32xf32>
    %574 = arith.addf %572, %573 : vector<16x32xf32>
    %c976 = arith.constant 976 : index
    %c0_232 = arith.constant 0 : index
    %575 = vector.load %arg1[%c976, %c0_232] : memref<1192x128xf32, #tpu.memory_space<vmem>>, vector<32x64xf32>
    %cst_233 = arith.constant dense<0.000000e+00> : vector<16x64xf32>
    %576 = tpu.matmul %574, %575, %cst_233 {dimension_numbers = #tpu.dot_dimension_numbers<[1], [0], [0], [1], [0, 0, 1, 1], [], []>} : vector<16x32xf32>, vector<32x64xf32>, vector<16x64xf32> -> vector<16x64xf32>
    %c1008 = arith.constant 1008 : index
    %c0_234 = arith.constant 0 : index
    %577 = vector.load %arg1[%c1008, %c0_234] : memref<1192x128xf32, #tpu.memory_space<vmem>>, vector<1x64xf32>
    %578 = vector.broadcast %577 : vector<1x64xf32> to vector<16x64xf32>
    %579 = arith.addf %576, %578 : vector<16x64xf32>
    %cst_235 = arith.constant 0.000000e+00 : f32
    %580 = vector.broadcast %cst_235 : f32 to vector<16x64xf32>
    %581 = arith.maximumf %579, %580 : vector<16x64xf32>
    %c1016 = arith.constant 1016 : index
    %c0_236 = arith.constant 0 : index
    %582 = vector.load %arg1[%c1016, %c0_236] : memref<1192x128xf32, #tpu.memory_space<vmem>>, vector<64x32xf32>
    %cst_237 = arith.constant dense<0.000000e+00> : vector<16x32xf32>
    %583 = tpu.matmul %581, %582, %cst_237 {dimension_numbers = #tpu.dot_dimension_numbers<[1], [0], [0], [1], [0, 0, 1, 1], [], []>} : vector<16x64xf32>, vector<64x32xf32>, vector<16x32xf32> -> vector<16x32xf32>
    %c1080 = arith.constant 1080 : index
    %c0_238 = arith.constant 0 : index
    %584 = vector.load %arg1[%c1080, %c0_238] : memref<1192x128xf32, #tpu.memory_space<vmem>>, vector<1x32xf32>
    %585 = vector.broadcast %584 : vector<1x32xf32> to vector<16x32xf32>
    %586 = arith.addf %583, %585 : vector<16x32xf32>
    %587 = arith.addf %574, %586 : vector<16x32xf32>
    %c1120 = arith.constant 1120 : index
    %c0_239 = arith.constant 0 : index
    %588 = vector.load %arg1[%c1120, %c0_239] : memref<1192x128xf32, #tpu.memory_space<vmem>>, vector<1x32xf32>
    %c1128 = arith.constant 1128 : index
    %c0_240 = arith.constant 0 : index
    %589 = vector.load %arg1[%c1128, %c0_240] : memref<1192x128xf32, #tpu.memory_space<vmem>>, vector<1x32xf32>
    %cst_241 = arith.constant dense<0.000000e+00> : vector<16xf32>
    %590 = vector.multi_reduction <add>, %587, %cst_241 [1] : vector<16x32xf32> to vector<16xf32>
    %591 = vector.shape_cast %590 : vector<16xf32> to vector<16x1xf32>
    %cst_242 = arith.constant 3.200000e+01 : f32
    %592 = vector.broadcast %cst_242 : f32 to vector<16x1xf32>
    %593 = arith.divf %591, %592 : vector<16x1xf32>
    %594 = vector.broadcast %593 : vector<16x1xf32> to vector<16x32xf32>
    %595 = arith.subf %587, %594 : vector<16x32xf32>
    %596 = arith.mulf %595, %595 : vector<16x32xf32>
    %cst_243 = arith.constant dense<0.000000e+00> : vector<16xf32>
    %597 = vector.multi_reduction <add>, %596, %cst_243 [1] : vector<16x32xf32> to vector<16xf32>
    %598 = vector.shape_cast %597 : vector<16xf32> to vector<16x1xf32>
    %cst_244 = arith.constant 3.200000e+01 : f32
    %599 = vector.broadcast %cst_244 : f32 to vector<16x1xf32>
    %600 = arith.divf %598, %599 : vector<16x1xf32>
    %601 = vector.broadcast %593 : vector<16x1xf32> to vector<16x32xf32>
    %602 = arith.subf %587, %601 : vector<16x32xf32>
    %cst_245 = arith.constant 9.99999974E-6 : f32
    %603 = vector.broadcast %cst_245 : f32 to vector<16x1xf32>
    %604 = arith.addf %600, %603 : vector<16x1xf32>
    %605 = math.rsqrt %604 : vector<16x1xf32>
    %606 = vector.broadcast %605 : vector<16x1xf32> to vector<16x32xf32>
    %607 = arith.mulf %602, %606 : vector<16x32xf32>
    %608 = vector.broadcast %588 : vector<1x32xf32> to vector<16x32xf32>
    %609 = arith.mulf %607, %608 : vector<16x32xf32>
    %610 = vector.broadcast %589 : vector<1x32xf32> to vector<16x32xf32>
    %611 = arith.addf %609, %610 : vector<16x32xf32>
    %c1136 = arith.constant 1136 : index
    %c0_246 = arith.constant 0 : index
    %612 = vector.load %arg1[%c1136, %c0_246] : memref<1192x128xf32, #tpu.memory_space<vmem>>, vector<1x32xf32>
    %c1144 = arith.constant 1144 : index
    %c0_247 = arith.constant 0 : index
    %613 = vector.load %arg1[%c1144, %c0_247] : memref<1192x128xf32, #tpu.memory_space<vmem>>, vector<1x32xf32>
    %cst_248 = arith.constant dense<0.000000e+00> : vector<16xf32>
    %614 = vector.multi_reduction <add>, %611, %cst_248 [1] : vector<16x32xf32> to vector<16xf32>
    %615 = vector.shape_cast %614 : vector<16xf32> to vector<16x1xf32>
    %cst_249 = arith.constant 3.200000e+01 : f32
    %616 = vector.broadcast %cst_249 : f32 to vector<16x1xf32>
    %617 = arith.divf %615, %616 : vector<16x1xf32>
    %618 = vector.broadcast %617 : vector<16x1xf32> to vector<16x32xf32>
    %619 = arith.subf %611, %618 : vector<16x32xf32>
    %620 = arith.mulf %619, %619 : vector<16x32xf32>
    %cst_250 = arith.constant dense<0.000000e+00> : vector<16xf32>
    %621 = vector.multi_reduction <add>, %620, %cst_250 [1] : vector<16x32xf32> to vector<16xf32>
    %622 = vector.shape_cast %621 : vector<16xf32> to vector<16x1xf32>
    %cst_251 = arith.constant 3.200000e+01 : f32
    %623 = vector.broadcast %cst_251 : f32 to vector<16x1xf32>
    %624 = arith.divf %622, %623 : vector<16x1xf32>
    %625 = vector.broadcast %617 : vector<16x1xf32> to vector<16x32xf32>
    %626 = arith.subf %611, %625 : vector<16x32xf32>
    %cst_252 = arith.constant 9.99999974E-6 : f32
    %627 = vector.broadcast %cst_252 : f32 to vector<16x1xf32>
    %628 = arith.addf %624, %627 : vector<16x1xf32>
    %629 = math.rsqrt %628 : vector<16x1xf32>
    %630 = vector.broadcast %629 : vector<16x1xf32> to vector<16x32xf32>
    %631 = arith.mulf %626, %630 : vector<16x32xf32>
    %632 = vector.broadcast %612 : vector<1x32xf32> to vector<16x32xf32>
    %633 = arith.mulf %631, %632 : vector<16x32xf32>
    %634 = vector.broadcast %613 : vector<1x32xf32> to vector<16x32xf32>
    %635 = arith.addf %633, %634 : vector<16x32xf32>
    %c1152 = arith.constant 1152 : index
    %c0_253 = arith.constant 0 : index
    %636 = vector.load %arg1[%c1152, %c0_253] : memref<1192x128xf32, #tpu.memory_space<vmem>>, vector<32x128xf32>
    %cst_254 = arith.constant dense<0.000000e+00> : vector<16x128xf32>
    %637 = tpu.matmul %635, %636, %cst_254 {dimension_numbers = #tpu.dot_dimension_numbers<[1], [0], [0], [1], [0, 0, 1, 1], [], []>} : vector<16x32xf32>, vector<32x128xf32>, vector<16x128xf32> -> vector<16x128xf32>
    %c1184 = arith.constant 1184 : index
    %c0_255 = arith.constant 0 : index
    %638 = vector.load %arg1[%c1184, %c0_255] : memref<1192x128xf32, #tpu.memory_space<vmem>>, vector<1x128xf32>
    %639 = vector.broadcast %638 : vector<1x128xf32> to vector<16x128xf32>
    %640 = arith.addf %637, %639 : vector<16x128xf32>
    %c0_256 = arith.constant 0 : index
    %c0_257 = arith.constant 0 : index
    %641 = vector.load %arg2[%c0_256, %c0_257] : memref<16x128xf32, #tpu.memory_space<vmem>>, vector<16x128xf32>
    tpu.vector_store %arg2[%c0_256, %c0_257], %640 {strides = array<i32>} : memref<16x128xf32, #tpu.memory_space<vmem>>, vector<16x128xf32>,
    return
  }
}

</mosaic_0001>

<bundles_post_ra>
// kernel: transformer_forward.1
= control target key start
LH: loop header
LB: loop body
LE: loop exit
PB: predicated region body
PF: predicated region fallthrough
CT: control target
= control target key end

     0   :  { %7 = vsyncpa [#allocation3], 0  ;;  %s13785_s9 = smov [#allocation2]   ;;  %s14814_s0 = inlined_call_operand.vmem [shape: f32[16,12], index: 0, kind: input, shape index: {}]   ;;  %s14815_s1 = inlined_call_operand.hbm [shape: f32[1192,128], index: 1, kind: input, shape index: {}]   ;;  %s14816_s2 = inlined_call_operand.vmem [shape: f32[16,128], index: 2, kind: output, shape index: {}]  }
   0x1   :  { %s15_s10 = sshll.u32 %s13785_s9, 4  ;;  %s16_s10 = int_to_ptr.vmem [resolvable:$true] %s15_s10 }
   0x2   :  { %s13771_s11 = scalar_lea.vmem %s16_s10, 19072  ;;  %p13776_p1 = scmp.lt.s32.totalorder %s16_s10, %s16_s10 }
   0x3   :  { %p13772_p0 = scmp.ne.s32.totalorder %s16_s10, %s13771_s11  ;;  %p13777_p2 = scmp.lt.s32.totalorder %s13771_s11, %s13771_s11 }
   0x5   :  { %p13778_p3 = por %p13777_p2, %p13776_p1 }
   0x7   :  { %p13779_p4 = pnand %p13778_p3, %p13772_p0 }
   0x9   :  { %13782 = shalt.err (!%p13779_p4)
}
   0xa   :  { %s13786_s12 = smov 128   ;;  %s13787_s13 = smov 8  }
   0xb   :  { %21 = dma.hbm_to_vmem [thread:$0]  %s14815_s1, 19072, %s16_s10, [#allocation3], %s13786_s12, %s13786_s12, %s13787_s13  }
   0xc   :  { %13783 = dma.done.wait [#allocation3], 19072  }
   0xd   :  { %13784 = vsyncadd [#allocation3], 4294948224  ;;  %vm38_vm0 = vcmask 1043456   ;;  %vm31_vm1 = vcmask 97280   ;;  %v28_v0 = vld [vmem:[#allocation2 + $0x8] sm:$0xf]  ;;  %v1085_v25 = vlaneseq }
   0xe   :  { %v27_v1 = vld [vmem:[#allocation2] sm:$0xff]  ;;  %12845 = vmatprep.subr.msk.mxu0 %vm38_vm0, %v28_v0  ;;  %v26_v3 = vld [vmem:[%s14814_s0 + $0x8] sm:$0xff]  ;;  %vm118_vm2 = vcmask 261120   ;;  %v282_v6 = vld [vmem:[#allocation2 + $0x30] sm:$0xff]  ;;  %v13788_v22 = vmov 0.0   ;;  %vm13789_vm3 = vmmov 0  }
   0xf   :  { %v25_v2 = vld [vmem:[%s14814_s0] sm:$0xff]  ;;  %12846 = vmatpush3.msk.msra.mxu0 %vm38_vm0, %v28_v0  ;;  %v203_v5 = vld [vmem:[#allocation2 + $0x28] sm:$0xff]  ;;  %v361_v7 = vld [vmem:[#allocation2 + $0x38] sm:$0xff]  ;;  %v13790_v23 = vmov 1966171168   ;;  %v13898_v27 = vshrl.u32 %v1085_v25, 7 }
  0x10   :  { %12849 = vmatprep.mubr.msk.f32.mxu0 %vm31_vm1, %v25_v2  ;;  %12847 = vmatprep.subr.mxu0 %v27_v1  ;;  %v117_v4 = vld [vmem:[#allocation2 + $0x20] sm:$0xff]  ;;  %v29_v9 = vld [vmem:[#allocation2 + $0x10] sm:$0xff]  ;;  %v30_v10 = vld [vmem:[#allocation2 + $0x18] sm:$0xff]  ;;  %v1083_v24 = vunpack.c.l.s4 %v13790_v23  ;;  %vm1242_vm4 = vcmask 64512   ;;  %vm3010_vm5 = vcmask 523264  }
  0x11   :  { %12848 = vmatpush3.msra.mxu0 %v27_v1  ;;  %12852 = vmatprep.subr.msk.mxu1 %vm118_vm2, %v117_v4  ;;  %v440_v14 = vld [vmem:[#allocation2 + $0x40] sm:$0xff]  ;;  %v519_v15 = vld [vmem:[#allocation2 + $0x48] sm:$0xff]  ;;  %v598_v16 = vld [vmem:[#allocation2 + $0x50] sm:$0xff]  ;;  %v13905_v33 = vsub.s32 0, %v13898_v27 }
  0x12   :  { %12850 = vmatmul.mubr.msk.f32.vlgmr.msra.gmra.mxu0 %vm31_vm1, %v26_v3  ;;  %12857 = vmatprep.subr.msk.mxu0 %vm118_vm2, %v203_v5  ;;  %v677_v17 = vld [vmem:[#allocation2 + $0x58] sm:$0xff]  ;;  %v756_v18 = vld [vmem:[#allocation2 + $0x60] sm:$0xff]  ;;  %v835_v19 = vld [vmem:[#allocation2 + $0x68] sm:$0xff]  ;;  %v1084_v26 = vunpack.c.0.s8 %v1083_v24 }
  0x13   :  { %12853 = vmatpush3.xpose.msk.msra.mxu1 %vm118_vm2, %v117_v4  ;;  %12858 = vmatpush3.xpose.msk.msra.mxu0 %vm118_vm2, %v203_v5  ;;  %v914_v20 = vld [vmem:[#allocation2 + $0x70] sm:$0xff]  ;;  %v993_v21 = vld [vmem:[#allocation2 + $0x78] sm:$0xff]  ;;  %v12176_v29 = vld.sshfl [vmem:[#allocation2 + $0x80] sm:$0x33 pattern:$0x75316420] }
  0x14   :  { %12862 = vmatprep.subr.msk.mxu1 %vm118_vm2, %v282_v6  ;;  %12867 = vmatprep.subr.msk.mxu0 %vm118_vm2, %v361_v7  ;;  %v13901_v28 = vsub.s32 %v1084_v26, %v13898_v27  ;;  %v12177_v30 = vld.sshfl [vmem:[#allocation2 + $0x88] sm:$0x33 pattern:$0x75316420]  ;;  %v1081_v35 = vcombine.high %v12176_v29, %v12176_v29 }
  0x15   :  { %v1143_v37 = vcombine.high %v12177_v30, %v12177_v30  ;;  %v12178_v40 = vld.sshfl [vmem:[#allocation2 + $0x90] sm:$0x33 pattern:$0x75316420] }
  0x16   :  { %v1088_v32 = vrot.slane %v12176_v29, %v13901_v28  ;;  %v1150_v36 = vrot.slane %v12177_v30, %v13901_v28  ;;  %v1095_v42 = vrot.slane %v1081_v35, %v13901_v28  ;;  %v1197_v48 = vcombine.high %v12178_v40, %v12178_v40 }
  0x17   :  { %v1157_v46 = vrot.slane %v1143_v37, %v13901_v28  ;;  %v1204_v63 = vrot.slane %v12178_v40, %v13901_v28 }
  0x18   :  { %v1101_v41 = vrot.slane %v1088_v32, %v13905_v33  ;;  %v1163_v45 = vrot.slane %v1150_v36, %v13905_v33  ;;  %v1105_v51 = vrot.slane %v1095_v42, %v13905_v33  ;;  %v1096_v52 = vcombine.high %v1088_v32, %v1088_v32 }
  0x19   :  { %v1167_v56 = vrot.slane %v1157_v46, %v13905_v33  ;;  %v1158_v57 = vcombine.high %v1150_v36, %v1150_v36  ;;  %v1211_v60 = vrot.slane %v1197_v48, %v13901_v28  ;;  %v1097_v3 = vcombine.high %v1095_v42, %v1095_v42 }
  0x1a   :  { %v1109_v2 = vrot.slane %v1096_v52, %v13905_v33 }
  0xd2   :  { %v12851_v8 = vpop.f32.mrf.mxu0 }
  0xd3   :  { %v13823_v13 = vadd.f32 %v12851_v8, %v30_v10  ;;  %v1159_v8 = vcombine.high %v1157_v46, %v1157_v46 }
  0xd4   :  { %v108_v11 = vpop.f32.mrf.mxu0 }
  0xd5   :  { %v13821_v12 = vadd.f32 %v108_v11, %v29_v9  ;;  %v1212_v9 = vcombine.high %v1204_v63, %v1204_v63  ;;  %v1175_v26 = vrot.slane %v1159_v8, %v13905_v33 }
  0xd7   :  { %12854 = vmatprep.mubr.msk.f32.mxu1 %vm118_vm2, %v13821_v12  ;;  %12859 = vmatprep.mubr.msk.f32.mxu0 %vm118_vm2, %v13821_v12  ;;  %v13941_v30 = vrot.slane %v1212_v9, %v13905_v33 }
  0xd8   :  { %12855 = vmatmul.mubr.msk.f32.vlgmr.msra.gmra.mxu1 %vm118_vm2, %v13823_v13  ;;  %12860 = vmatmul.mubr.msk.f32.vlgmr.msra.gmra.mxu0 %vm118_vm2, %v13823_v13 }
  0xd9   :  { %12863 = vmatpush3.xpose.msk.msra.mxu1 %vm118_vm2, %v282_v6  ;;  %12864 = vmatprep.mubr.msk.f32.mxu1 %vm118_vm2, %v13821_v12  ;;  %v1171_v6 = vrot.slane %v1158_v57, %v13905_v33 }
  0xda   :  { %12868 = vmatpush3.xpose.msk.msra.mxu0 %vm118_vm2, %v361_v7  ;;  %12869 = vmatprep.mubr.msk.f32.mxu0 %vm118_vm2, %v13821_v12 }
  0xdb   :  { %12872 = vmatprep.subr.msk.mxu1 %vm118_vm2, %v440_v14  ;;  %12877 = vmatprep.subr.msk.mxu0 %vm118_vm2, %v519_v15 }
  0xdc   :  { %12865 = vmatmul.mubr.msk.f32.vlgmr.msra.gmra.mxu1 %vm118_vm2, %v13823_v13 }
  0xdd   :  { %12870 = vmatmul.mubr.msk.f32.vlgmr.msra.gmra.mxu0 %vm118_vm2, %v13823_v13  ;;  %12873 = vmatpush3.xpose.msk.msra.mxu1 %vm118_vm2, %v440_v14 }
  0xde   :  { %12874 = vmatprep.mubr.msk.f32.mxu1 %vm118_vm2, %v13821_v12  ;;  %12878 = vmatpush3.xpose.msk.msra.mxu0 %vm118_vm2, %v519_v15  ;;  %v13927_v15 = vrot.slane %v1211_v60, %v13905_v33 }
  0xdf   :  { %12879 = vmatprep.mubr.msk.f32.mxu0 %vm118_vm2, %v13821_v12  ;;  %12882 = vmatprep.subr.msk.mxu1 %vm118_vm2, %v598_v16 }
  0xe0   :  { %12875 = vmatmul.mubr.msk.f32.vlgmr.msra.gmra.mxu1 %vm118_vm2, %v13823_v13  ;;  %12887 = vmatprep.subr.msk.mxu0 %vm118_vm2, %v677_v17 }
  0xe1   :  { %12880 = vmatmul.mubr.msk.f32.vlgmr.msra.gmra.mxu0 %vm118_vm2, %v13823_v13  ;;  %12883 = vmatpush3.xpose.msk.msra.mxu1 %vm118_vm2, %v598_v16  ;;  %v1213_v16 = vcombine.high %v1211_v60, %v1211_v60 }
  0xe2   :  { %12884 = vmatprep.mubr.msk.f32.mxu1 %vm118_vm2, %v13821_v12  ;;  %12888 = vmatpush3.xpose.msk.msra.mxu0 %vm118_vm2, %v677_v17 }
  0xe3   :  { %12889 = vmatprep.mubr.msk.f32.mxu0 %vm118_vm2, %v13821_v12  ;;  %12892 = vmatprep.subr.msk.mxu1 %vm118_vm2, %v756_v18  ;;  %v13948_v36 = vrot.slane %v1213_v16, %v13905_v33 }
  0xe4   :  { %12885 = vmatmul.mubr.msk.f32.vlgmr.msra.gmra.mxu1 %vm118_vm2, %v13823_v13  ;;  %12897 = vmatprep.subr.msk.mxu0 %vm118_vm2, %v835_v19 }
  0xe5   :  { %12890 = vmatmul.mubr.msk.f32.vlgmr.msra.gmra.mxu0 %vm118_vm2, %v13823_v13  ;;  %12893 = vmatpush3.xpose.msk.msra.mxu1 %vm118_vm2, %v756_v18 }
  0xe6   :  { %12894 = vmatprep.mubr.msk.f32.mxu1 %vm118_vm2, %v13821_v12  ;;  %12898 = vmatpush3.xpose.msk.msra.mxu0 %vm118_vm2, %v835_v19 }
  0xe7   :  { %12899 = vmatprep.mubr.msk.f32.mxu0 %vm118_vm2, %v13821_v12  ;;  %12902 = vmatprep.subr.msk.mxu1 %vm118_vm2, %v914_v20 }
  0xe8   :  { %12895 = vmatmul.mubr.msk.f32.vlgmr.msra.gmra.mxu1 %vm118_vm2, %v13823_v13  ;;  %12907 = vmatprep.subr.msk.mxu0 %vm118_vm2, %v993_v21 }
  0xe9   :  { %12900 = vmatmul.mubr.msk.f32.vlgmr.msra.gmra.mxu0 %vm118_vm2, %v13823_v13  ;;  %12903 = vmatpush3.xpose.msk.msra.mxu1 %vm118_vm2, %v914_v20 }
  0xea   :  { %12904 = vmatprep.mubr.msk.f32.mxu1 %vm118_vm2, %v13821_v12  ;;  %12908 = vmatpush3.xpose.msk.msra.mxu0 %vm118_vm2, %v993_v21  ;;  %v1113_v21 = vrot.slane %v1097_v3, %v13905_v33 }
  0xeb   :  { %12909 = vmatprep.mubr.msk.f32.mxu0 %vm118_vm2, %v13821_v12  ;;  %12917 = vmatprep.subr.mxu0 %v13788_v22 }
  0xec   :  { %12905 = vmatmul.mubr.msk.f32.vlgmr.msra.gmra.mxu1 %vm118_vm2, %v13823_v13  ;;  %12912 = vmatprep.subr.mxu1 %v13788_v22 }
  0xed   :  { %12910 = vmatmul.mubr.msk.f32.vlgmr.msra.gmra.mxu0 %vm118_vm2, %v13823_v13  ;;  %12914 = vmatprep.mubr.msk.f32.mxu1 %vm13789_vm3, %v13788_v22 }
  0xee   :  { %12919 = vmatprep.mubr.msk.f32.mxu0 %vm13789_vm3, %v13788_v22 }
 0x198   :  { %v12856_v31 = vpop.f32.mrf.mxu1  ;;  %v12861_v34 = vpop.f32.mrf.mxu0 }
 0x199   :  { %v1119_v50 = vadd.f32 %v12856_v31, %v1101_v41  ;;  %v1121_v1 = vadd.f32 %v12861_v34, %v1105_v51 }
 0x19a   :  { %v194_v38 = vpop.f32.mrf.mxu1  ;;  %v273_v39 = vpop.f32.mrf.mxu0 }
 0x19b   :  { %v1118_v58 = vadd.f32 %v1101_v41, %v194_v38  ;;  %v1127_v0 = vmul.f32 0.35355338, %v1119_v50  ;;  %v1120_v11 = vadd.f32 %v1105_v51, %v273_v39  ;;  %v1129_v19 = vmul.f32 0.35355338, %v1121_v1 }
 0x19c   :  { %v12866_v43 = vpop.f32.mrf.mxu1 }
 0x19d   :  { %v13910_v44 = vpop.f32.mrf.mxu0  ;;  %v1126_v10 = vmul.f32 0.35355338, %v1118_v58  ;;  %v1123_v20 = vadd.f32 %v12866_v43, %v1109_v2  ;;  %v1128_v31 = vmul.f32 0.35355338, %v1120_v11  ;;  %v1217_v43 = vrot.slane %v1204_v63, %v13905_v33 }
 0x19e   :  { %v352_v47 = vpop.f32.mrf.mxu1  ;;  %v1125_v40 = vadd.f32 %v13910_v44, %v1113_v21 }
 0x19f   :  { %v13914_v49 = vpop.f32.mrf.mxu0  ;;  %v1122_v32 = vadd.f32 %v1109_v2, %v352_v47  ;;  %v1131_v39 = vmul.f32 0.35355338, %v1123_v20 }
 0x1a0   :  { %v12876_v53 = vpop.f32.mrf.mxu1  ;;  %v1124_v44 = vadd.f32 %v1113_v21, %v13914_v49  ;;  %v1133_v51 = vmul.f32 0.35355338, %v1125_v40 }
 0x1a1   :  { %v1181_v54 = vadd.f32 %v12876_v53, %v1163_v45  ;;  %v12881_v55 = vpop.f32.mrf.mxu0  ;;  %v1130_v47 = vmul.f32 0.35355338, %v1122_v32 }
 0x1a2   :  { %v510_v59 = vpop.f32.mrf.mxu1  ;;  %v1183_v5 = vadd.f32 %v12881_v55, %v1167_v56  ;;  %v1132_v49 = vmul.f32 0.35355338, %v1124_v44 }
 0x1a3   :  { %v1180_v61 = vadd.f32 %v1163_v45, %v510_v59  ;;  %v589_v62 = vpop.f32.mrf.mxu0  ;;  %12918 = vmatpush3.xpose.msk.msra.mxu0 %vm1242_vm4, %v1181_v54 }
 0x1a4   :  { %v12886_v4 = vpop.f32.mrf.mxu1  ;;  %12927 = vmatprep.subr.mxu0 %v13788_v22  ;;  %v1182_v17 = vadd.f32 %v1167_v56, %v589_v62 }
 0x1a5   :  { %v12891_v7 = vpop.f32.mrf.mxu0  ;;  %12913 = vmatpush3.xpose.msk.msra.mxu1 %vm1242_vm4, %v1180_v61  ;;  %v1185_v24 = vadd.f32 %v12886_v4, %v1171_v6 }
 0x1a6   :  { %v668_v14 = vpop.f32.mrf.mxu1  ;;  %12920 = vmatmul.mubr.msk.f32.vlgmr.msra.gmra.mxu0 %vm1242_vm4, %v1127_v0  ;;  %12922 = vmatprep.subr.mxu1 %v13788_v22  ;;  %v1187_v42 = vadd.f32 %v12891_v7, %v1175_v26 }
 0x1a7   :  { %v747_v18 = vpop.f32.mrf.mxu0  ;;  %12928 = vmatpush3.xpose.msk.msra.mxu0 %vm1242_vm4, %v1183_v5  ;;  %12929 = vmatprep.mubr.msk.f32.mxu0 %vm13789_vm3, %v13788_v22  ;;  %v1184_v37 = vadd.f32 %v1171_v6, %v668_v14 }
 0x1a8   :  { %v12896_v23 = vpop.f32.mrf.mxu1  ;;  %12915 = vmatmul.mubr.msk.f32.vlgmr.msra.gmra.mxu1 %vm1242_vm4, %v1126_v10  ;;  %12937 = vmatprep.subr.mxu0 %v13788_v22  ;;  %v1186_v50 = vadd.f32 %v1175_v26, %v747_v18 }
 0x1a9   :  { %v12901_v29 = vpop.f32.mrf.mxu0  ;;  %12923 = vmatpush3.xpose.msk.msra.mxu1 %vm1242_vm4, %v1182_v17  ;;  %12924 = vmatprep.mubr.msk.f32.mxu1 %vm13789_vm3, %v13788_v22  ;;  %v1235_v52 = vadd.f32 %v12896_v23, %v1217_v43 }
 0x1aa   :  { %v13944_v34 = vadd.f32 %v12901_v29, %v13927_v15  ;;  %v826_v35 = vpop.f32.mrf.mxu1  ;;  %12930 = vmatmul.mubr.msk.f32.vlgmr.msra.gmra.mxu0 %vm1242_vm4, %v1129_v19  ;;  %12932 = vmatprep.subr.mxu1 %v13788_v22 }
 0x1ab   :  { %v13951_v38 = vpop.f32.mrf.mxu0  ;;  %12938 = vmatpush3.xpose.msk.msra.mxu0 %vm1242_vm4, %v1185_v24  ;;  %12939 = vmatprep.mubr.msk.f32.mxu0 %vm13789_vm3, %v13788_v22  ;;  %v1234_v53 = vadd.f32 %v1217_v43, %v826_v35 }
 0x1ac   :  { %v12906_v41 = vpop.f32.mrf.mxu1  ;;  %12925 = vmatmul.mubr.msk.f32.vlgmr.msra.gmra.mxu1 %vm1242_vm4, %v1128_v31  ;;  %12947 = vmatprep.subr.mxu0 %v13788_v22 }
 0x1ad   :  { %v13961_v45 = vadd.f32 %v12906_v41, %v13941_v30  ;;  %v12911_v46 = vpop.f32.mrf.mxu0  ;;  %12933 = vmatpush3.xpose.msk.msra.mxu1 %vm1242_vm4, %v1184_v37  ;;  %12934 = vmatprep.mubr.msk.f32.mxu1 %vm13789_vm3, %v13788_v22 }
 0x1ae   :  { %v13968_v48 = vadd.f32 %v12911_v46, %v13948_v36  ;;  %12940 = vmatmul.mubr.msk.f32.vlgmr.msra.gmra.mxu0 %vm1242_vm4, %v1131_v39  ;;  %12942 = vmatprep.subr.mxu1 %v13788_v22  ;;  %v13991_v55 = vpop.f32.mrf.mxu1 }
 0x1af   :  { %12948 = vmatpush3.xpose.msk.msra.mxu0 %vm1242_vm4, %v1187_v42  ;;  %12949 = vmatprep.mubr.msk.f32.mxu0 %vm13789_vm3, %v13788_v22  ;;  %v13989_v54 = vpop.f32.mrf.mxu0 }
 0x1b0   :  { %12935 = vmatmul.mubr.msk.f32.vlgmr.msra.gmra.mxu1 %vm1242_vm4, %v1130_v47  ;;  %12957 = vmatprep.subr.mxu0 %v13788_v22 }
 0x1b1   :  { %12943 = vmatpush3.xpose.msk.msra.mxu1 %vm1242_vm4, %v1186_v50  ;;  %12944 = vmatprep.mubr.msk.f32.mxu1 %vm13789_vm3, %v13788_v22 }
 0x1b2   :  { %12950 = vmatmul.mubr.msk.f32.vlgmr.msra.gmra.mxu0 %vm1242_vm4, %v1133_v51  ;;  %12952 = vmatprep.subr.mxu1 %v13788_v22 }
 0x1b3   :  { %12958 = vmatpush3.msra.mxu0 %v1235_v52  ;;  %12959 = vmatprep.mubr.msk.f32.mxu0 %vm13789_vm3, %v13788_v22 }
 0x1b4   :  { %12945 = vmatmul.mubr.msk.f32.vlgmr.msra.gmra.mxu1 %vm1242_vm4, %v1132_v49  ;;  %12967 = vmatprep.subr.mxu0 %v13788_v22 }
 0x1b5   :  { %12953 = vmatpush3.msra.mxu1 %v1234_v53  ;;  %12954 = vmatprep.mubr.msk.f32.mxu1 %vm13789_vm3, %v13788_v22 }
 0x1b6   :  { %12962 = vmatprep.subr.mxu1 %v13788_v22 }
 0x266   :  { %v1391_v56 = vpop.f32.mrf.mxu0 }
 0x267   :  { %v1854_v0 = vsel %vm1242_vm4, %v1391_v56, -inf }
 0x268   :  { %v1315_v57 = vpop.f32.mrf.mxu1  ;;  %v12921_v58 = vpop.f32.mrf.mxu0 }
 0x269   :  { %v1851_v59 = vsel %vm1242_vm4, %v1315_v57, -inf }
 0x26a   :  { %v1543_v60 = vpop.f32.mrf.mxu0  ;;  %1852 = vmax.xlane.f32.xlu0 %v1851_v59  ;;  %v12916_v61 = vpop.f32.mrf.mxu1 }
 0x26b   :  { %v1860_v6 = vsel %vm1242_vm4, %v1543_v60, -inf }
 0x26c   :  { %v1467_v62 = vpop.f32.mrf.mxu1  ;;  %v12931_v63 = vpop.f32.mrf.mxu0 }
 0x26d   :  { %v1857_v1 = vsel %vm1242_vm4, %v1467_v62, -inf }
 0x26e   :  { %v1695_v2 = vpop.f32.mrf.mxu0  ;;  %1855 = vmax.xlane.f32.xlu0 %v1854_v0  ;;  %1858 = vmax.xlane.f32.xlu1 %v1857_v1  ;;  %v12926_v3 = vpop.f32.mrf.mxu1 }
 0x26f   :  { %v1866_v14 = vsel %vm1242_vm4, %v1695_v2, -inf }
 0x270   :  { %v1619_v4 = vpop.f32.mrf.mxu1  ;;  %v12941_v5 = vpop.f32.mrf.mxu0 }
 0x271   :  { %v1863_v7 = vsel %vm1242_vm4, %v1619_v4, -inf }
 0x272   :  { %v1847_v8 = vpop.f32.mrf.mxu0  ;;  %1861 = vmax.xlane.f32.xlu1 %v1860_v6  ;;  %1864 = vmax.xlane.f32.xlu0 %v1863_v7  ;;  %v12936_v9 = vpop.f32.mrf.mxu1 }
 0x273   :  { %v1872_v18 = vsel %vm1242_vm4, %v1847_v8, -inf }
 0x274   :  { %v1771_v10 = vpop.f32.mrf.mxu1  ;;  %v12951_v11 = vpop.f32.mrf.mxu0 }
 0x275   :  { %v1869_v16 = vsel %vm1242_vm4, %v1771_v10, -inf }
 0x276   :  { %1867 = vmax.xlane.f32.xlu1 %v1866_v14  ;;  %1870 = vmax.xlane.f32.xlu0 %v1869_v16  ;;  %v12946_v17 = vpop.f32.mrf.mxu1 }
 0x27a   :  { %1873 = vmax.xlane.f32.xlu1 %v1872_v18 }
 0x2f3   :  { %v1853_v19 = vpop.xlane.xlu0 %1852 }
 0x2f4   :  { %v1875_v20 = vsub.f32 %v1315_v57, %v1853_v19 }
 0x2f6   :  { %v1883_v21 = vmul.f32 1.442695, %v1875_v20  ;;  %v1236_v20 = vadd.f32 %v13927_v15, %v13951_v38 }
 0x2f7   :  { %v1856_v23 = vpop.xlane.xlu0 %1855  ;;  %v1859_v24 = vpop.xlane.xlu1 %1858 }
 0x2f8   :  { %13599 = vpow2.f32 %v1883_v21  ;;  %v1876_v26 = vsub.f32 %v1391_v56, %v1856_v23  ;;  %v1877_v29 = vsub.f32 %v1467_v62, %v1859_v24 }
 0x2fa   :  { %v1885_v31 = vmul.f32 1.442695, %v1876_v26  ;;  %v1887_v32 = vmul.f32 1.442695, %v1877_v29 }
 0x2fb   :  { %v1862_v35 = vpop.xlane.xlu1 %1861  ;;  %v1865_v37 = vpop.xlane.xlu0 %1864 }
 0x2fc   :  { %13601 = vpow2.f32 %v1885_v31  ;;  %v1878_v39 = vsub.f32 %v1543_v60, %v1862_v35  ;;  %v1879_v40 = vsub.f32 %v1619_v4, %v1865_v37  ;;  %v1238_v31 = vadd.f32 %v13941_v30, %v13991_v55 }
 0x2fd   :  { %13603 = vpow2.f32 %v1887_v32  ;;  %v1240_v30 = vadd.f32 %v13948_v36, %v13989_v54 }
 0x2fe   :  { %v1889_v41 = vmul.f32 1.442695, %v1878_v39  ;;  %v1891_v42 = vmul.f32 1.442695, %v1879_v40  ;;  %v2523_v39 = vld [vmem:[#allocation2 + $0x98] sm:$0xff]  ;;  %v2610_v40 = vld [vmem:[#allocation2 + $0xa0] sm:$0xff] }
 0x2ff   :  { %v1868_v43 = vpop.xlane.xlu1 %1867  ;;  %v1871_v46 = vpop.xlane.xlu0 %1870 }
 0x300   :  { %13605 = vpow2.f32 %v1889_v41  ;;  %v1880_v47 = vsub.f32 %v1695_v2, %v1868_v43  ;;  %v1881_v44 = vsub.f32 %v1771_v10, %v1871_v46  ;;  %v2694_v41 = vld [vmem:[#allocation2 + $0xa8] sm:$0xff] }
 0x301   :  { %13607 = vpow2.f32 %v1891_v42  ;;  %v2778_v42 = vld [vmem:[#allocation2 + $0xb0] sm:$0xff] }
 0x302   :  { %v1893_v50 = vmul.f32 1.442695, %v1880_v47  ;;  %v1895_v51 = vmul.f32 1.442695, %v1881_v44 }
 0x303   :  { %v1874_v52 = vpop.xlane.xlu1 %1873 }
 0x304   :  { %13609 = vpow2.f32 %v1893_v50  ;;  %v1882_v49 = vsub.f32 %v1847_v8, %v1874_v52 }
 0x305   :  { %v13600_v53 = vpop.eup %13599  ;;  %13611 = vpow2.f32 %v1895_v51 }
 0x306   :  { %v1897_v56 = vmul.f32 1.442695, %v1882_v49  ;;  %v1899_v57 = vsel %vm1242_vm4, %v13600_v53, 0.0 }
 0x307   :  { %1900 = vadd.xlane.f32.xlu0 %v1899_v57 }
 0x308   :  { %13613 = vpow2.f32 %v1897_v56 }
 0x309   :  { %v13602_v58 = vpop.eup %13601 }
 0x30a   :  { %v13604_v59 = vpop.eup %13603  ;;  %v1902_v60 = vsel %vm1242_vm4, %v13602_v58, 0.0 }
 0x30b   :  { %1903 = vadd.xlane.f32.xlu1 %v1902_v60  ;;  %v1905_v61 = vsel %vm1242_vm4, %v13604_v59, 0.0 }
 0x30c   :  { %1906 = vadd.xlane.f32.xlu0 %v1905_v61 }
 0x30d   :  { %v13606_v62 = vpop.eup %13605 }
 0x30e   :  { %v13608_v63 = vpop.eup %13607  ;;  %v1908_v0 = vsel %vm1242_vm4, %v13606_v62, 0.0 }
 0x30f   :  { %1909 = vadd.xlane.f32.xlu1 %v1908_v0  ;;  %v1911_v1 = vsel %vm1242_vm4, %v13608_v63, 0.0 }
 0x310   :  { %1912 = vadd.xlane.f32.xlu0 %v1911_v1 }
 0x311   :  { %v13610_v2 = vpop.eup %13609 }
 0x312   :  { %v13612_v3 = vpop.eup %13611  ;;  %v1914_v4 = vsel %vm1242_vm4, %v13610_v2, 0.0 }
 0x313   :  { %1915 = vadd.xlane.f32.xlu1 %v1914_v4  ;;  %v1917_v5 = vsel %vm1242_vm4, %v13612_v3, 0.0 }
 0x314   :  { %1918 = vadd.xlane.f32.xlu0 %v1917_v5 }
 0x315   :  { %v13614_v6 = vpop.eup %13613 }
 0x316   :  { %v1920_v7 = vsel %vm1242_vm4, %v13614_v6, 0.0 }
 0x317   :  { %1921 = vadd.xlane.f32.xlu1 %v1920_v7 }
 0x390   :  { %v1901_v8 = vpop.xlane.xlu0 %1900 }
 0x391   :  { %13615 = vrcp.f32 %v1901_v8 }
 0x394   :  { %v1904_v9 = vpop.xlane.xlu1 %1903 }
 0x395   :  { %13617 = vrcp.f32 %v1904_v9  ;;  %v1907_v10 = vpop.xlane.xlu0 %1906 }
 0x396   :  { %13619 = vrcp.f32 %v1907_v10 }
 0x398   :  { %v1910_v11 = vpop.xlane.xlu1 %1909 }
 0x399   :  { %13621 = vrcp.f32 %v1910_v11  ;;  %v1913_v14 = vpop.xlane.xlu0 %1912 }
 0x39a   :  { %13623 = vrcp.f32 %v1913_v14 }
 0x39c   :  { %v1916_v16 = vpop.xlane.xlu1 %1915 }
 0x39d   :  { %13625 = vrcp.f32 %v1916_v16  ;;  %v1919_v17 = vpop.xlane.xlu0 %1918 }
 0x39e   :  { %v13616_v18 = vpop.eup %13615  ;;  %13627 = vrcp.f32 %v1919_v17 }
 0x39f   :  { %v1931_v19 = vmul.f32 %v13616_v18, %v13600_v53 }
 0x3a0   :  { %v1922_v21 = vpop.xlane.xlu1 %1921 }
 0x3a1   :  { %13629 = vrcp.f32 %v1922_v21  ;;  %12955 = vmatmul.mubr.msk.f32.vlgmr.msra.gmra.mxu1 %vm1242_vm4, %v1931_v19 }
 0x3a2   :  { %v13618_v23 = vpop.eup %13617  ;;  %12963 = vmatpush3.msra.mxu1 %v1236_v20  ;;  %12964 = vmatprep.mubr.msk.f32.mxu1 %vm13789_vm3, %v13788_v22 }
 0x3a3   :  { %v13620_v24 = vpop.eup %13619  ;;  %12972 = vmatprep.subr.mxu1 %v13788_v22  ;;  %v1932_v26 = vmul.f32 %v13618_v23, %v13602_v58 }
 0x3a4   :  { %v1933_v29 = vmul.f32 %v13620_v24, %v13604_v59 }
 0x3a5   :  { %12960 = vmatmul.mubr.msk.f32.vlgmr.msra.gmra.mxu0 %vm1242_vm4, %v1932_v26 }
 0x3a6   :  { %v13622_v15 = vpop.eup %13621  ;;  %12965 = vmatmul.mubr.msk.f32.vlgmr.msra.gmra.mxu1 %vm1242_vm4, %v1933_v29  ;;  %12968 = vmatpush3.msra.mxu0 %v13944_v34 }
 0x3a7   :  { %v13624_v38 = vpop.eup %13623  ;;  %12973 = vmatpush3.msra.mxu1 %v1238_v31  ;;  %12969 = vmatprep.mubr.msk.f32.mxu0 %vm13789_vm3, %v13788_v22  ;;  %v1934_v32 = vmul.f32 %v13622_v15, %v13606_v62 }
 0x3a8   :  { %12974 = vmatprep.mubr.msk.f32.mxu1 %vm13789_vm3, %v13788_v22  ;;  %12977 = vmatprep.subr.mxu0 %v13788_v22  ;;  %v1935_v35 = vmul.f32 %v13624_v38, %v13608_v63  ;;  %v12203_v63 = vld [vmem:[#allocation2 + $0xb8] ss:$0 sm:$0xff] }
 0x3a9   :  { %12982 = vmatprep.subr.mxu1 %v13788_v22  ;;  %12970 = vmatmul.mubr.msk.f32.vlgmr.msra.gmra.mxu0 %vm1242_vm4, %v1934_v32 }
 0x3aa   :  { %v13626_v34 = vpop.eup %13625  ;;  %12975 = vmatmul.mubr.msk.f32.vlgmr.msra.gmra.mxu1 %vm1242_vm4, %v1935_v35  ;;  %12978 = vmatpush3.msra.mxu0 %v13961_v45 }
 0x3ab   :  { %v13628_v55 = vpop.eup %13627  ;;  %12983 = vmatpush3.msra.mxu1 %v1240_v30  ;;  %12979 = vmatprep.mubr.msk.f32.mxu0 %vm13789_vm3, %v13788_v22  ;;  %v1936_v37 = vmul.f32 %v13626_v34, %v13610_v2  ;;  %v2908_v30 = vld [vmem:[#allocation2 + $0xd8] sm:$0xff]  ;;  %v2906_v34 = vld [vmem:[#allocation2 + $0xc8] sm:$0xff] }
 0x3ac   :  { %12984 = vmatprep.mubr.msk.f32.mxu1 %vm13789_vm3, %v13788_v22  ;;  %12987 = vmatprep.subr.mxu0 %v13788_v22  ;;  %v1937_v36 = vmul.f32 %v13628_v55, %v13612_v3  ;;  %v2905_v55 = vld [vmem:[#allocation2 + $0xc0] sm:$0xff] }
 0x3ad   :  { %12980 = vmatmul.mubr.msk.f32.vlgmr.msra.gmra.mxu0 %vm1242_vm4, %v1936_v37  ;;  %12992 = vmatprep.subr.mxu1 %v2523_v39  ;;  %v3004_v37 = vld [vmem:[#allocation2 + $0x120] sm:$0xff] }
 0x3ae   :  { %v13630_v54 = vpop.eup %13629  ;;  %12985 = vmatmul.mubr.msk.f32.vlgmr.msra.gmra.mxu1 %vm1242_vm4, %v1937_v36  ;;  %12988 = vmatpush3.msra.mxu0 %v13968_v48  ;;  %v3003_v36 = vld [vmem:[#allocation2 + $0x118] sm:$0xff] }
 0x3af   :  { %12989 = vmatprep.mubr.msk.f32.mxu0 %vm13789_vm3, %v13788_v22  ;;  %v1938_v45 = vmul.f32 %v13630_v54, %v13614_v6  ;;  %12993 = vmatpush3.msra.mxu1 %v2523_v39  ;;  %v3002_v54 = vld [vmem:[#allocation2 + $0x110] sm:$0xff] }
 0x3b0   :  { %12997 = vmatprep.subr.mxu0 %v2610_v40  ;;  %13002 = vmatprep.subr.mxu1 %v2694_v41 }
 0x3b1   :  { %12990 = vmatmul.mubr.msk.f32.vlgmr.msra.gmra.mxu0 %vm1242_vm4, %v1938_v45  ;;  %v3001_v45 = vld [vmem:[#allocation2 + $0x108] sm:$0xff] }
 0x3b2   :  { %12998 = vmatpush3.msra.mxu0 %v2610_v40 }
 0x3b3   :  { %13007 = vmatprep.subr.mxu0 %v2778_v42 }
 0x461   :  { %v2008_v43 = vpop.f32.mrf.mxu1 }
 0x462   :  { %12994 = vmatprep.mubr.msk.f32.mxu1 %vm1242_vm4, %v2008_v43 }
 0x463   :  { %v12956_v48 = vpop.f32.mrf.mxu1 }
 0x465   :  { %v2081_v46 = vpop.f32.mrf.mxu0 }
 0x466   :  { %v2154_v47 = vpop.f32.mrf.mxu1  ;;  %12995 = vmatmul.mubr.msk.f32.vlgmr.msra.gmra.mxu1 %vm1242_vm4, %v2081_v46 }
 0x467   :  { %12999 = vmatprep.mubr.msk.f32.mxu0 %vm1242_vm4, %v2154_v47  ;;  %v12961_v44 = vpop.f32.mrf.mxu0  ;;  %13003 = vmatpush3.msra.mxu1 %v2694_v41  ;;  %v12212_v47 = vld [vmem:[#allocation2 + $0x130] ss:$0 sm:$0xff] }
 0x468   :  { %v12966_v50 = vpop.f32.mrf.mxu1  ;;  %13012 = vmatprep.subr.mxu1 %v2908_v30 }
 0x469   :  { %v2227_v51 = vpop.f32.mrf.mxu0 }
 0x46a   :  { %v2300_v52 = vpop.f32.mrf.mxu1  ;;  %13000 = vmatmul.mubr.msk.f32.vlgmr.msra.gmra.mxu0 %vm1242_vm4, %v2227_v51 }
 0x46b   :  { %13004 = vmatprep.mubr.msk.f32.mxu1 %vm1242_vm4, %v2300_v52  ;;  %v12971_v49 = vpop.f32.mrf.mxu0  ;;  %13008 = vmatpush3.msra.mxu0 %v2778_v42 }
 0x46c   :  { %v12976_v53 = vpop.f32.mrf.mxu1  ;;  %13023 = vmatprep.subr.mxu0 %v3004_v37  ;;  %v12213_v49 = vld [vmem:[#allocation2 + $0x138] ss:$0 sm:$0xff] }
 0x46d   :  { %v2373_v56 = vpop.f32.mrf.mxu0 }
 0x46e   :  { %v2446_v57 = vpop.f32.mrf.mxu1  ;;  %13005 = vmatmul.mubr.msk.f32.vlgmr.msra.gmra.mxu1 %vm1242_vm4, %v2373_v56 }
 0x46f   :  { %13009 = vmatprep.mubr.msk.f32.mxu0 %vm1242_vm4, %v2446_v57  ;;  %v12981_v58 = vpop.f32.mrf.mxu0  ;;  %13013 = vmatpush3.msra.mxu1 %v2908_v30 }
 0x470   :  { %v12986_v59 = vpop.f32.mrf.mxu1  ;;  %v3000_v58 = vld [vmem:[#allocation2 + $0x100] sm:$0xff] }
 0x471   :  { %v2519_v60 = vpop.f32.mrf.mxu0  ;;  %v2999_v59 = vld [vmem:[#allocation2 + $0xf8] sm:$0xff] }
 0x472   :  { %13010 = vmatmul.mubr.msk.f32.vlgmr.msra.gmra.mxu0 %vm1242_vm4, %v2519_v60  ;;  %v2998_v60 = vld [vmem:[#allocation2 + $0xf0] sm:$0xff] }
 0x473   :  { %v12991_v61 = vpop.f32.mrf.mxu0  ;;  %13024 = vmatpush3.msra.mxu0 %v3004_v37 }
 0x474   :  { %13025 = vmatprep.subr.mxu0 %v3003_v36  ;;  %v2997_v61 = vld [vmem:[#allocation2 + $0xe8] sm:$0xff] }
 0x475   :  { %13026 = vmatpush3.msra.mxu0 %v3003_v36 }
 0x476   :  { %13027 = vmatprep.subr.mxu0 %v3002_v54 }
 0x477   :  { %13028 = vmatpush3.msra.mxu0 %v3002_v54  ;;  %v12220_v54 = vld [vmem:[#allocation2 + $0x140] ss:$0 sm:$0xff] }
 0x478   :  { %13029 = vmatprep.subr.mxu0 %v3001_v45 }
 0x479   :  { %13030 = vmatpush3.msra.mxu0 %v3001_v45 }
 0x47a   :  { %13031 = vmatprep.subr.mxu0 %v3000_v58 }
 0x47b   :  { %13032 = vmatpush3.msra.mxu0 %v3000_v58 }
 0x47c   :  { %13033 = vmatprep.subr.mxu0 %v2999_v59 }
 0x47d   :  { %13034 = vmatpush3.msra.mxu0 %v2999_v59 }
 0x47e   :  { %13035 = vmatprep.subr.mxu0 %v2998_v60 }
 0x47f   :  { %13036 = vmatpush3.msra.mxu0 %v2998_v60 }
 0x480   :  { %13037 = vmatprep.subr.mxu0 %v2997_v61 }
 0x481   :  { %13038 = vmatpush3.msra.mxu0 %v2997_v61 }
 0x526   :  { %v12996_v62 = vpop.f32.mrf.mxu1 }
 0x527   :  { %v2607_v2 = vadd.f32 %v12996_v62, %v12203_v63  ;;  %v12214_v62 = vld [vmem:[#allocation2 + $0xe0] ss:$0 sm:$0xff] }
 0x528   :  { %v2601_v1 = vpop.f32.mrf.mxu1 }
 0x529   :  { %v2602_v5 = vadd.f32 %v12203_v63, %v2601_v1 }
 0x52a   :  { %v13001_v0 = vpop.f32.mrf.mxu0 }
 0x52b   :  { %v2693_v6 = vadd.f32 %v13001_v0, %v2607_v2 }
 0x52c   :  { %v2683_v3 = vpop.f32.mrf.mxu0 }
 0x52d   :  { %v2692_v8 = vadd.f32 %v2683_v3, %v2602_v5  ;;  %v12217_v5 = vld [vmem:[#allocation2 + $0x128] ss:$0 sm:$0xff] }
 0x52e   :  { %v13006_v4 = vpop.f32.mrf.mxu1 }
 0x52f   :  { %v2777_v9 = vadd.f32 %v13006_v4, %v2693_v6 }
 0x530   :  { %v2767_v7 = vpop.f32.mrf.mxu1 }
 0x531   :  { %v2776_v11 = vadd.f32 %v2767_v7, %v2692_v8 }
 0x532   :  { %v13011_v10 = vpop.f32.mrf.mxu0 }
 0x533   :  { %v2861_v14 = vadd.f32 %v13011_v10, %v2777_v9 }
 0x534   :  { %v2851_v16 = vpop.f32.mrf.mxu0 }
 0x535   :  { %v2860_v17 = vadd.f32 %v2851_v16, %v2776_v11  ;;  %v2863_v18 = vadd.f32 %v2861_v14, %v13823_v13 }
 0x537   :  { %v2869_v19 = vsel %vm118_vm2, %v2863_v18, 0.0  ;;  %v2862_v20 = vadd.f32 %v2860_v17, %v13821_v12  ;;  %v2907_v12 = vld [vmem:[#allocation2 + $0xd0] sm:$0xff] }
 0x538   :  { %2870 = vadd.xlane.f32.xlu1 %v2869_v19  ;;  %13014 = vmatprep.subr.mxu1 %v2907_v12 }
 0x539   :  { %v2866_v21 = vsel %vm118_vm2, %v2862_v20, 0.0  ;;  %13015 = vmatpush3.msra.mxu1 %v2907_v12 }
 0x53a   :  { %2867 = vadd.xlane.f32.xlu0 %v2866_v21  ;;  %13016 = vmatprep.subr.mxu1 %v2906_v34 }
 0x53b   :  { %13017 = vmatpush3.msra.mxu1 %v2906_v34 }
 0x53c   :  { %13018 = vmatprep.subr.mxu1 %v2905_v55 }
 0x53d   :  { %13019 = vmatpush3.msra.mxu1 %v2905_v55 }
 0x5c1   :  { %v2871_v23 = vpop.xlane.xlu1 %2870 }
 0x5c2   :  { %v2874_v24 = vmul.f32 0.03125, %v2871_v23 }
 0x5c3   :  { %v2868_v26 = vpop.xlane.xlu0 %2867 }
 0x5c4   :  { %v2876_v29 = vsub.f32 %v2863_v18, %v2874_v24  ;;  %v2873_v31 = vmul.f32 0.03125, %v2868_v26 }
 0x5c6   :  { %v2875_v15 = vsub.f32 %v2862_v20, %v2873_v31  ;;  %v2878_v38 = vmul.f32 %v2876_v29, %v2876_v29 }
 0x5c8   :  { %v2882_v32 = vsel %vm118_vm2, %v2878_v38, 0.0  ;;  %v2877_v35 = vmul.f32 %v2875_v15, %v2875_v15  ;;  %v3377_v38 = vld [vmem:[#allocation2 + $0x168] sm:$0xff] }
 0x5c9   :  { %2883 = vadd.xlane.f32.xlu1 %v2882_v32  ;;  %13057 = vmatprep.subr.msk.mxu0 %vm118_vm2, %v3377_v38  ;;  %v3219_v32 = vld [vmem:[#allocation2 + $0x158] sm:$0xff] }
 0x5ca   :  { %v2879_v13 = vsel %vm118_vm2, %v2877_v35, 0.0  ;;  %v3535_v35 = vld [vmem:[#allocation2 + $0x178] sm:$0xff] }
 0x5cb   :  { %2880 = vadd.xlane.f32.xlu0 %v2879_v13 }
 0x652   :  { %v2884_v39 = vpop.xlane.xlu1 %2883 }
 0x653   :  { %v2886_v40 = vmul.f32 0.03125, %v2884_v39 }
 0x654   :  { %v2881_v41 = vpop.xlane.xlu0 %2880 }
 0x655   :  { %v2888_v42 = vadd.f32 1e-05, %v2886_v40  ;;  %v2885_v43 = vmul.f32 0.03125, %v2881_v41 }
 0x657   :  { %13631 = vrsqrt.f32 %v2888_v42  ;;  %v2887_v48 = vadd.f32 1e-05, %v2885_v43  ;;  %v12221_v42 = vld [vmem:[#allocation2 + $0x148] ss:$0 sm:$0xff] }
 0x659   :  { %13633 = vrsqrt.f32 %v2887_v48 }
 0x664   :  { %v13632_v46 = vpop.eup %13631 }
 0x665   :  { %v2892_v44 = vmul.f32 %v13632_v46, %v2876_v29 }
 0x666   :  { %v13634_v50 = vpop.eup %13633 }
 0x667   :  { %v2891_v51 = vmul.f32 %v13634_v50, %v2875_v15  ;;  %v2898_v52 = vmul.f32 %v12212_v47, %v2892_v44  ;;  %v3134_v15 = vld [vmem:[#allocation2 + $0x150] sm:$0xff]  ;;  %v3693_v44 = vld [vmem:[#allocation2 + $0x188] sm:$0xff] }
 0x668   :  { %13042 = vmatprep.subr.msk.mxu1 %vm118_vm2, %v3134_v15  ;;  %v3456_v50 = vld [vmem:[#allocation2 + $0x170] sm:$0xff] }
 0x669   :  { %v2897_v53 = vmul.f32 %v12212_v47, %v2891_v51  ;;  %v2904_v57 = vadd.f32 %v12213_v49, %v2898_v52  ;;  %v3298_v47 = vld [vmem:[#allocation2 + $0x160] sm:$0xff]  ;;  %v3851_v51 = vld [vmem:[#allocation2 + $0x198] sm:$0xff] }
 0x66a   :  { %v3614_v52 = vld [vmem:[#allocation2 + $0x180] sm:$0xff] }
 0x66b   :  { %v2903_v56 = vadd.f32 %v12213_v49, %v2897_v53  ;;  %v4009_v49 = vld [vmem:[#allocation2 + $0x1a8] sm:$0xff]  ;;  %v3772_v53 = vld [vmem:[#allocation2 + $0x190] sm:$0xff] }
 0x66d   :  { %13020 = vmatprep.mubr.msk.f32.mxu1 %vm118_vm2, %v2903_v56 }
 0x66e   :  { %13021 = vmatmul.mubr.msk.f32.vlgmr.msra.gmra.mxu1 %vm118_vm2, %v2904_v57 }
 0x66f   :  { %13043 = vmatpush3.xpose.msk.msra.mxu1 %vm118_vm2, %v3134_v15 }
 0x670   :  { %13047 = vmatprep.subr.msk.mxu1 %vm118_vm2, %v3219_v32 }
 0x72e   :  { %v13022_v63 = vpop.f32.mrf.mxu1 }
 0x72f   :  { %v2992_v0 = vadd.f32 %v13022_v63, %v12214_v62 }
 0x730   :  { %v2986_v1 = vpop.f32.mrf.mxu1 }
 0x731   :  { %v2987_v2 = vadd.f32 %v12214_v62, %v2986_v1  ;;  %v2996_v4 = vmax.f32 %v2992_v0, 0.0  ;;  %v12259_v62 = vld.sshfl [vmem:[#allocation2 + $0x1b8] sm:$0x33 pattern:$0x75316420] }
 0x732   :  { %v12258_v0 = vld.sshfl [vmem:[#allocation2 + $0x1b0] sm:$0x33 pattern:$0x75316420] }
 0x733   :  { %v2995_v3 = vmax.f32 %v2987_v2, 0.0  ;;  %v4104_v1 = vrot.slane %v12258_v0, %v13901_v28 }
 0x735   :  { %13039 = vmatprep.mubr.msk.f32.mxu0 %vm3010_vm5, %v2995_v3 }
 0x736   :  { %13040 = vmatmul.mubr.msk.f32.vlgmr.msra.gmra.mxu0 %vm3010_vm5, %v2996_v4  ;;  %v4159_v4 = vcombine.high %v12259_v62, %v12259_v62 }
 0x737   :  { %13058 = vmatpush3.xpose.msk.msra.mxu0 %vm118_vm2, %v3377_v38 }
 0x738   :  { %13067 = vmatprep.subr.msk.mxu0 %vm118_vm2, %v3535_v35 }
 0x7f6   :  { %v13041_v6 = vpop.f32.mrf.mxu0 }
 0x7f7   :  { %v3089_v7 = vadd.f32 %v13041_v6, %v12217_v5  ;;  %v4097_v6 = vcombine.high %v12258_v0, %v12258_v0 }
 0x7f8   :  { %v3083_v8 = vpop.f32.mrf.mxu0 }
 0x7f9   :  { %v3084_v9 = vadd.f32 %v12217_v5, %v3083_v8  ;;  %v3093_v10 = vadd.f32 %v3089_v7, %v2904_v57  ;;  %v12260_v57 = vld.sshfl [vmem:[#allocation2 + $0x1c0] sm:$0x33 pattern:$0x75316420]  ;;  %v4166_v5 = vrot.slane %v12259_v62, %v13901_v28 }
 0x7fa   :  { %v4213_v63 = vcombine.high %v12260_v57, %v12260_v57 }
 0x7fb   :  { %v3099_v11 = vsel %vm118_vm2, %v3093_v10, 0.0  ;;  %v3092_v14 = vadd.f32 %v3084_v9, %v2903_v56  ;;  %v3930_v56 = vld [vmem:[#allocation2 + $0x1a0] sm:$0xff] }
 0x7fc   :  { %3100 = vadd.xlane.f32.xlu1 %v3099_v11  ;;  %v4227_v8 = vrot.slane %v4213_v63, %v13901_v28 }
 0x7fd   :  { %v3096_v16 = vsel %vm118_vm2, %v3092_v14, 0.0 }
 0x7fe   :  { %3097 = vadd.xlane.f32.xlu0 %v3096_v16 }
 0x885   :  { %v3101_v17 = vpop.xlane.xlu1 %3100 }
 0x886   :  { %v3103_v18 = vmul.f32 0.03125, %v3101_v17  ;;  %v4179_v17 = vrot.slane %v4166_v5, %v13905_v33 }
 0x887   :  { %v3098_v19 = vpop.xlane.xlu0 %3097 }
 0x888   :  { %v3105_v20 = vsub.f32 %v3093_v10, %v3103_v18  ;;  %v3102_v21 = vmul.f32 0.03125, %v3098_v19  ;;  %v4117_v10 = vrot.slane %v4104_v1, %v13905_v33  ;;  %v4111_v18 = vrot.slane %v4097_v6, %v13901_v28 }
 0x88a   :  { %v3104_v23 = vsub.f32 %v3092_v14, %v3102_v21  ;;  %v3107_v24 = vmul.f32 %v3105_v20, %v3105_v20  ;;  %v4173_v14 = vrot.slane %v4159_v4, %v13901_v28  ;;  %v4229_v21 = vcombine.high %v4227_v8, %v4227_v8 }
 0x88c   :  { %v3111_v26 = vsel %vm118_vm2, %v3107_v24, 0.0  ;;  %v3106_v29 = vmul.f32 %v3104_v23, %v3104_v23  ;;  %v4183_v15 = vrot.slane %v4173_v14, %v13905_v33 }
 0x88d   :  { %3112 = vadd.xlane.f32.xlu1 %v3111_v26  ;;  %v4121_v26 = vrot.slane %v4111_v18, %v13905_v33 }
 0x88e   :  { %v3108_v31 = vsel %vm118_vm2, %v3106_v29, 0.0  ;;  %v4112_v29 = vcombine.high %v4104_v1, %v4104_v1 }
 0x88f   :  { %3109 = vadd.xlane.f32.xlu0 %v3108_v31 }
 0x916   :  { %v3113_v13 = vpop.xlane.xlu1 %3112 }
 0x917   :  { %v3115_v30 = vmul.f32 0.03125, %v3113_v13 }
 0x918   :  { %v3110_v12 = vpop.xlane.xlu0 %3109 }
 0x919   :  { %v3117_v34 = vadd.f32 1e-05, %v3115_v30  ;;  %v3114_v55 = vmul.f32 0.03125, %v3110_v12 }
 0x91b   :  { %13635 = vrsqrt.f32 %v3117_v34  ;;  %v3116_v37 = vadd.f32 1e-05, %v3114_v55  ;;  %v14167_v34 = vrot.slane %v4229_v21, %v13905_v33  ;;  %v4113_v55 = vcombine.high %v4111_v18, %v4111_v18 }
 0x91d   :  { %13637 = vrsqrt.f32 %v3116_v37 }
 0x928   :  { %v13636_v36 = vpop.eup %13635 }
 0x929   :  { %v3121_v45 = vmul.f32 %v13636_v36, %v3105_v20  ;;  %v4237_v20 = vrot.slane %v4227_v8, %v13905_v33 }
 0x92a   :  { %v13638_v39 = vpop.eup %13637 }
 0x92b   :  { %v3120_v40 = vmul.f32 %v13638_v39, %v3104_v23  ;;  %v3127_v41 = vmul.f32 %v12220_v54, %v3121_v45 }
 0x92d   :  { %v3126_v43 = vmul.f32 %v12220_v54, %v3120_v40  ;;  %v14072_v46 = vadd.f32 %v12221_v42, %v3127_v41  ;;  %v4220_v54 = vrot.slane %v12260_v57, %v13901_v28  ;;  %v4125_v40 = vrot.slane %v4112_v29, %v13905_v33 }
 0x92f   :  { %v14070_v48 = vadd.f32 %v12221_v42, %v3126_v43 }
 0x931   :  { %13044 = vmatprep.mubr.msk.f32.mxu1 %vm118_vm2, %v14070_v48  ;;  %13059 = vmatprep.mubr.msk.f32.mxu0 %vm118_vm2, %v14070_v48 }
 0x932   :  { %13045 = vmatmul.mubr.msk.f32.vlgmr.msra.gmra.mxu1 %vm118_vm2, %v14072_v46  ;;  %13060 = vmatmul.mubr.msk.f32.vlgmr.msra.gmra.mxu0 %vm118_vm2, %v14072_v46 }
 0x933   :  { %13048 = vmatpush3.xpose.msk.msra.mxu1 %vm118_vm2, %v3219_v32  ;;  %13049 = vmatprep.mubr.msk.f32.mxu1 %vm118_vm2, %v14070_v48 }
 0x934   :  { %13068 = vmatpush3.xpose.msk.msra.mxu0 %vm118_vm2, %v3535_v35  ;;  %13069 = vmatprep.mubr.msk.f32.mxu0 %vm118_vm2, %v14070_v48  ;;  %v4174_v35 = vcombine.high %v4166_v5, %v4166_v5 }
 0x935   :  { %13052 = vmatprep.subr.msk.mxu1 %vm118_vm2, %v3298_v47  ;;  %13077 = vmatprep.subr.msk.mxu0 %vm118_vm2, %v3693_v44 }
 0x936   :  { %13050 = vmatmul.mubr.msk.f32.vlgmr.msra.gmra.mxu1 %vm118_vm2, %v14072_v46 }
 0x937   :  { %13070 = vmatmul.mubr.msk.f32.vlgmr.msra.gmra.mxu0 %vm118_vm2, %v14072_v46  ;;  %13053 = vmatpush3.xpose.msk.msra.mxu1 %vm118_vm2, %v3298_v47  ;;  %v4175_v47 = vcombine.high %v4173_v14, %v4173_v14 }
 0x938   :  { %13054 = vmatprep.mubr.msk.f32.mxu1 %vm118_vm2, %v14070_v48  ;;  %13078 = vmatpush3.xpose.msk.msra.mxu0 %vm118_vm2, %v3693_v44  ;;  %v4187_v44 = vrot.slane %v4174_v35, %v13905_v33 }
 0x939   :  { %13079 = vmatprep.mubr.msk.f32.mxu0 %vm118_vm2, %v14070_v48  ;;  %13062 = vmatprep.subr.msk.mxu1 %vm118_vm2, %v3456_v50  ;;  %v4191_v0 = vrot.slane %v4175_v47, %v13905_v33 }
 0x93a   :  { %13055 = vmatmul.mubr.msk.f32.vlgmr.msra.gmra.mxu1 %vm118_vm2, %v14072_v46  ;;  %13087 = vmatprep.subr.msk.mxu0 %vm118_vm2, %v3851_v51 }
 0x93b   :  { %13080 = vmatmul.mubr.msk.f32.vlgmr.msra.gmra.mxu0 %vm118_vm2, %v14072_v46  ;;  %13063 = vmatpush3.xpose.msk.msra.mxu1 %vm118_vm2, %v3456_v50 }
 0x93c   :  { %13064 = vmatprep.mubr.msk.f32.mxu1 %vm118_vm2, %v14070_v48  ;;  %13088 = vmatpush3.xpose.msk.msra.mxu0 %vm118_vm2, %v3851_v51  ;;  %v4228_v51 = vcombine.high %v4220_v54, %v4220_v54 }
 0x93d   :  { %13089 = vmatprep.mubr.msk.f32.mxu0 %vm118_vm2, %v14070_v48  ;;  %13072 = vmatprep.subr.msk.mxu1 %vm118_vm2, %v3614_v52 }
 0x93e   :  { %13065 = vmatmul.mubr.msk.f32.vlgmr.msra.gmra.mxu1 %vm118_vm2, %v14072_v46  ;;  %13097 = vmatprep.subr.msk.mxu0 %vm118_vm2, %v4009_v49 }
 0x93f   :  { %13090 = vmatmul.mubr.msk.f32.vlgmr.msra.gmra.mxu0 %vm118_vm2, %v14072_v46  ;;  %13073 = vmatpush3.xpose.msk.msra.mxu1 %vm118_vm2, %v3614_v52 }
 0x940   :  { %13074 = vmatprep.mubr.msk.f32.mxu1 %vm118_vm2, %v14070_v48  ;;  %13098 = vmatpush3.xpose.msk.msra.mxu0 %vm118_vm2, %v4009_v49 }
 0x941   :  { %13099 = vmatprep.mubr.msk.f32.mxu0 %vm118_vm2, %v14070_v48  ;;  %13082 = vmatprep.subr.msk.mxu1 %vm118_vm2, %v3772_v53 }
 0x942   :  { %13075 = vmatmul.mubr.msk.f32.vlgmr.msra.gmra.mxu1 %vm118_vm2, %v14072_v46  ;;  %13107 = vmatprep.subr.mxu0 %v13788_v22 }
 0x943   :  { %13100 = vmatmul.mubr.msk.f32.vlgmr.msra.gmra.mxu0 %vm118_vm2, %v14072_v46  ;;  %13083 = vmatpush3.xpose.msk.msra.mxu1 %vm118_vm2, %v3772_v53 }
 0x944   :  { %13084 = vmatprep.mubr.msk.f32.mxu1 %vm118_vm2, %v14070_v48  ;;  %13092 = vmatprep.subr.msk.mxu1 %vm118_vm2, %v3930_v56 }
 0x945   :  { %13109 = vmatprep.mubr.msk.f32.mxu0 %vm13789_vm3, %v13788_v22 }
 0x946   :  { %13085 = vmatmul.mubr.msk.f32.vlgmr.msra.gmra.mxu1 %vm118_vm2, %v14072_v46 }
 0x947   :  { %13093 = vmatpush3.xpose.msk.msra.mxu1 %vm118_vm2, %v3930_v56  ;;  %13094 = vmatprep.mubr.msk.f32.mxu1 %vm118_vm2, %v14070_v48 }
 0x948   :  { %13102 = vmatprep.subr.mxu1 %v13788_v22 }
 0x94a   :  { %13095 = vmatmul.mubr.msk.f32.vlgmr.msra.gmra.mxu1 %vm118_vm2, %v14072_v46 }
 0x94b   :  { %13104 = vmatprep.mubr.msk.f32.mxu1 %vm13789_vm3, %v13788_v22 }
 0x9f2   :  { %v13046_v58 = vpop.f32.mrf.mxu1  ;;  %v14146_v59 = vpop.f32.mrf.mxu0 }
 0x9f3   :  { %v4135_v24 = vadd.f32 %v13046_v58, %v4117_v10  ;;  %v4129_v58 = vrot.slane %v4113_v55, %v13905_v33 }
 0x9f4   :  { %v3210_v60 = vpop.f32.mrf.mxu1  ;;  %v14148_v61 = vpop.f32.mrf.mxu0 }
 0x9f5   :  { %v4134_v13 = vadd.f32 %v4117_v10, %v3210_v60  ;;  %v4143_v45 = vmul.f32 0.35355338, %v4135_v24 }
 0x9f6   :  { %v13051_v2 = vpop.f32.mrf.mxu1 }
 0x9f7   :  { %v13071_v3 = vpop.f32.mrf.mxu0  ;;  %v4137_v39 = vadd.f32 %v13051_v2, %v4121_v26  ;;  %v4142_v52 = vmul.f32 0.35355338, %v4134_v13  ;;  %v14193_v2 = vrot.slane %v4228_v51, %v13905_v33 }
 0x9f8   :  { %v3289_v7 = vpop.f32.mrf.mxu1  ;;  %v4199_v43 = vadd.f32 %v13071_v3, %v4183_v15 }
 0x9f9   :  { %v3605_v9 = vpop.f32.mrf.mxu0  ;;  %v4136_v49 = vadd.f32 %v4121_v26, %v3289_v7  ;;  %v4145_v60 = vmul.f32 0.35355338, %v4137_v39  ;;  %v4141_v7 = vadd.f32 %v14146_v59, %v4129_v58  ;;  %v4140_v59 = vadd.f32 %v4129_v58, %v14148_v61 }
 0x9fa   :  { %v13056_v11 = vpop.f32.mrf.mxu1  ;;  %v4198_v57 = vadd.f32 %v4183_v15, %v3605_v9 }
 0x9fb   :  { %v14155_v16 = vpop.f32.mrf.mxu0  ;;  %v4139_v62 = vadd.f32 %v13056_v11, %v4125_v40  ;;  %v4144_v3 = vmul.f32 0.35355338, %v4136_v49  ;;  %v4233_v11 = vrot.slane %v4220_v54, %v13905_v33  ;;  %v4148_v61 = vmul.f32 0.35355338, %v4140_v59 }
 0x9fc   :  { %v3368_v19 = vpop.f32.mrf.mxu1  ;;  %v4203_v10 = vadd.f32 %v14155_v16, %v4191_v0  ;;  %v4149_v16 = vmul.f32 0.35355338, %v4141_v7 }
 0x9fd   :  { %v14160_v23 = vpop.f32.mrf.mxu0  ;;  %v4138_v4 = vadd.f32 %v4125_v40, %v3368_v19  ;;  %v4147_v8 = vmul.f32 0.35355338, %v4139_v62 }
 0x9fe   :  { %v13066_v31 = vpop.f32.mrf.mxu1  ;;  %v4202_v18 = vadd.f32 %v4191_v0, %v14160_v23 }
 0x9ff   :  { %v4197_v38 = vadd.f32 %v13066_v31, %v4179_v17  ;;  %v13091_v32 = vpop.f32.mrf.mxu0 }
 0xa00   :  { %v14164_v30 = vadd.f32 %v13091_v32, %v4237_v20  ;;  %v3526_v12 = vpop.f32.mrf.mxu1 }
 0xa01   :  { %v4196_v37 = vadd.f32 %v4179_v17, %v3526_v12  ;;  %v3921_v36 = vpop.f32.mrf.mxu0  ;;  %13108 = vmatpush3.xpose.msk.msra.mxu0 %vm1242_vm4, %v4197_v38  ;;  %v4146_v17 = vmul.f32 0.35355338, %v4138_v4 }
 0xa02   :  { %v14172_v41 = vadd.f32 %v4237_v20, %v3921_v36  ;;  %v13076_v42 = vpop.f32.mrf.mxu1  ;;  %13117 = vmatprep.subr.mxu0 %v13788_v22 }
 0xa03   :  { %v13101_v50 = vpop.f32.mrf.mxu0  ;;  %13103 = vmatpush3.xpose.msk.msra.mxu1 %vm1242_vm4, %v4196_v37  ;;  %v4201_v1 = vadd.f32 %v13076_v42, %v4187_v44 }
 0xa04   :  { %v14178_v53 = vadd.f32 %v13101_v50, %v14167_v34  ;;  %v3684_v56 = vpop.f32.mrf.mxu1  ;;  %13110 = vmatmul.mubr.msk.f32.vlgmr.msra.gmra.mxu0 %vm1242_vm4, %v4143_v45  ;;  %13112 = vmatprep.subr.mxu1 %v13788_v22 }
 0xa05   :  { %13118 = vmatpush3.xpose.msk.msra.mxu0 %vm1242_vm4, %v4199_v43  ;;  %13119 = vmatprep.mubr.msk.f32.mxu0 %vm13789_vm3, %v13788_v22  ;;  %v4200_v6 = vadd.f32 %v4187_v44, %v3684_v56  ;;  %v14232_v21 = vpop.f32.mrf.mxu0 }
 0xa06   :  { %v13086_v63 = vpop.f32.mrf.mxu1  ;;  %13105 = vmatmul.mubr.msk.f32.vlgmr.msra.gmra.mxu1 %vm1242_vm4, %v4142_v52  ;;  %13127 = vmatprep.subr.mxu0 %v13788_v22 }
 0xa07   :  { %13113 = vmatpush3.xpose.msk.msra.mxu1 %vm1242_vm4, %v4198_v57  ;;  %13114 = vmatprep.mubr.msk.f32.mxu1 %vm13789_vm3, %v13788_v22  ;;  %v4251_v19 = vadd.f32 %v13086_v63, %v4233_v11 }
 0xa08   :  { %v3842_v5 = vpop.f32.mrf.mxu1  ;;  %13120 = vmatmul.mubr.msk.f32.vlgmr.msra.gmra.mxu0 %vm1242_vm4, %v4145_v60  ;;  %13122 = vmatprep.subr.mxu1 %v13788_v22 }
 0xa09   :  { %13128 = vmatpush3.xpose.msk.msra.mxu0 %vm1242_vm4, %v4201_v1  ;;  %13129 = vmatprep.mubr.msk.f32.mxu0 %vm13789_vm3, %v13788_v22  ;;  %v4250_v20 = vadd.f32 %v4233_v11, %v3842_v5 }
 0xa0a   :  { %v13096_v9 = vpop.f32.mrf.mxu1  ;;  %13115 = vmatmul.mubr.msk.f32.vlgmr.msra.gmra.mxu1 %vm1242_vm4, %v4144_v3  ;;  %13137 = vmatprep.subr.mxu0 %v13788_v22 }
 0xa0b   :  { %v14206_v14 = vadd.f32 %v13096_v9, %v14193_v2  ;;  %13123 = vmatpush3.xpose.msk.msra.mxu1 %vm1242_vm4, %v4200_v6  ;;  %13124 = vmatprep.mubr.msk.f32.mxu1 %vm13789_vm3, %v13788_v22 }
 0xa0c   :  { %13130 = vmatmul.mubr.msk.f32.vlgmr.msra.gmra.mxu0 %vm1242_vm4, %v4147_v8  ;;  %13132 = vmatprep.subr.mxu1 %v13788_v22  ;;  %v14234_v23 = vpop.f32.mrf.mxu1 }
 0xa0d   :  { %13138 = vmatpush3.xpose.msk.msra.mxu0 %vm1242_vm4, %v4203_v10  ;;  %13139 = vmatprep.mubr.msk.f32.mxu0 %vm13789_vm3, %v13788_v22 }
 0xa0e   :  { %13125 = vmatmul.mubr.msk.f32.vlgmr.msra.gmra.mxu1 %vm1242_vm4, %v4146_v17  ;;  %13147 = vmatprep.subr.mxu0 %v13788_v22 }
 0xa0f   :  { %13133 = vmatpush3.xpose.msk.msra.mxu1 %vm1242_vm4, %v4202_v18  ;;  %13134 = vmatprep.mubr.msk.f32.mxu1 %vm13789_vm3, %v13788_v22 }
 0xa10   :  { %13140 = vmatmul.mubr.msk.f32.vlgmr.msra.gmra.mxu0 %vm1242_vm4, %v4149_v16  ;;  %13142 = vmatprep.subr.mxu1 %v13788_v22 }
 0xa11   :  { %13148 = vmatpush3.msra.mxu0 %v4251_v19  ;;  %13149 = vmatprep.mubr.msk.f32.mxu0 %vm13789_vm3, %v13788_v22 }
 0xa12   :  { %13135 = vmatmul.mubr.msk.f32.vlgmr.msra.gmra.mxu1 %vm1242_vm4, %v4148_v61  ;;  %13157 = vmatprep.subr.mxu0 %v13788_v22 }
 0xa13   :  { %13143 = vmatpush3.msra.mxu1 %v4250_v20  ;;  %13144 = vmatprep.mubr.msk.f32.mxu1 %vm13789_vm3, %v13788_v22 }
 0xa14   :  { %13152 = vmatprep.subr.mxu1 %v13788_v22 }
 0xac4   :  { %v4406_v24 = vpop.f32.mrf.mxu0 }
 0xac5   :  { %v4869_v26 = vsel %vm1242_vm4, %v4406_v24, -inf }
 0xac6   :  { %4870 = vmax.xlane.f32.xlu1 %v4869_v26  ;;  %v4330_v29 = vpop.f32.mrf.mxu1  ;;  %v13111_v31 = vpop.f32.mrf.mxu0 }
 0xac7   :  { %v4866_v15 = vsel %vm1242_vm4, %v4330_v29, -inf }
 0xac8   :  { %v4558_v38 = vpop.f32.mrf.mxu0  ;;  %4867 = vmax.xlane.f32.xlu0 %v4866_v15  ;;  %v13106_v32 = vpop.f32.mrf.mxu1 }
 0xac9   :  { %v4875_v35 = vsel %vm1242_vm4, %v4558_v38, -inf }
 0xaca   :  { %4876 = vmax.xlane.f32.xlu1 %v4875_v35  ;;  %v4482_v13 = vpop.f32.mrf.mxu1  ;;  %v13121_v12 = vpop.f32.mrf.mxu0 }
 0xacb   :  { %v4872_v55 = vsel %vm1242_vm4, %v4482_v13, -inf }
 0xacc   :  { %v4710_v37 = vpop.f32.mrf.mxu0  ;;  %4873 = vmax.xlane.f32.xlu0 %v4872_v55  ;;  %v13116_v36 = vpop.f32.mrf.mxu1 }
 0xacd   :  { %v4881_v54 = vsel %vm1242_vm4, %v4710_v37, -inf }
 0xace   :  { %4882 = vmax.xlane.f32.xlu1 %v4881_v54  ;;  %v4634_v45 = vpop.f32.mrf.mxu1  ;;  %v13131_v39 = vpop.f32.mrf.mxu0 }
 0xacf   :  { %v4878_v40 = vsel %vm1242_vm4, %v4634_v45, -inf }
 0xad0   :  { %v4862_v42 = vpop.f32.mrf.mxu0  ;;  %4879 = vmax.xlane.f32.xlu0 %v4878_v40  ;;  %v13126_v43 = vpop.f32.mrf.mxu1 }
 0xad1   :  { %v4887_v47 = vsel %vm1242_vm4, %v4862_v42, -inf }
 0xad2   :  { %4888 = vmax.xlane.f32.xlu1 %v4887_v47  ;;  %v4786_v44 = vpop.f32.mrf.mxu1  ;;  %v13141_v50 = vpop.f32.mrf.mxu0 }
 0xad3   :  { %v4884_v51 = vsel %vm1242_vm4, %v4786_v44, -inf }
 0xad4   :  { %4885 = vmax.xlane.f32.xlu0 %v4884_v51  ;;  %v13136_v52 = vpop.f32.mrf.mxu1 }
 0xb4f   :  { %v4871_v49 = vpop.xlane.xlu1 %4870 }
 0xb50   :  { %v4891_v56 = vsub.f32 %v4406_v24, %v4871_v49 }
 0xb51   :  { %v4868_v57 = vpop.xlane.xlu0 %4867 }
 0xb52   :  { %v4900_v58 = vmul.f32 1.442695, %v4891_v56  ;;  %v4890_v60 = vsub.f32 %v4330_v29, %v4868_v57 }
 0xb53   :  { %v4877_v62 = vpop.xlane.xlu1 %4876 }
 0xb54   :  { %13639 = vpow2.f32 %v4900_v58  ;;  %v4898_v63 = vmul.f32 1.442695, %v4890_v60  ;;  %v4893_v0 = vsub.f32 %v4558_v38, %v4877_v62 }
 0xb55   :  { %v4874_v1 = vpop.xlane.xlu0 %4873 }
 0xb56   :  { %13641 = vpow2.f32 %v4898_v63  ;;  %v4904_v3 = vmul.f32 1.442695, %v4893_v0  ;;  %v4892_v4 = vsub.f32 %v4482_v13, %v4874_v1  ;;  %v4254_v0 = vadd.f32 %v14193_v2, %v14234_v23 }
 0xb57   :  { %v4883_v5 = vpop.xlane.xlu1 %4882 }
 0xb58   :  { %13643 = vpow2.f32 %v4904_v3  ;;  %v4902_v6 = vmul.f32 1.442695, %v4892_v4  ;;  %v4895_v7 = vsub.f32 %v4710_v37, %v4883_v5 }
 0xb59   :  { %v4880_v8 = vpop.xlane.xlu0 %4879 }
 0xb5a   :  { %13645 = vpow2.f32 %v4902_v6  ;;  %v4908_v9 = vmul.f32 1.442695, %v4895_v7  ;;  %v4894_v10 = vsub.f32 %v4634_v45, %v4880_v8  ;;  %v5538_v6 = vld [vmem:[#allocation2 + $0x1c8] sm:$0xff] }
 0xb5b   :  { %v4889_v11 = vpop.xlane.xlu1 %4888 }
 0xb5c   :  { %13647 = vpow2.f32 %v4908_v9  ;;  %v4906_v59 = vmul.f32 1.442695, %v4894_v10  ;;  %v4897_v17 = vsub.f32 %v4862_v42, %v4889_v11 }
 0xb5d   :  { %v4886_v18 = vpop.xlane.xlu0 %4885 }
 0xb5e   :  { %13649 = vpow2.f32 %v4906_v59  ;;  %v4912_v16 = vmul.f32 1.442695, %v4897_v17  ;;  %v4896_v19 = vsub.f32 %v4786_v44, %v4886_v18 }
 0xb60   :  { %13651 = vpow2.f32 %v4912_v16  ;;  %v4910_v61 = vmul.f32 1.442695, %v4896_v19 }
 0xb61   :  { %v13640_v20 = vpop.eup %13639 }
 0xb62   :  { %13653 = vpow2.f32 %v4910_v61  ;;  %v4917_v24 = vsel %vm1242_vm4, %v13640_v20, 0.0 }
 0xb63   :  { %v13642_v26 = vpop.eup %13641  ;;  %4918 = vadd.xlane.f32.xlu1 %v4917_v24 }
 0xb64   :  { %v4914_v29 = vsel %vm1242_vm4, %v13642_v26, 0.0 }
 0xb65   :  { %v13644_v31 = vpop.eup %13643  ;;  %4915 = vadd.xlane.f32.xlu0 %v4914_v29 }
 0xb66   :  { %v4923_v15 = vsel %vm1242_vm4, %v13644_v31, 0.0 }
 0xb67   :  { %v13646_v38 = vpop.eup %13645  ;;  %4924 = vadd.xlane.f32.xlu1 %v4923_v15 }
 0xb68   :  { %v4920_v32 = vsel %vm1242_vm4, %v13646_v38, 0.0 }
 0xb69   :  { %v13648_v35 = vpop.eup %13647  ;;  %4921 = vadd.xlane.f32.xlu0 %v4920_v32 }
 0xb6a   :  { %v4929_v13 = vsel %vm1242_vm4, %v13648_v35, 0.0 }
 0xb6b   :  { %v13650_v12 = vpop.eup %13649  ;;  %4930 = vadd.xlane.f32.xlu1 %v4929_v13 }
 0xb6c   :  { %v4926_v55 = vsel %vm1242_vm4, %v13650_v12, 0.0 }
 0xb6d   :  { %v13652_v37 = vpop.eup %13651  ;;  %4927 = vadd.xlane.f32.xlu0 %v4926_v55 }
 0xb6e   :  { %v4935_v36 = vsel %vm1242_vm4, %v13652_v37, 0.0 }
 0xb6f   :  { %v13654_v54 = vpop.eup %13653  ;;  %4936 = vadd.xlane.f32.xlu1 %v4935_v36 }
 0xb70   :  { %v4932_v45 = vsel %vm1242_vm4, %v13654_v54, 0.0 }
 0xb71   :  { %4933 = vadd.xlane.f32.xlu0 %v4932_v45 }
 0xbec   :  { %v4919_v39 = vpop.xlane.xlu1 %4918 }
 0xbed   :  { %13655 = vrcp.f32 %v4919_v39 }
 0xbee   :  { %v4916_v40 = vpop.xlane.xlu0 %4915 }
 0xbef   :  { %13657 = vrcp.f32 %v4916_v40 }
 0xbf0   :  { %v4925_v42 = vpop.xlane.xlu1 %4924 }
 0xbf1   :  { %13659 = vrcp.f32 %v4925_v42 }
 0xbf2   :  { %v4922_v43 = vpop.xlane.xlu0 %4921 }
 0xbf3   :  { %13661 = vrcp.f32 %v4922_v43 }
 0xbf4   :  { %v4931_v47 = vpop.xlane.xlu1 %4930 }
 0xbf5   :  { %13663 = vrcp.f32 %v4931_v47 }
 0xbf6   :  { %v4928_v44 = vpop.xlane.xlu0 %4927 }
 0xbf7   :  { %13665 = vrcp.f32 %v4928_v44 }
 0xbf8   :  { %v4937_v50 = vpop.xlane.xlu1 %4936 }
 0xbf9   :  { %13667 = vrcp.f32 %v4937_v50 }
 0xbfa   :  { %v13656_v51 = vpop.eup %13655  ;;  %v4934_v52 = vpop.xlane.xlu0 %4933 }
 0xbfb   :  { %13669 = vrcp.f32 %v4934_v52  ;;  %v4947_v49 = vmul.f32 %v13656_v51, %v13640_v20 }
 0xbfc   :  { %v13658_v56 = vpop.eup %13657 }
 0xbfd   :  { %13150 = vmatmul.mubr.msk.f32.vlgmr.msra.gmra.mxu0 %vm1242_vm4, %v4947_v49  ;;  %v4946_v57 = vmul.f32 %v13658_v56, %v13642_v26 }
 0xbfe   :  { %v13660_v58 = vpop.eup %13659  ;;  %13158 = vmatpush3.msra.mxu0 %v14164_v30  ;;  %13159 = vmatprep.mubr.msk.f32.mxu0 %vm13789_vm3, %v13788_v22 }
 0xbff   :  { %13145 = vmatmul.mubr.msk.f32.vlgmr.msra.gmra.mxu1 %vm1242_vm4, %v4946_v57  ;;  %13167 = vmatprep.subr.mxu0 %v13788_v22  ;;  %v4949_v60 = vmul.f32 %v13660_v58, %v13644_v31 }
 0xc00   :  { %v13662_v62 = vpop.eup %13661  ;;  %13153 = vmatpush3.msra.mxu1 %v14172_v41  ;;  %13154 = vmatprep.mubr.msk.f32.mxu1 %vm13789_vm3, %v13788_v22 }
 0xc01   :  { %13160 = vmatmul.mubr.msk.f32.vlgmr.msra.gmra.mxu0 %vm1242_vm4, %v4949_v60  ;;  %13162 = vmatprep.subr.mxu1 %v13788_v22  ;;  %v4948_v63 = vmul.f32 %v13662_v62, %v13646_v38  ;;  %v12285_v38 = vld [vmem:[#allocation2 + $0x1e8] ss:$0 sm:$0xff] }
 0xc02   :  { %v13664_v30 = vpop.eup %13663  ;;  %13168 = vmatpush3.msra.mxu0 %v14206_v14  ;;  %13169 = vmatprep.mubr.msk.f32.mxu0 %vm13789_vm3, %v13788_v22  ;;  %v4256_v14 = vadd.f32 %v14167_v34, %v14232_v21  ;;  %v5625_v34 = vld [vmem:[#allocation2 + $0x1d0] sm:$0xff]  ;;  %v5793_v21 = vld [vmem:[#allocation2 + $0x1e0] sm:$0xff] }
 0xc03   :  { %13155 = vmatmul.mubr.msk.f32.vlgmr.msra.gmra.mxu1 %vm1242_vm4, %v4948_v63  ;;  %13177 = vmatprep.subr.mxu0 %v13788_v22  ;;  %v4951_v41 = vmul.f32 %v13664_v30, %v13648_v35 }
 0xc04   :  { %v13666_v1 = vpop.eup %13665  ;;  %13163 = vmatpush3.msra.mxu1 %v4254_v0  ;;  %13164 = vmatprep.mubr.msk.f32.mxu1 %vm13789_vm3, %v13788_v22 }
 0xc05   :  { %13170 = vmatmul.mubr.msk.f32.vlgmr.msra.gmra.mxu0 %vm1242_vm4, %v4951_v41  ;;  %13172 = vmatprep.subr.mxu1 %v13788_v22  ;;  %v4950_v2 = vmul.f32 %v13666_v1, %v13650_v12  ;;  %v5922_v1 = vld [vmem:[#allocation2 + $0x208] sm:$0xff] }
 0xc06   :  { %v13668_v23 = vpop.eup %13667  ;;  %13178 = vmatpush3.msra.mxu0 %v14178_v53  ;;  %13179 = vmatprep.mubr.msk.f32.mxu0 %vm13789_vm3, %v13788_v22  ;;  %v5709_v53 = vld [vmem:[#allocation2 + $0x1d8] sm:$0xff] }
 0xc07   :  { %13165 = vmatmul.mubr.msk.f32.vlgmr.msra.gmra.mxu1 %vm1242_vm4, %v4950_v2  ;;  %v4953_v3 = vmul.f32 %v13668_v23, %v13652_v37  ;;  %13187 = vmatprep.subr.mxu0 %v5625_v34  ;;  %v5920_v2 = vld [vmem:[#allocation2 + $0x1f8] sm:$0xff]  ;;  %v5919_v23 = vld [vmem:[#allocation2 + $0x1f0] sm:$0xff] }
 0xc08   :  { %v13670_v4 = vpop.eup %13669  ;;  %13173 = vmatpush3.msra.mxu1 %v4256_v14  ;;  %13174 = vmatprep.mubr.msk.f32.mxu1 %vm13789_vm3, %v13788_v22  ;;  %v6018_v14 = vld [vmem:[#allocation2 + $0x250] sm:$0xff] }
 0xc09   :  { %13180 = vmatmul.mubr.msk.f32.vlgmr.msra.gmra.mxu0 %vm1242_vm4, %v4953_v3  ;;  %v4952_v5 = vmul.f32 %v13670_v4, %v13654_v54  ;;  %13182 = vmatprep.subr.mxu1 %v5538_v6  ;;  %v6017_v3 = vld [vmem:[#allocation2 + $0x248] sm:$0xff]  ;;  %v6016_v4 = vld [vmem:[#allocation2 + $0x240] sm:$0xff] }
 0xc0a   :  { %13188 = vmatpush3.msra.mxu0 %v5625_v34 }
 0xc0b   :  { %13175 = vmatmul.mubr.msk.f32.vlgmr.msra.gmra.mxu1 %vm1242_vm4, %v4952_v5  ;;  %13197 = vmatprep.subr.mxu0 %v5793_v21  ;;  %v6015_v5 = vld [vmem:[#allocation2 + $0x238] sm:$0xff] }
 0xc0c   :  { %13183 = vmatpush3.msra.mxu1 %v5538_v6 }
 0xc0d   :  { %13192 = vmatprep.subr.mxu1 %v5709_v53 }
 0xcbd   :  { %v5096_v7 = vpop.f32.mrf.mxu0 }
 0xcbf   :  { %v5023_v8 = vpop.f32.mrf.mxu1  ;;  %v13151_v9 = vpop.f32.mrf.mxu0 }
 0xcc0   :  { %13184 = vmatprep.mubr.msk.f32.mxu1 %vm1242_vm4, %v5023_v8 }
 0xcc1   :  { %v13146_v10 = vpop.f32.mrf.mxu1  ;;  %v5242_v11 = vpop.f32.mrf.mxu0  ;;  %13185 = vmatmul.mubr.msk.f32.vlgmr.msra.gmra.mxu1 %vm1242_vm4, %v5096_v7 }
 0xcc2   :  { %13193 = vmatpush3.msra.mxu1 %v5709_v53  ;;  %v12294_v10 = vld [vmem:[#allocation2 + $0x260] ss:$0 sm:$0xff] }
 0xcc3   :  { %v5169_v59 = vpop.f32.mrf.mxu1  ;;  %v13161_v17 = vpop.f32.mrf.mxu0  ;;  %13202 = vmatprep.subr.mxu1 %v5922_v1 }
 0xcc4   :  { %13189 = vmatprep.mubr.msk.f32.mxu0 %vm1242_vm4, %v5169_v59 }
 0xcc5   :  { %v13156_v18 = vpop.f32.mrf.mxu1  ;;  %v5388_v16 = vpop.f32.mrf.mxu0  ;;  %13190 = vmatmul.mubr.msk.f32.vlgmr.msra.gmra.mxu0 %vm1242_vm4, %v5242_v11 }
 0xcc6   :  { %13198 = vmatpush3.msra.mxu0 %v5793_v21 }
 0xcc7   :  { %v5315_v19 = vpop.f32.mrf.mxu1  ;;  %v13171_v61 = vpop.f32.mrf.mxu0  ;;  %13213 = vmatprep.subr.mxu0 %v6018_v14 }
 0xcc8   :  { %13194 = vmatprep.mubr.msk.f32.mxu1 %vm1242_vm4, %v5315_v19 }
 0xcc9   :  { %v13166_v20 = vpop.f32.mrf.mxu1  ;;  %v5534_v24 = vpop.f32.mrf.mxu0  ;;  %13195 = vmatmul.mubr.msk.f32.vlgmr.msra.gmra.mxu1 %vm1242_vm4, %v5388_v16  ;;  %v12295_v16 = vld [vmem:[#allocation2 + $0x268] ss:$0 sm:$0xff] }
 0xcca   :  { %13203 = vmatpush3.msra.mxu1 %v5922_v1 }
 0xccb   :  { %v5461_v26 = vpop.f32.mrf.mxu1  ;;  %v13181_v29 = vpop.f32.mrf.mxu0 }
 0xccc   :  { %13199 = vmatprep.mubr.msk.f32.mxu0 %vm1242_vm4, %v5461_v26  ;;  %v6013_v26 = vld [vmem:[#allocation2 + $0x228] sm:$0xff]  ;;  %v6012_v29 = vld [vmem:[#allocation2 + $0x220] sm:$0xff] }
 0xccd   :  { %v13176_v31 = vpop.f32.mrf.mxu1  ;;  %13200 = vmatmul.mubr.msk.f32.vlgmr.msra.gmra.mxu0 %vm1242_vm4, %v5534_v24  ;;  %v6014_v24 = vld [vmem:[#allocation2 + $0x230] sm:$0xff] }
 0xcce   :  { %13214 = vmatpush3.msra.mxu0 %v6018_v14  ;;  %v6011_v31 = vld [vmem:[#allocation2 + $0x218] sm:$0xff] }
 0xccf   :  { %13215 = vmatprep.subr.mxu0 %v6017_v3 }
 0xcd0   :  { %13216 = vmatpush3.msra.mxu0 %v6017_v3  ;;  %v12303_v3 = vld [vmem:[#allocation2 + $0x278] ss:$0 sm:$0xff] }
 0xcd1   :  { %13217 = vmatprep.subr.mxu0 %v6016_v4 }
 0xcd2   :  { %13218 = vmatpush3.msra.mxu0 %v6016_v4 }
 0xcd3   :  { %13219 = vmatprep.subr.mxu0 %v6015_v5 }
 0xcd4   :  { %13220 = vmatpush3.msra.mxu0 %v6015_v5 }
 0xcd5   :  { %13221 = vmatprep.subr.mxu0 %v6014_v24 }
 0xcd6   :  { %13222 = vmatpush3.msra.mxu0 %v6014_v24  ;;  %v6430_v24 = vld [vmem:[#allocation2 + $0x2a8] sm:$0xff] }
 0xcd7   :  { %13223 = vmatprep.subr.mxu0 %v6013_v26 }
 0xcd8   :  { %13224 = vmatpush3.msra.mxu0 %v6013_v26  ;;  %v6272_v26 = vld [vmem:[#allocation2 + $0x298] sm:$0xff] }
 0xcd9   :  { %13225 = vmatprep.subr.mxu0 %v6012_v29 }
 0xcda   :  { %13226 = vmatpush3.msra.mxu0 %v6012_v29  ;;  %v6588_v29 = vld [vmem:[#allocation2 + $0x2b8] sm:$0xff] }
 0xcdb   :  { %13227 = vmatprep.subr.mxu0 %v6011_v31 }
 0xcdc   :  { %13228 = vmatpush3.msra.mxu0 %v6011_v31 }
 0xcdd   :  { %13247 = vmatprep.subr.msk.mxu0 %vm118_vm2, %v6430_v24 }
 0xd81   :  { %v13186_v15 = vpop.f32.mrf.mxu1 }
 0xd82   :  { %v5622_v13 = vadd.f32 %v13186_v15, %v12285_v38  ;;  %v12296_v15 = vld [vmem:[#allocation2 + $0x210] ss:$0 sm:$0xff] }
 0xd83   :  { %v5616_v35 = vpop.f32.mrf.mxu1 }
 0xd84   :  { %v5617_v37 = vadd.f32 %v12285_v38, %v5616_v35 }
 0xd85   :  { %v13191_v32 = vpop.f32.mrf.mxu0 }
 0xd86   :  { %v5708_v36 = vadd.f32 %v13191_v32, %v5622_v13 }
 0xd87   :  { %v5698_v12 = vpop.f32.mrf.mxu0 }
 0xd88   :  { %v5707_v45 = vadd.f32 %v5698_v12, %v5617_v37  ;;  %v12299_v37 = vld [vmem:[#allocation2 + $0x258] ss:$0 sm:$0xff] }
 0xd89   :  { %v13196_v55 = vpop.f32.mrf.mxu1 }
 0xd8a   :  { %v5792_v39 = vadd.f32 %v13196_v55, %v5708_v36 }
 0xd8b   :  { %v5782_v54 = vpop.f32.mrf.mxu1 }
 0xd8c   :  { %v5791_v42 = vadd.f32 %v5782_v54, %v5707_v45 }
 0xd8d   :  { %v13201_v40 = vpop.f32.mrf.mxu0 }
 0xd8e   :  { %v5876_v43 = vadd.f32 %v13201_v40, %v5792_v39 }
 0xd8f   :  { %v5866_v47 = vpop.f32.mrf.mxu0 }
 0xd90   :  { %v5875_v44 = vadd.f32 %v5866_v47, %v5791_v42  ;;  %v5878_v50 = vadd.f32 %v5876_v43, %v14072_v46 }
 0xd92   :  { %v5884_v51 = vsel %vm118_vm2, %v5878_v50, 0.0  ;;  %v5877_v52 = vadd.f32 %v5875_v44, %v14070_v48  ;;  %v5921_v48 = vld [vmem:[#allocation2 + $0x200] sm:$0xff] }
 0xd93   :  { %5885 = vadd.xlane.f32.xlu1 %v5884_v51  ;;  %13204 = vmatprep.subr.mxu1 %v5921_v48 }
 0xd94   :  { %v5881_v49 = vsel %vm118_vm2, %v5877_v52, 0.0  ;;  %13205 = vmatpush3.msra.mxu1 %v5921_v48 }
 0xd95   :  { %5882 = vadd.xlane.f32.xlu0 %v5881_v49  ;;  %13206 = vmatprep.subr.mxu1 %v5920_v2 }
 0xd96   :  { %13207 = vmatpush3.msra.mxu1 %v5920_v2  ;;  %v12302_v2 = vld [vmem:[#allocation2 + $0x270] ss:$0 sm:$0xff] }
 0xd97   :  { %13208 = vmatprep.subr.mxu1 %v5919_v23 }
 0xd98   :  { %13209 = vmatpush3.msra.mxu1 %v5919_v23 }
 0xe1c   :  { %v5886_v56 = vpop.xlane.xlu1 %5885 }
 0xe1d   :  { %v5888_v57 = vmul.f32 0.03125, %v5886_v56 }
 0xe1e   :  { %v5883_v58 = vpop.xlane.xlu0 %5882 }
 0xe1f   :  { %v5890_v60 = vsub.f32 %v5878_v50, %v5888_v57  ;;  %v5887_v62 = vmul.f32 0.03125, %v5883_v58 }
 0xe21   :  { %v5889_v63 = vsub.f32 %v5877_v52, %v5887_v62  ;;  %v5892_v30 = vmul.f32 %v5890_v60, %v5890_v60 }
 0xe23   :  { %v5896_v0 = vsel %vm118_vm2, %v5892_v30, 0.0  ;;  %v5891_v41 = vmul.f32 %v5889_v63, %v5889_v63 }
 0xe24   :  { %5897 = vadd.xlane.f32.xlu1 %v5896_v0 }
 0xe25   :  { %v5893_v46 = vsel %vm118_vm2, %v5891_v41, 0.0 }
 0xe26   :  { %5894 = vadd.xlane.f32.xlu0 %v5893_v46 }
 0xead   :  { %v5898_v6 = vpop.xlane.xlu1 %5897 }
 0xeae   :  { %v5900_v34 = vmul.f32 0.03125, %v5898_v6 }
 0xeaf   :  { %v5895_v53 = vpop.xlane.xlu0 %5894 }
 0xeb0   :  { %v5902_v21 = vadd.f32 1e-05, %v5900_v34  ;;  %v5899_v7 = vmul.f32 0.03125, %v5895_v53 }
 0xeb2   :  { %13671 = vrsqrt.f32 %v5902_v21  ;;  %v5901_v8 = vadd.f32 1e-05, %v5899_v7 }
 0xeb4   :  { %13673 = vrsqrt.f32 %v5901_v8 }
 0xebf   :  { %v13672_v9 = vpop.eup %13671 }
 0xec0   :  { %v5906_v11 = vmul.f32 %v13672_v9, %v5890_v60 }
 0xec1   :  { %v13674_v59 = vpop.eup %13673 }
 0xec2   :  { %v5905_v17 = vmul.f32 %v13674_v59, %v5889_v63  ;;  %v5912_v18 = vmul.f32 %v12294_v10, %v5906_v11 }
 0xec4   :  { %v5911_v19 = vmul.f32 %v12294_v10, %v5905_v17  ;;  %v5918_v20 = vadd.f32 %v12295_v16, %v5912_v18 }
 0xec6   :  { %v5917_v61 = vadd.f32 %v12295_v16, %v5911_v19 }
 0xec8   :  { %13210 = vmatprep.mubr.msk.f32.mxu1 %vm118_vm2, %v5917_v61 }
 0xec9   :  { %13211 = vmatmul.mubr.msk.f32.vlgmr.msra.gmra.mxu1 %vm118_vm2, %v5918_v20 }
 0xf89   :  { %v13212_v38 = vpop.f32.mrf.mxu1 }
 0xf8a   :  { %v6006_v32 = vadd.f32 %v13212_v38, %v12296_v15 }
 0xf8b   :  { %v6000_v35 = vpop.f32.mrf.mxu1 }
 0xf8c   :  { %v6001_v13 = vadd.f32 %v12296_v15, %v6000_v35  ;;  %v6010_v55 = vmax.f32 %v6006_v32, 0.0 }
 0xf8e   :  { %v6009_v12 = vmax.f32 %v6001_v13, 0.0 }
 0xf90   :  { %13229 = vmatprep.mubr.msk.f32.mxu0 %vm3010_vm5, %v6009_v12 }
 0xf91   :  { %13230 = vmatmul.mubr.msk.f32.vlgmr.msra.gmra.mxu0 %vm3010_vm5, %v6010_v55  ;;  %v12304_v55 = vld [vmem:[#allocation2 + $0x280] ss:$0 sm:$0xff] }
 0xf92   :  { %13248 = vmatpush3.xpose.msk.msra.mxu0 %vm118_vm2, %v6430_v24 }
 0xf93   :  { %13257 = vmatprep.subr.msk.mxu0 %vm118_vm2, %v6588_v29 }
0x1051   :  { %v13231_v36 = vpop.f32.mrf.mxu0 }
0x1052   :  { %v6102_v54 = vadd.f32 %v13231_v36, %v12299_v37 }
0x1053   :  { %v6096_v45 = vpop.f32.mrf.mxu0 }
0x1054   :  { %v6097_v39 = vadd.f32 %v12299_v37, %v6096_v45  ;;  %v6106_v40 = vadd.f32 %v6102_v54, %v5918_v20  ;;  %v6187_v20 = vld [vmem:[#allocation2 + $0x290] sm:$0xff] }
0x1055   :  { %13232 = vmatprep.subr.msk.mxu1 %vm118_vm2, %v6187_v20 }
0x1056   :  { %v6112_v42 = vsel %vm118_vm2, %v6106_v40, 0.0  ;;  %v6105_v43 = vadd.f32 %v6097_v39, %v5917_v61  ;;  %13233 = vmatpush3.xpose.msk.msra.mxu1 %vm118_vm2, %v6187_v20  ;;  %v12305_v39 = vld [vmem:[#allocation2 + $0x288] ss:$0 sm:$0xff] }
0x1057   :  { %6113 = vadd.xlane.f32.xlu1 %v6112_v42  ;;  %13237 = vmatprep.subr.msk.mxu1 %vm118_vm2, %v6272_v26 }
0x1058   :  { %v6109_v47 = vsel %vm118_vm2, %v6105_v43, 0.0 }
0x1059   :  { %6110 = vadd.xlane.f32.xlu0 %v6109_v47  ;;  %v6351_v47 = vld [vmem:[#allocation2 + $0x2a0] sm:$0xff] }
0x10e0   :  { %v6114_v44 = vpop.xlane.xlu1 %6113 }
0x10e1   :  { %v6116_v50 = vmul.f32 0.03125, %v6114_v44  ;;  %v6746_v44 = vld [vmem:[#allocation2 + $0x2c8] sm:$0xff] }
0x10e2   :  { %v6111_v51 = vpop.xlane.xlu0 %6110 }
0x10e3   :  { %v6118_v52 = vsub.f32 %v6106_v40, %v6116_v50  ;;  %v6115_v49 = vmul.f32 0.03125, %v6111_v51  ;;  %v6509_v50 = vld [vmem:[#allocation2 + $0x2b0] sm:$0xff]  ;;  %v6904_v51 = vld [vmem:[#allocation2 + $0x2d8] sm:$0xff] }
0x10e5   :  { %v6117_v56 = vsub.f32 %v6105_v43, %v6115_v49  ;;  %v6120_v57 = vmul.f32 %v6118_v52, %v6118_v52  ;;  %v7062_v49 = vld [vmem:[#allocation2 + $0x2e8] sm:$0xff] }
0x10e7   :  { %v6124_v58 = vsel %vm118_vm2, %v6120_v57, 0.0  ;;  %v6119_v60 = vmul.f32 %v6117_v56, %v6117_v56  ;;  %v6983_v57 = vld [vmem:[#allocation2 + $0x2e0] sm:$0xff] }
0x10e8   :  { %6125 = vadd.xlane.f32.xlu1 %v6124_v58  ;;  %v12344_v58 = vld.sshfl [vmem:[#allocation2 + $0x300] sm:$0x33 pattern:$0x75316420] }
0x10e9   :  { %v6121_v62 = vsel %vm118_vm2, %v6119_v60, 0.0 }
0x10ea   :  { %6122 = vadd.xlane.f32.xlu0 %v6121_v62 }
0x1171   :  { %v6126_v63 = vpop.xlane.xlu1 %6125 }
0x1172   :  { %v6128_v30 = vmul.f32 0.03125, %v6126_v63 }
0x1173   :  { %v6123_v0 = vpop.xlane.xlu0 %6122 }
0x1174   :  { %v6130_v41 = vadd.f32 1e-05, %v6128_v30  ;;  %v6127_v46 = vmul.f32 0.03125, %v6123_v0 }
0x1175   :  { %v12343_v0 = vld.sshfl [vmem:[#allocation2 + $0x2f8] sm:$0x33 pattern:$0x75316420] }
0x1176   :  { %13675 = vrsqrt.f32 %v6130_v41  ;;  %v6129_v1 = vadd.f32 1e-05, %v6127_v46  ;;  %v7266_v41 = vcombine.high %v12344_v58, %v12344_v58  ;;  %v12342_v46 = vld.sshfl [vmem:[#allocation2 + $0x2f0] sm:$0x33 pattern:$0x75316420] }
0x1178   :  { %13677 = vrsqrt.f32 %v6129_v1  ;;  %v7157_v1 = vrot.slane %v12342_v46, %v13901_v28 }
0x1183   :  { %v13676_v48 = vpop.eup %13675 }
0x1184   :  { %v6134_v23 = vmul.f32 %v13676_v48, %v6118_v52  ;;  %v6667_v52 = vld [vmem:[#allocation2 + $0x2c0] sm:$0xff] }
0x1185   :  { %v13678_v14 = vpop.eup %13677 }
0x1186   :  { %v6140_v4 = vmul.f32 %v12302_v2, %v6134_v23  ;;  %v6133_v5 = vmul.f32 %v13678_v14, %v6117_v56  ;;  %v6825_v56 = vld [vmem:[#allocation2 + $0x2d0] sm:$0xff]  ;;  %v7212_v23 = vcombine.high %v12343_v0, %v12343_v0  ;;  %v7219_v14 = vrot.slane %v12343_v0, %v13901_v28 }
0x1188   :  { %v6146_v6 = vadd.f32 %v12303_v3, %v6140_v4  ;;  %v6139_v34 = vmul.f32 %v12302_v2, %v6133_v5  ;;  %v7280_v5 = vrot.slane %v7266_v41, %v13901_v28 }
0x118a   :  { %v6152_v53 = vsel %vm118_vm2, %v6146_v6, 0.0  ;;  %v6145_v21 = vadd.f32 %v12303_v3, %v6139_v34  ;;  %v7150_v3 = vcombine.high %v12342_v46, %v12342_v46  ;;  %v7170_v34 = vrot.slane %v7157_v1, %v13905_v33 }
0x118b   :  { %6153 = vadd.xlane.f32.xlu1 %v6152_v53 }
0x118c   :  { %v6149_v7 = vsel %vm118_vm2, %v6145_v21, 0.0 }
0x118d   :  { %6150 = vadd.xlane.f32.xlu0 %v6149_v7 }
0x1214   :  { %v6154_v8 = vpop.xlane.xlu1 %6153 }
0x1215   :  { %v6156_v9 = vmul.f32 0.03125, %v6154_v8  ;;  %v7232_v8 = vrot.slane %v7219_v14, %v13905_v33 }
0x1216   :  { %v6151_v10 = vpop.xlane.xlu0 %6150 }
0x1217   :  { %v6158_v11 = vsub.f32 %v6146_v6, %v6156_v9  ;;  %v6155_v59 = vmul.f32 0.03125, %v6151_v10  ;;  %v7164_v9 = vrot.slane %v7150_v3, %v13901_v28 }
0x1219   :  { %v6157_v17 = vsub.f32 %v6145_v21, %v6155_v59  ;;  %v6160_v18 = vmul.f32 %v6158_v11, %v6158_v11  ;;  %v7226_v21 = vrot.slane %v7212_v23, %v13901_v28  ;;  %v7282_v59 = vcombine.high %v7280_v5, %v7280_v5 }
0x121b   :  { %v6164_v16 = vsel %vm118_vm2, %v6160_v18, 0.0  ;;  %v6159_v19 = vmul.f32 %v6157_v17, %v6157_v17  ;;  %v7236_v20 = vrot.slane %v7226_v21, %v13905_v33 }
0x121c   :  { %6165 = vadd.xlane.f32.xlu1 %v6164_v16  ;;  %v7174_v16 = vrot.slane %v7164_v9, %v13905_v33 }
0x121d   :  { %v6161_v61 = vsel %vm118_vm2, %v6159_v19, 0.0  ;;  %v7165_v19 = vcombine.high %v7157_v1, %v7157_v1 }
0x121e   :  { %6162 = vadd.xlane.f32.xlu0 %v6161_v61 }
0x12a5   :  { %v6166_v31 = vpop.xlane.xlu1 %6165 }
0x12a6   :  { %v6168_v15 = vmul.f32 0.03125, %v6166_v31 }
0x12a7   :  { %v6163_v38 = vpop.xlane.xlu0 %6162 }
0x12a8   :  { %v6170_v32 = vadd.f32 1e-05, %v6168_v15  ;;  %v6167_v35 = vmul.f32 0.03125, %v6163_v38 }
0x12aa   :  { %13679 = vrsqrt.f32 %v6170_v32  ;;  %v6169_v13 = vadd.f32 1e-05, %v6167_v35  ;;  %v14413_v32 = vrot.slane %v7282_v59, %v13905_v33  ;;  %v7166_v35 = vcombine.high %v7164_v9, %v7164_v9 }
0x12ab   :  { %v7922_v59 = vand.u32 127, %v1085_v25 }
0x12ac   :  { %13681 = vrsqrt.f32 %v6169_v13 }
0x12ad   :  { %vm14482_vm6 = vcmp.le.s32.totalorder %v7922_v59, %v13898_v27 }
0x12b7   :  { %v13680_v12 = vpop.eup %13679 }
0x12b8   :  { %v6174_v37 = vmul.f32 %v13680_v12, %v6158_v11  ;;  %v7290_v11 = vrot.slane %v7280_v5, %v13905_v33 }
0x12b9   :  { %v13682_v36 = vpop.eup %13681 }
0x12ba   :  { %v6173_v54 = vmul.f32 %v13682_v36, %v6157_v17  ;;  %v6180_v45 = vmul.f32 %v12304_v55, %v6174_v37 }
0x12bc   :  { %v6179_v40 = vmul.f32 %v12304_v55, %v6173_v54  ;;  %v14318_v43 = vadd.f32 %v12305_v39, %v6180_v45  ;;  %v7273_v55 = vrot.slane %v12344_v58, %v13901_v28  ;;  %v7178_v54 = vrot.slane %v7165_v19, %v13905_v33 }
0x12be   :  { %v14316_v42 = vadd.f32 %v12305_v39, %v6179_v40 }
0x12c0   :  { %13234 = vmatprep.mubr.msk.f32.mxu1 %vm118_vm2, %v14316_v42  ;;  %13249 = vmatprep.mubr.msk.f32.mxu0 %vm118_vm2, %v14316_v42 }
0x12c1   :  { %13235 = vmatmul.mubr.msk.f32.vlgmr.msra.gmra.mxu1 %vm118_vm2, %v14318_v43  ;;  %13250 = vmatmul.mubr.msk.f32.vlgmr.msra.gmra.mxu0 %vm118_vm2, %v14318_v43 }
0x12c2   :  { %13238 = vmatpush3.xpose.msk.msra.mxu1 %vm118_vm2, %v6272_v26  ;;  %13239 = vmatprep.mubr.msk.f32.mxu1 %vm118_vm2, %v14316_v42 }
0x12c3   :  { %13258 = vmatpush3.xpose.msk.msra.mxu0 %vm118_vm2, %v6588_v29  ;;  %13259 = vmatprep.mubr.msk.f32.mxu0 %vm118_vm2, %v14316_v42  ;;  %v7227_v29 = vcombine.high %v7219_v14, %v7219_v14 }
0x12c4   :  { %13242 = vmatprep.subr.msk.mxu1 %vm118_vm2, %v6351_v47  ;;  %13267 = vmatprep.subr.msk.mxu0 %vm118_vm2, %v6746_v44 }
0x12c5   :  { %13240 = vmatmul.mubr.msk.f32.vlgmr.msra.gmra.mxu1 %vm118_vm2, %v14318_v43 }
0x12c6   :  { %13260 = vmatmul.mubr.msk.f32.vlgmr.msra.gmra.mxu0 %vm118_vm2, %v14318_v43  ;;  %13243 = vmatpush3.xpose.msk.msra.mxu1 %vm118_vm2, %v6351_v47  ;;  %v7228_v47 = vcombine.high %v7226_v21, %v7226_v21 }
0x12c7   :  { %13244 = vmatprep.mubr.msk.f32.mxu1 %vm118_vm2, %v14316_v42  ;;  %13268 = vmatpush3.xpose.msk.msra.mxu0 %vm118_vm2, %v6746_v44  ;;  %v7240_v44 = vrot.slane %v7227_v29, %v13905_v33 }
0x12c8   :  { %13269 = vmatprep.mubr.msk.f32.mxu0 %vm118_vm2, %v14316_v42  ;;  %13252 = vmatprep.subr.msk.mxu1 %vm118_vm2, %v6509_v50  ;;  %v7244_v46 = vrot.slane %v7228_v47, %v13905_v33 }
0x12c9   :  { %13245 = vmatmul.mubr.msk.f32.vlgmr.msra.gmra.mxu1 %vm118_vm2, %v14318_v43  ;;  %13277 = vmatprep.subr.msk.mxu0 %vm118_vm2, %v6904_v51 }
0x12ca   :  { %13270 = vmatmul.mubr.msk.f32.vlgmr.msra.gmra.mxu0 %vm118_vm2, %v14318_v43  ;;  %13253 = vmatpush3.xpose.msk.msra.mxu1 %vm118_vm2, %v6509_v50 }
0x12cb   :  { %13254 = vmatprep.mubr.msk.f32.mxu1 %vm118_vm2, %v14316_v42  ;;  %13278 = vmatpush3.xpose.msk.msra.mxu0 %vm118_vm2, %v6904_v51  ;;  %v7281_v51 = vcombine.high %v7273_v55, %v7273_v55 }
0x12cc   :  { %13279 = vmatprep.mubr.msk.f32.mxu0 %vm118_vm2, %v14316_v42  ;;  %13262 = vmatprep.subr.msk.mxu1 %vm118_vm2, %v6667_v52 }
0x12cd   :  { %13255 = vmatmul.mubr.msk.f32.vlgmr.msra.gmra.mxu1 %vm118_vm2, %v14318_v43  ;;  %13287 = vmatprep.subr.msk.mxu0 %vm118_vm2, %v7062_v49 }
0x12ce   :  { %13280 = vmatmul.mubr.msk.f32.vlgmr.msra.gmra.mxu0 %vm118_vm2, %v14318_v43  ;;  %13263 = vmatpush3.xpose.msk.msra.mxu1 %vm118_vm2, %v6667_v52 }
0x12cf   :  { %13264 = vmatprep.mubr.msk.f32.mxu1 %vm118_vm2, %v14316_v42  ;;  %13288 = vmatpush3.xpose.msk.msra.mxu0 %vm118_vm2, %v7062_v49 }
0x12d0   :  { %13289 = vmatprep.mubr.msk.f32.mxu0 %vm118_vm2, %v14316_v42  ;;  %13272 = vmatprep.subr.msk.mxu1 %vm118_vm2, %v6825_v56 }
0x12d1   :  { %13265 = vmatmul.mubr.msk.f32.vlgmr.msra.gmra.mxu1 %vm118_vm2, %v14318_v43  ;;  %13297 = vmatprep.subr.mxu0 %v13788_v22 }
0x12d2   :  { %13290 = vmatmul.mubr.msk.f32.vlgmr.msra.gmra.mxu0 %vm118_vm2, %v14318_v43  ;;  %13273 = vmatpush3.xpose.msk.msra.mxu1 %vm118_vm2, %v6825_v56 }
0x12d3   :  { %13274 = vmatprep.mubr.msk.f32.mxu1 %vm118_vm2, %v14316_v42  ;;  %13282 = vmatprep.subr.msk.mxu1 %vm118_vm2, %v6983_v57 }
0x12d4   :  { %13299 = vmatprep.mubr.msk.f32.mxu0 %vm13789_vm3, %v13788_v22 }
0x12d5   :  { %13275 = vmatmul.mubr.msk.f32.vlgmr.msra.gmra.mxu1 %vm118_vm2, %v14318_v43 }
0x12d6   :  { %13283 = vmatpush3.xpose.msk.msra.mxu1 %vm118_vm2, %v6983_v57  ;;  %13284 = vmatprep.mubr.msk.f32.mxu1 %vm118_vm2, %v14316_v42 }
0x12d7   :  { %13292 = vmatprep.subr.mxu1 %v13788_v22 }
0x12d9   :  { %13285 = vmatmul.mubr.msk.f32.vlgmr.msra.gmra.mxu1 %vm118_vm2, %v14318_v43 }
0x12da   :  { %13294 = vmatprep.mubr.msk.f32.mxu1 %vm13789_vm3, %v13788_v22 }
0x1381   :  { %v13236_v60 = vpop.f32.mrf.mxu1  ;;  %v14392_v62 = vpop.f32.mrf.mxu0 }
0x1382   :  { %v7188_v18 = vadd.f32 %v13236_v60, %v7170_v34  ;;  %v7182_v60 = vrot.slane %v7166_v35, %v13905_v33 }
0x1383   :  { %v6263_v63 = vpop.f32.mrf.mxu1  ;;  %v14394_v30 = vpop.f32.mrf.mxu0 }
0x1384   :  { %v7187_v31 = vadd.f32 %v7170_v34, %v6263_v63  ;;  %v7196_v37 = vmul.f32 0.35355338, %v7188_v18 }
0x1385   :  { %v13241_v48 = vpop.f32.mrf.mxu1 }
0x1386   :  { %v13261_v2 = vpop.f32.mrf.mxu0  ;;  %v7190_v36 = vadd.f32 %v13241_v48, %v7174_v16  ;;  %v7195_v52 = vmul.f32 0.35355338, %v7187_v31  ;;  %v14439_v48 = vrot.slane %v7281_v51, %v13905_v33 }
0x1387   :  { %v6342_v4 = vpop.f32.mrf.mxu1  ;;  %v7252_v40 = vadd.f32 %v13261_v2, %v7236_v20 }
0x1388   :  { %v6658_v6 = vpop.f32.mrf.mxu0  ;;  %v7189_v49 = vadd.f32 %v7174_v16, %v6342_v4  ;;  %v7198_v63 = vmul.f32 0.35355338, %v7190_v36  ;;  %v7194_v4 = vadd.f32 %v14392_v62, %v7182_v60  ;;  %v7193_v62 = vadd.f32 %v7182_v60, %v14394_v30 }
0x1389   :  { %v13246_v53 = vpop.f32.mrf.mxu1  ;;  %v7251_v58 = vadd.f32 %v7236_v20, %v6658_v6 }
0x138a   :  { %v14401_v7 = vpop.f32.mrf.mxu0  ;;  %v7192_v0 = vadd.f32 %v13246_v53, %v7178_v54  ;;  %v7197_v2 = vmul.f32 0.35355338, %v7189_v49  ;;  %v7286_v53 = vrot.slane %v7273_v55, %v13905_v33  ;;  %v7201_v30 = vmul.f32 0.35355338, %v7193_v62 }
0x138b   :  { %v6421_v10 = vpop.f32.mrf.mxu1  ;;  %v7256_v34 = vadd.f32 %v14401_v7, %v7244_v46  ;;  %v7202_v7 = vmul.f32 0.35355338, %v7194_v4 }
0x138c   :  { %v14406_v17 = vpop.f32.mrf.mxu0  ;;  %v7191_v23 = vadd.f32 %v7178_v54, %v6421_v10  ;;  %v7200_v5 = vmul.f32 0.35355338, %v7192_v0 }
0x138d   :  { %v13256_v61 = vpop.f32.mrf.mxu1  ;;  %v7255_v9 = vadd.f32 %v7244_v46, %v14406_v17 }
0x138e   :  { %v7250_v24 = vadd.f32 %v13256_v61, %v7232_v8  ;;  %v13281_v26 = vpop.f32.mrf.mxu0 }
0x138f   :  { %v14410_v15 = vadd.f32 %v13281_v26, %v7290_v11  ;;  %v6579_v38 = vpop.f32.mrf.mxu1 }
0x1390   :  { %v7249_v13 = vadd.f32 %v7232_v8, %v6579_v38  ;;  %v6974_v12 = vpop.f32.mrf.mxu0  ;;  %13298 = vmatpush3.xpose.msk.msra.mxu0 %vm1242_vm4, %v7250_v24  ;;  %v7199_v8 = vmul.f32 0.35355338, %v7191_v23 }
0x1391   :  { %v14418_v45 = vadd.f32 %v7290_v11, %v6974_v12  ;;  %v13266_v39 = vpop.f32.mrf.mxu1  ;;  %13307 = vmatprep.subr.mxu0 %v13788_v22 }
0x1392   :  { %v13291_v50 = vpop.f32.mrf.mxu0  ;;  %13293 = vmatpush3.xpose.msk.msra.mxu1 %vm1242_vm4, %v7249_v13  ;;  %v7254_v1 = vadd.f32 %v13266_v39, %v7240_v44 }
0x1393   :  { %v14424_v56 = vadd.f32 %v13291_v50, %v14413_v32  ;;  %v6737_v57 = vpop.f32.mrf.mxu1  ;;  %13300 = vmatmul.mubr.msk.f32.vlgmr.msra.gmra.mxu0 %vm1242_vm4, %v7196_v37  ;;  %13302 = vmatprep.subr.mxu1 %v13788_v22 }
0x1394   :  { %13308 = vmatpush3.xpose.msk.msra.mxu0 %vm1242_vm4, %v7252_v40  ;;  %13309 = vmatprep.mubr.msk.f32.mxu0 %vm13789_vm3, %v13788_v22  ;;  %v7253_v3 = vadd.f32 %v7240_v44, %v6737_v57  ;;  %v14479_v17 = vpop.f32.mrf.mxu0 }
0x1395   :  { %v13276_v41 = vpop.f32.mrf.mxu1  ;;  %13295 = vmatmul.mubr.msk.f32.vlgmr.msra.gmra.mxu1 %vm1242_vm4, %v7195_v52  ;;  %13317 = vmatprep.subr.mxu0 %v13788_v22 }
0x1396   :  { %13303 = vmatpush3.xpose.msk.msra.mxu1 %vm1242_vm4, %v7251_v58  ;;  %13304 = vmatprep.mubr.msk.f32.mxu1 %vm13789_vm3, %v13788_v22  ;;  %v7304_v10 = vadd.f32 %v13276_v41, %v7286_v53 }
0x1397   :  { %v6895_v14 = vpop.f32.mrf.mxu1  ;;  %13310 = vmatmul.mubr.msk.f32.vlgmr.msra.gmra.mxu0 %vm1242_vm4, %v7198_v63  ;;  %13312 = vmatprep.subr.mxu1 %v13788_v22 }
0x1398   :  { %13318 = vmatpush3.xpose.msk.msra.mxu0 %vm1242_vm4, %v7254_v1  ;;  %13319 = vmatprep.mubr.msk.f32.mxu0 %vm13789_vm3, %v13788_v22  ;;  %v7303_v11 = vadd.f32 %v7286_v53, %v6895_v14 }
0x1399   :  { %v13286_v6 = vpop.f32.mrf.mxu1  ;;  %13305 = vmatmul.mubr.msk.f32.vlgmr.msra.gmra.mxu1 %vm1242_vm4, %v7197_v2  ;;  %13327 = vmatprep.subr.mxu0 %v13788_v22 }
0x139a   :  { %v14452_v21 = vadd.f32 %v13286_v6, %v14439_v48  ;;  %13313 = vmatpush3.xpose.msk.msra.mxu1 %vm1242_vm4, %v7253_v3  ;;  %13314 = vmatprep.mubr.msk.f32.mxu1 %vm13789_vm3, %v13788_v22 }
0x139b   :  { %13320 = vmatmul.mubr.msk.f32.vlgmr.msra.gmra.mxu0 %vm1242_vm4, %v7200_v5  ;;  %13322 = vmatprep.subr.mxu1 %v13788_v22  ;;  %v14486_v16 = vpop.f32.mrf.mxu1 }
0x139c   :  { %13328 = vmatpush3.xpose.msk.msra.mxu0 %vm1242_vm4, %v7256_v34  ;;  %13329 = vmatprep.mubr.msk.f32.mxu0 %vm13789_vm3, %v13788_v22 }
0x139d   :  { %13315 = vmatmul.mubr.msk.f32.vlgmr.msra.gmra.mxu1 %vm1242_vm4, %v7199_v8  ;;  %13337 = vmatprep.subr.mxu0 %v13788_v22 }
0x139e   :  { %13323 = vmatpush3.xpose.msk.msra.mxu1 %vm1242_vm4, %v7255_v9  ;;  %13324 = vmatprep.mubr.msk.f32.mxu1 %vm13789_vm3, %v13788_v22 }
0x139f   :  { %13330 = vmatmul.mubr.msk.f32.vlgmr.msra.gmra.mxu0 %vm1242_vm4, %v7202_v7  ;;  %13332 = vmatprep.subr.mxu1 %v13788_v22 }
0x13a0   :  { %13338 = vmatpush3.msra.mxu0 %v7304_v10  ;;  %13339 = vmatprep.mubr.msk.f32.mxu0 %vm13789_vm3, %v13788_v22 }
0x13a1   :  { %13325 = vmatmul.mubr.msk.f32.vlgmr.msra.gmra.mxu1 %vm1242_vm4, %v7201_v30  ;;  %13347 = vmatprep.subr.mxu0 %v13788_v22 }
0x13a2   :  { %13333 = vmatpush3.msra.mxu1 %v7303_v11  ;;  %13334 = vmatprep.mubr.msk.f32.mxu1 %vm13789_vm3, %v13788_v22 }
0x13a3   :  { %13342 = vmatprep.subr.mxu1 %v13788_v22 }
0x1453   :  { %v7459_v19 = vpop.f32.mrf.mxu0 }
0x1454   :  { %v7927_v61 = vsel %vm14482_vm6, %v7459_v19, -1e+30 }
0x1455   :  { %v7383_v20 = vpop.f32.mrf.mxu1  ;;  %v13301_v24 = vpop.f32.mrf.mxu0  ;;  %v7937_v26 = vsel %vm1242_vm4, %v7927_v61, -inf }
0x1456   :  { %v7926_v25 = vsel %vm14482_vm6, %v7383_v20, -1e+30  ;;  %7938 = vmax.xlane.f32.xlu1 %v7937_v26 }
0x1457   :  { %v13296_v29 = vpop.f32.mrf.mxu1  ;;  %v7611_v31 = vpop.f32.mrf.mxu0  ;;  %v7934_v27 = vsel %vm1242_vm4, %v7926_v25, -inf }
0x1458   :  { %v7929_v38 = vsel %vm14482_vm6, %v7611_v31, -1e+30  ;;  %7935 = vmax.xlane.f32.xlu0 %v7934_v27 }
0x1459   :  { %v7535_v35 = vpop.f32.mrf.mxu1  ;;  %v13311_v13 = vpop.f32.mrf.mxu0  ;;  %v7943_v12 = vsel %vm1242_vm4, %v7929_v38, -inf }
0x145a   :  { %v7928_v55 = vsel %vm14482_vm6, %v7535_v35, -1e+30  ;;  %7944 = vmax.xlane.f32.xlu1 %v7943_v12 }
0x145b   :  { %v13306_v37 = vpop.f32.mrf.mxu1  ;;  %v7763_v36 = vpop.f32.mrf.mxu0  ;;  %v7940_v54 = vsel %vm1242_vm4, %v7928_v55, -inf }
0x145c   :  { %v7931_v39 = vsel %vm14482_vm6, %v7763_v36, -1e+30  ;;  %7941 = vmax.xlane.f32.xlu0 %v7940_v54 }
0x145d   :  { %v7687_v40 = vpop.f32.mrf.mxu1  ;;  %v13321_v47 = vpop.f32.mrf.mxu0  ;;  %v7949_v44 = vsel %vm1242_vm4, %v7931_v39, -inf }
0x145e   :  { %v7930_v50 = vsel %vm14482_vm6, %v7687_v40, -1e+30  ;;  %7950 = vmax.xlane.f32.xlu1 %v7949_v44 }
0x145f   :  { %v13316_v51 = vpop.f32.mrf.mxu1  ;;  %v7915_v52 = vpop.f32.mrf.mxu0  ;;  %v7946_v49 = vsel %vm1242_vm4, %v7930_v50, -inf }
0x1460   :  { %v7933_v57 = vsel %vm14482_vm6, %v7915_v52, -1e+30  ;;  %7947 = vmax.xlane.f32.xlu0 %v7946_v49 }
0x1461   :  { %v7839_v58 = vpop.f32.mrf.mxu1  ;;  %v13331_v60 = vpop.f32.mrf.mxu0  ;;  %v7955_v63 = vsel %vm1242_vm4, %v7933_v57, -inf }
0x1462   :  { %v7932_v0 = vsel %vm14482_vm6, %v7839_v58, -1e+30  ;;  %7956 = vmax.xlane.f32.xlu1 %v7955_v63 }
0x1463   :  { %v13326_v41 = vpop.f32.mrf.mxu1  ;;  %v7952_v46 = vsel %vm1242_vm4, %v7932_v0, -inf }
0x1464   :  { %7953 = vmax.xlane.f32.xlu0 %v7952_v46 }
0x14df   :  { %v7939_v1 = vpop.xlane.xlu1 %7938 }
0x14e0   :  { %v7959_v2 = vsub.f32 %v7927_v61, %v7939_v1 }
0x14e1   :  { %v7936_v23 = vpop.xlane.xlu0 %7935 }
0x14e2   :  { %v7968_v14 = vmul.f32 1.442695, %v7959_v2  ;;  %v7958_v3 = vsub.f32 %v7926_v25, %v7936_v23 }
0x14e3   :  { %v7945_v4 = vpop.xlane.xlu1 %7944 }
0x14e4   :  { %13683 = vpow2.f32 %v7968_v14  ;;  %v7966_v5 = vmul.f32 1.442695, %v7958_v3  ;;  %v7961_v6 = vsub.f32 %v7929_v38, %v7945_v4  ;;  %v7307_v4 = vadd.f32 %v14439_v48, %v14486_v16 }
0x14e5   :  { %v7942_v34 = vpop.xlane.xlu0 %7941 }
0x14e6   :  { %13685 = vpow2.f32 %v7966_v5  ;;  %v7972_v53 = vmul.f32 1.442695, %v7961_v6  ;;  %v7960_v62 = vsub.f32 %v7928_v55, %v7942_v34 }
0x14e7   :  { %v7951_v8 = vpop.xlane.xlu1 %7950 }
0x14e8   :  { %13687 = vpow2.f32 %v7972_v53  ;;  %v7970_v9 = vmul.f32 1.442695, %v7960_v62  ;;  %v7963_v7 = vsub.f32 %v7931_v39, %v7951_v8  ;;  %v8606_v62 = vld [vmem:[#allocation2 + $0x308] sm:$0xff] }
0x14e9   :  { %v7948_v10 = vpop.xlane.xlu0 %7947 }
0x14ea   :  { %13689 = vpow2.f32 %v7970_v9  ;;  %v7976_v30 = vmul.f32 1.442695, %v7963_v7  ;;  %v7962_v11 = vsub.f32 %v7930_v50, %v7948_v10 }
0x14eb   :  { %v7957_v59 = vpop.xlane.xlu1 %7956 }
0x14ec   :  { %13691 = vpow2.f32 %v7976_v30  ;;  %v7974_v18 = vmul.f32 1.442695, %v7962_v11  ;;  %v7965_v19 = vsub.f32 %v7933_v57, %v7957_v59 }
0x14ed   :  { %v7954_v61 = vpop.xlane.xlu0 %7953 }
0x14ee   :  { %13693 = vpow2.f32 %v7974_v18  ;;  %v7980_v20 = vmul.f32 1.442695, %v7965_v19  ;;  %v7964_v24 = vsub.f32 %v7932_v0, %v7954_v61 }
0x14f0   :  { %13695 = vpow2.f32 %v7980_v20  ;;  %v7978_v26 = vmul.f32 1.442695, %v7964_v24 }
0x14f1   :  { %v13684_v25 = vpop.eup %13683 }
0x14f2   :  { %13697 = vpow2.f32 %v7978_v26  ;;  %v7985_v29 = vsel %vm1242_vm4, %v13684_v25, 0.0 }
0x14f3   :  { %v13686_v31 = vpop.eup %13685  ;;  %7986 = vadd.xlane.f32.xlu1 %v7985_v29 }
0x14f4   :  { %v7982_v27 = vsel %vm1242_vm4, %v13686_v31, 0.0 }
0x14f5   :  { %v13688_v38 = vpop.eup %13687  ;;  %7983 = vadd.xlane.f32.xlu0 %v7982_v27 }
0x14f6   :  { %v7991_v35 = vsel %vm1242_vm4, %v13688_v38, 0.0 }
0x14f7   :  { %v13690_v13 = vpop.eup %13689  ;;  %7992 = vadd.xlane.f32.xlu1 %v7991_v35 }
0x14f8   :  { %v7988_v12 = vsel %vm1242_vm4, %v13690_v13, 0.0 }
0x14f9   :  { %v13692_v55 = vpop.eup %13691  ;;  %7989 = vadd.xlane.f32.xlu0 %v7988_v12 }
0x14fa   :  { %v7997_v37 = vsel %vm1242_vm4, %v13692_v55, 0.0 }
0x14fb   :  { %v13694_v36 = vpop.eup %13693  ;;  %7998 = vadd.xlane.f32.xlu1 %v7997_v37 }
0x14fc   :  { %v7994_v54 = vsel %vm1242_vm4, %v13694_v36, 0.0 }
0x14fd   :  { %v13696_v39 = vpop.eup %13695  ;;  %7995 = vadd.xlane.f32.xlu0 %v7994_v54 }
0x14fe   :  { %v8003_v40 = vsel %vm1242_vm4, %v13696_v39, 0.0 }
0x14ff   :  { %v13698_v47 = vpop.eup %13697  ;;  %8004 = vadd.xlane.f32.xlu1 %v8003_v40 }
0x1500   :  { %v8000_v44 = vsel %vm1242_vm4, %v13698_v47, 0.0 }
0x1501   :  { %8001 = vadd.xlane.f32.xlu0 %v8000_v44 }
0x157c   :  { %v7987_v50 = vpop.xlane.xlu1 %7986 }
0x157d   :  { %13699 = vrcp.f32 %v7987_v50 }
0x157e   :  { %v7984_v51 = vpop.xlane.xlu0 %7983 }
0x157f   :  { %13701 = vrcp.f32 %v7984_v51 }
0x1580   :  { %v7993_v52 = vpop.xlane.xlu1 %7992 }
0x1581   :  { %13703 = vrcp.f32 %v7993_v52 }
0x1582   :  { %v7990_v49 = vpop.xlane.xlu0 %7989 }
0x1583   :  { %13705 = vrcp.f32 %v7990_v49 }
0x1584   :  { %v7999_v57 = vpop.xlane.xlu1 %7998 }
0x1585   :  { %13707 = vrcp.f32 %v7999_v57 }
0x1586   :  { %v7996_v58 = vpop.xlane.xlu0 %7995 }
0x1587   :  { %13709 = vrcp.f32 %v7996_v58 }
0x1588   :  { %v8005_v60 = vpop.xlane.xlu1 %8004 }
0x1589   :  { %13711 = vrcp.f32 %v8005_v60 }
0x158a   :  { %v13700_v63 = vpop.eup %13699  ;;  %v8002_v0 = vpop.xlane.xlu0 %8001 }
0x158b   :  { %13713 = vrcp.f32 %v8002_v0  ;;  %v8015_v41 = vmul.f32 %v13700_v63, %v13684_v25 }
0x158c   :  { %v13702_v46 = vpop.eup %13701 }
0x158d   :  { %13340 = vmatmul.mubr.msk.f32.vlgmr.msra.gmra.mxu0 %vm1242_vm4, %v8015_v41  ;;  %v8014_v1 = vmul.f32 %v13702_v46, %v13686_v31 }
0x158e   :  { %v13704_v2 = vpop.eup %13703  ;;  %13348 = vmatpush3.msra.mxu0 %v14410_v15  ;;  %13349 = vmatprep.mubr.msk.f32.mxu0 %vm13789_vm3, %v13788_v22 }
0x158f   :  { %13335 = vmatmul.mubr.msk.f32.vlgmr.msra.gmra.mxu1 %vm1242_vm4, %v8014_v1  ;;  %13357 = vmatprep.subr.mxu0 %v13788_v22  ;;  %v8017_v23 = vmul.f32 %v13704_v2, %v13688_v38  ;;  %v12369_v38 = vld [vmem:[#allocation2 + $0x328] ss:$0 sm:$0xff] }
0x1590   :  { %v13706_v14 = vpop.eup %13705  ;;  %13343 = vmatpush3.msra.mxu1 %v14418_v45  ;;  %13344 = vmatprep.mubr.msk.f32.mxu1 %vm13789_vm3, %v13788_v22 }
0x1591   :  { %13350 = vmatmul.mubr.msk.f32.vlgmr.msra.gmra.mxu0 %vm1242_vm4, %v8017_v23  ;;  %13352 = vmatprep.subr.mxu1 %v13788_v22  ;;  %v8016_v3 = vmul.f32 %v13706_v14, %v13690_v13 }
0x1592   :  { %v13708_v15 = vpop.eup %13707  ;;  %13358 = vmatpush3.msra.mxu0 %v14452_v21  ;;  %13359 = vmatprep.mubr.msk.f32.mxu0 %vm13789_vm3, %v13788_v22  ;;  %v7309_v21 = vadd.f32 %v14413_v32, %v14479_v17  ;;  %v8693_v32 = vld [vmem:[#allocation2 + $0x310] sm:$0xff]  ;;  %v8861_v17 = vld [vmem:[#allocation2 + $0x320] sm:$0xff] }
0x1593   :  { %13345 = vmatmul.mubr.msk.f32.vlgmr.msra.gmra.mxu1 %vm1242_vm4, %v8016_v3  ;;  %13367 = vmatprep.subr.mxu0 %v13788_v22  ;;  %v8019_v45 = vmul.f32 %v13708_v15, %v13692_v55 }
0x1594   :  { %v13710_v5 = vpop.eup %13709  ;;  %13353 = vmatpush3.msra.mxu1 %v7307_v4  ;;  %13354 = vmatprep.mubr.msk.f32.mxu1 %vm13789_vm3, %v13788_v22 }
0x1595   :  { %13360 = vmatmul.mubr.msk.f32.vlgmr.msra.gmra.mxu0 %vm1242_vm4, %v8019_v45  ;;  %13362 = vmatprep.subr.mxu1 %v13788_v22  ;;  %v8018_v48 = vmul.f32 %v13710_v5, %v13694_v36  ;;  %v8987_v45 = vld [vmem:[#allocation2 + $0x330] sm:$0xff]  ;;  %v9072_v5 = vld [vmem:[#allocation2 + $0x338] sm:$0xff] }
0x1596   :  { %v13712_v16 = vpop.eup %13711  ;;  %13368 = vmatpush3.msra.mxu0 %v14424_v56  ;;  %13369 = vmatprep.mubr.msk.f32.mxu0 %vm13789_vm3, %v13788_v22  ;;  %v8777_v56 = vld [vmem:[#allocation2 + $0x318] sm:$0xff] }
0x1597   :  { %13355 = vmatmul.mubr.msk.f32.vlgmr.msra.gmra.mxu1 %vm1242_vm4, %v8018_v48  ;;  %v8021_v6 = vmul.f32 %v13712_v16, %v13696_v39  ;;  %13377 = vmatprep.subr.mxu0 %v8693_v32  ;;  %v9151_v48 = vld [vmem:[#allocation2 + $0x340] sm:$0xff]  ;;  %v9230_v16 = vld [vmem:[#allocation2 + $0x348] sm:$0xff] }
0x1598   :  { %v13714_v34 = vpop.eup %13713  ;;  %13363 = vmatpush3.msra.mxu1 %v7309_v21  ;;  %13364 = vmatprep.mubr.msk.f32.mxu1 %vm13789_vm3, %v13788_v22 }
0x1599   :  { %13370 = vmatmul.mubr.msk.f32.vlgmr.msra.gmra.mxu0 %vm1242_vm4, %v8021_v6  ;;  %v8020_v53 = vmul.f32 %v13714_v34, %v13698_v47  ;;  %13372 = vmatprep.subr.mxu1 %v8606_v62 }
0x159a   :  { %13378 = vmatpush3.msra.mxu0 %v8693_v32 }
0x159b   :  { %13365 = vmatmul.mubr.msk.f32.vlgmr.msra.gmra.mxu1 %vm1242_vm4, %v8020_v53  ;;  %13387 = vmatprep.subr.mxu0 %v8861_v17 }
0x159c   :  { %13373 = vmatpush3.msra.mxu1 %v8606_v62 }
0x159d   :  { %13382 = vmatprep.subr.mxu1 %v8777_v56 }
0x164d   :  { %v8164_v8 = vpop.f32.mrf.mxu0 }
0x164f   :  { %v8091_v9 = vpop.f32.mrf.mxu1  ;;  %v13341_v7 = vpop.f32.mrf.mxu0 }
0x1650   :  { %13374 = vmatprep.mubr.msk.f32.mxu1 %vm1242_vm4, %v8091_v9 }
0x1651   :  { %v13336_v10 = vpop.f32.mrf.mxu1  ;;  %v8310_v30 = vpop.f32.mrf.mxu0  ;;  %13375 = vmatmul.mubr.msk.f32.vlgmr.msra.gmra.mxu1 %vm1242_vm4, %v8164_v8  ;;  %v12378_v8 = vld [vmem:[#allocation2 + $0x440] ss:$0 sm:$0xff] }
0x1652   :  { %13383 = vmatpush3.msra.mxu1 %v8777_v56 }
0x1653   :  { %v8237_v11 = vpop.f32.mrf.mxu1  ;;  %v13351_v59 = vpop.f32.mrf.mxu0  ;;  %13392 = vmatprep.subr.msk.mxu1 %vm118_vm2, %v8987_v45 }
0x1654   :  { %13379 = vmatprep.mubr.msk.f32.mxu0 %vm1242_vm4, %v8237_v11 }
0x1655   :  { %v13346_v18 = vpop.f32.mrf.mxu1  ;;  %v8456_v19 = vpop.f32.mrf.mxu0  ;;  %13380 = vmatmul.mubr.msk.f32.vlgmr.msra.gmra.mxu0 %vm1242_vm4, %v8310_v30  ;;  %v12379_v30 = vld [vmem:[#allocation2 + $0x448] ss:$0 sm:$0xff] }
0x1656   :  { %13388 = vmatpush3.msra.mxu0 %v8861_v17 }
0x1657   :  { %v8383_v61 = vpop.f32.mrf.mxu1  ;;  %v13361_v20 = vpop.f32.mrf.mxu0  ;;  %13397 = vmatprep.subr.msk.mxu0 %vm118_vm2, %v9072_v5 }
0x1658   :  { %13384 = vmatprep.mubr.msk.f32.mxu1 %vm1242_vm4, %v8383_v61  ;;  %v9388_v61 = vld [vmem:[#allocation2 + $0x358] sm:$0xff]  ;;  %v9467_v20 = vld [vmem:[#allocation2 + $0x360] sm:$0xff] }
0x1659   :  { %v13356_v24 = vpop.f32.mrf.mxu1  ;;  %v8602_v26 = vpop.f32.mrf.mxu0  ;;  %13385 = vmatmul.mubr.msk.f32.vlgmr.msra.gmra.mxu1 %vm1242_vm4, %v8456_v19  ;;  %v9309_v19 = vld [vmem:[#allocation2 + $0x350] sm:$0xff] }
0x165a   :  { %13393 = vmatpush3.xpose.msk.msra.mxu1 %vm118_vm2, %v8987_v45  ;;  %v9546_v24 = vld [vmem:[#allocation2 + $0x368] sm:$0xff] }
0x165b   :  { %v8529_v25 = vpop.f32.mrf.mxu1  ;;  %v13371_v29 = vpop.f32.mrf.mxu0  ;;  %13402 = vmatprep.subr.msk.mxu1 %vm118_vm2, %v9151_v48 }
0x165c   :  { %13389 = vmatprep.mubr.msk.f32.mxu0 %vm1242_vm4, %v8529_v25  ;;  %v9704_v25 = vld [vmem:[#allocation2 + $0x378] sm:$0xff]  ;;  %v9783_v29 = vld [vmem:[#allocation2 + $0x380] sm:$0xff] }
0x165d   :  { %v13366_v31 = vpop.f32.mrf.mxu1  ;;  %13390 = vmatmul.mubr.msk.f32.vlgmr.msra.gmra.mxu0 %vm1242_vm4, %v8602_v26  ;;  %v9625_v26 = vld [vmem:[#allocation2 + $0x370] sm:$0xff] }
0x165e   :  { %13398 = vmatpush3.xpose.msk.msra.mxu0 %vm118_vm2, %v9072_v5  ;;  %v9862_v31 = vld [vmem:[#allocation2 + $0x388] sm:$0xff] }
0x165f   :  { %13407 = vmatprep.subr.msk.mxu0 %vm118_vm2, %v9230_v16 }
0x1711   :  { %v13376_v27 = vpop.f32.mrf.mxu1 }
0x1712   :  { %v8690_v12 = vadd.f32 %v13376_v27, %v12369_v38  ;;  %v12416_v27 = vld.sshfl [vmem:[#allocation2 + $0x390] sm:$0x33 pattern:$0x75316420] }
0x1713   :  { %v8684_v13 = vpop.f32.mrf.mxu1 }
0x1714   :  { %v8685_v36 = vadd.f32 %v12369_v38, %v8684_v13  ;;  %v12417_v38 = vld.sshfl [vmem:[#allocation2 + $0x398] sm:$0x33 pattern:$0x75316420] }
0x1715   :  { %v13381_v35 = vpop.f32.mrf.mxu0 }
0x1716   :  { %v8776_v54 = vadd.f32 %v13381_v35, %v8690_v12  ;;  %v9950_v12 = vcombine.high %v12416_v27, %v12416_v27 }
0x1717   :  { %v8766_v55 = vpop.f32.mrf.mxu0 }
0x1718   :  { %v8775_v40 = vadd.f32 %v8766_v55, %v8685_v36  ;;  %v10019_v55 = vrot.slane %v12417_v38, %v13901_v28 }
0x1719   :  { %v13386_v37 = vpop.f32.mrf.mxu1 }
0x171a   :  { %v8860_v47 = vadd.f32 %v13386_v37, %v8776_v54  ;;  %v10012_v37 = vcombine.high %v12417_v38, %v12417_v38 }
0x171b   :  { %v8850_v39 = vpop.f32.mrf.mxu1 }
0x171c   :  { %v8859_v50 = vadd.f32 %v8850_v39, %v8775_v40  ;;  %v12418_v39 = vld.sshfl [vmem:[#allocation2 + $0x3a0] sm:$0x33 pattern:$0x75316420]  ;;  %v9964_v40 = vrot.slane %v9950_v12, %v13901_v28 }
0x171d   :  { %v13391_v44 = vpop.f32.mrf.mxu0  ;;  %v10073_v45 = vrot.slane %v12418_v39, %v13901_v28 }
0x171e   :  { %v8944_v51 = vadd.f32 %v13391_v44, %v8860_v47 }
0x171f   :  { %v8934_v52 = vpop.f32.mrf.mxu0 }
0x1720   :  { %v8943_v49 = vadd.f32 %v8934_v52, %v8859_v50  ;;  %v8946_v57 = vadd.f32 %v8944_v51, %v14318_v43  ;;  %v10032_v50 = vrot.slane %v10019_v55, %v13905_v33  ;;  %v10026_v51 = vrot.slane %v10012_v37, %v13901_v28 }
0x1722   :  { %v8952_v58 = vsel %vm118_vm2, %v8946_v57, 0.0  ;;  %v8945_v60 = vadd.f32 %v8943_v49, %v14316_v42  ;;  %v10066_v49 = vcombine.high %v12418_v39, %v12418_v39 }
0x1723   :  { %8953 = vadd.xlane.f32.xlu1 %v8952_v58 }
0x1724   :  { %v8949_v63 = vsel %vm118_vm2, %v8945_v60, 0.0 }
0x1725   :  { %8950 = vadd.xlane.f32.xlu0 %v8949_v63 }
0x17ac   :  { %v8954_v0 = vpop.xlane.xlu1 %8953 }
0x17ad   :  { %v8956_v41 = vmul.f32 0.03125, %v8954_v0 }
0x17ae   :  { %v8951_v46 = vpop.xlane.xlu0 %8950 }
0x17af   :  { %v8958_v1 = vsub.f32 %v8946_v57, %v8956_v41  ;;  %v8955_v2 = vmul.f32 0.03125, %v8951_v46 }
0x17b1   :  { %v8957_v23 = vsub.f32 %v8945_v60, %v8955_v2  ;;  %v8960_v14 = vmul.f32 %v8958_v1, %v8958_v1  ;;  %v9974_v60 = vrot.slane %v9964_v40, %v13905_v33  ;;  %v10027_v2 = vcombine.high %v10019_v55, %v10019_v55 }
0x17b3   :  { %v8964_v3 = vsel %vm118_vm2, %v8960_v14, 0.0  ;;  %v8959_v15 = vmul.f32 %v8957_v23, %v8957_v23 }
0x17b4   :  { %8965 = vadd.xlane.f32.xlu1 %v8964_v3  ;;  %v10080_v3 = vrot.slane %v10066_v49, %v13901_v28 }
0x17b5   :  { %v8961_v4 = vsel %vm118_vm2, %v8959_v15, 0.0 }
0x17b6   :  { %8962 = vadd.xlane.f32.xlu0 %v8961_v4 }
0x183d   :  { %v8966_v21 = vpop.xlane.xlu1 %8965 }
0x183e   :  { %v8968_v6 = vmul.f32 0.03125, %v8966_v21  ;;  %v9966_v21 = vcombine.high %v9964_v40, %v9964_v40 }
0x183f   :  { %v8963_v34 = vpop.xlane.xlu0 %8962 }
0x1840   :  { %v8970_v53 = vadd.f32 1e-05, %v8968_v6  ;;  %v8967_v62 = vmul.f32 0.03125, %v8963_v34 }
0x1842   :  { %13715 = vrsqrt.f32 %v8970_v53  ;;  %v8969_v32 = vadd.f32 1e-05, %v8967_v62  ;;  %v10040_v53 = vrot.slane %v10027_v2, %v13905_v33 }
0x1844   :  { %13717 = vrsqrt.f32 %v8969_v32  ;;  %v10028_v32 = vcombine.high %v10026_v51, %v10026_v51 }
0x184f   :  { %v13716_v56 = vpop.eup %13715 }
0x1850   :  { %v8974_v17 = vmul.f32 %v13716_v56, %v8958_v1  ;;  %v10036_v1 = vrot.slane %v10026_v51, %v13905_v33  ;;  %v10081_v56 = vcombine.high %v10073_v45, %v10073_v45 }
0x1851   :  { %v13718_v9 = vpop.eup %13717 }
0x1852   :  { %v8973_v7 = vmul.f32 %v13718_v9, %v8957_v23  ;;  %v8980_v10 = vmul.f32 %v12378_v8, %v8974_v17 }
0x1854   :  { %v8979_v11 = vmul.f32 %v12378_v8, %v8973_v7  ;;  %v14574_v18 = vadd.f32 %v12379_v30, %v8980_v10  ;;  %v10082_v7 = vcombine.high %v10080_v3, %v10080_v3 }
0x1856   :  { %v14572_v59 = vadd.f32 %v12379_v30, %v8979_v11 }
0x1858   :  { %13394 = vmatprep.mubr.msk.f32.mxu1 %vm118_vm2, %v14572_v59  ;;  %13399 = vmatprep.mubr.msk.f32.mxu0 %vm118_vm2, %v14572_v59 }
0x1859   :  { %13395 = vmatmul.mubr.msk.f32.vlgmr.msra.gmra.mxu1 %vm118_vm2, %v14574_v18  ;;  %13400 = vmatmul.mubr.msk.f32.vlgmr.msra.gmra.mxu0 %vm118_vm2, %v14574_v18 }
0x185a   :  { %13403 = vmatpush3.xpose.msk.msra.mxu1 %vm118_vm2, %v9151_v48  ;;  %13404 = vmatprep.mubr.msk.f32.mxu1 %vm118_vm2, %v14572_v59 }
0x185b   :  { %13408 = vmatpush3.xpose.msk.msra.mxu0 %vm118_vm2, %v9230_v16  ;;  %13409 = vmatprep.mubr.msk.f32.mxu0 %vm118_vm2, %v14572_v59 }
0x185c   :  { %13412 = vmatprep.subr.msk.mxu1 %vm118_vm2, %v9309_v19  ;;  %13417 = vmatprep.subr.msk.mxu0 %vm118_vm2, %v9388_v61 }
0x185d   :  { %13405 = vmatmul.mubr.msk.f32.vlgmr.msra.gmra.mxu1 %vm118_vm2, %v14574_v18 }
0x185e   :  { %13410 = vmatmul.mubr.msk.f32.vlgmr.msra.gmra.mxu0 %vm118_vm2, %v14574_v18  ;;  %13413 = vmatpush3.xpose.msk.msra.mxu1 %vm118_vm2, %v9309_v19 }
0x185f   :  { %13414 = vmatprep.mubr.msk.f32.mxu1 %vm118_vm2, %v14316_v42  ;;  %13418 = vmatpush3.xpose.msk.msra.mxu0 %vm118_vm2, %v9388_v61  ;;  %v9982_v61 = vrot.slane %v9966_v21, %v13905_v33 }
0x1860   :  { %13419 = vmatprep.mubr.msk.f32.mxu0 %vm118_vm2, %v14316_v42  ;;  %13422 = vmatprep.subr.msk.mxu1 %vm118_vm2, %v9467_v20 }
0x1861   :  { %13415 = vmatmul.mubr.msk.f32.vlgmr.msra.gmra.mxu1 %vm118_vm2, %v14318_v43  ;;  %13427 = vmatprep.subr.msk.mxu0 %vm118_vm2, %v9546_v24 }
0x1862   :  { %13420 = vmatmul.mubr.msk.f32.vlgmr.msra.gmra.mxu0 %vm118_vm2, %v14318_v43  ;;  %13423 = vmatpush3.xpose.msk.msra.mxu1 %vm118_vm2, %v9467_v20 }
0x1863   :  { %13424 = vmatprep.mubr.msk.f32.mxu1 %vm118_vm2, %v14316_v42  ;;  %13428 = vmatpush3.xpose.msk.msra.mxu0 %vm118_vm2, %v9546_v24 }
0x1864   :  { %13429 = vmatprep.mubr.msk.f32.mxu0 %vm118_vm2, %v14316_v42  ;;  %13432 = vmatprep.subr.msk.mxu1 %vm118_vm2, %v9625_v26 }
0x1865   :  { %13425 = vmatmul.mubr.msk.f32.vlgmr.msra.gmra.mxu1 %vm118_vm2, %v14318_v43  ;;  %13437 = vmatprep.subr.msk.mxu0 %vm118_vm2, %v9704_v25 }
0x1866   :  { %13430 = vmatmul.mubr.msk.f32.vlgmr.msra.gmra.mxu0 %vm118_vm2, %v14318_v43  ;;  %13433 = vmatpush3.xpose.msk.msra.mxu1 %vm118_vm2, %v9625_v26  ;;  %v10044_v26 = vrot.slane %v10028_v32, %v13905_v33 }
0x1867   :  { %13434 = vmatprep.mubr.msk.f32.mxu1 %vm118_vm2, %v14316_v42  ;;  %13438 = vmatpush3.xpose.msk.msra.mxu0 %vm118_vm2, %v9704_v25 }
0x1868   :  { %13439 = vmatprep.mubr.msk.f32.mxu0 %vm118_vm2, %v14316_v42  ;;  %13442 = vmatprep.subr.msk.mxu1 %vm118_vm2, %v9783_v29 }
0x1869   :  { %13435 = vmatmul.mubr.msk.f32.vlgmr.msra.gmra.mxu1 %vm118_vm2, %v14318_v43  ;;  %13447 = vmatprep.subr.msk.mxu0 %vm118_vm2, %v9862_v31 }
0x186a   :  { %13440 = vmatmul.mubr.msk.f32.vlgmr.msra.gmra.mxu0 %vm118_vm2, %v14318_v43  ;;  %13443 = vmatpush3.xpose.msk.msra.mxu1 %vm118_vm2, %v9783_v29  ;;  %v14681_v29 = vrot.slane %v10081_v56, %v13905_v33 }
0x186b   :  { %13444 = vmatprep.mubr.msk.f32.mxu1 %vm118_vm2, %v14316_v42  ;;  %13448 = vmatpush3.xpose.msk.msra.mxu0 %vm118_vm2, %v9862_v31 }
0x186c   :  { %13449 = vmatprep.mubr.msk.f32.mxu0 %vm118_vm2, %v14316_v42  ;;  %13457 = vmatprep.subr.mxu0 %v13788_v22  ;;  %v9957_v42 = vrot.slane %v12416_v27, %v13901_v28  ;;  %v10090_v28 = vrot.slane %v10080_v3, %v13905_v33 }
0x186d   :  { %13445 = vmatmul.mubr.msk.f32.vlgmr.msra.gmra.mxu1 %vm118_vm2, %v14318_v43  ;;  %13452 = vmatprep.subr.mxu1 %v13788_v22 }
0x186e   :  { %13450 = vmatmul.mubr.msk.f32.vlgmr.msra.gmra.mxu0 %vm118_vm2, %v14318_v43  ;;  %13454 = vmatprep.mubr.msk.f32.mxu1 %vm13789_vm3, %v13788_v22  ;;  %v9970_v43 = vrot.slane %v9957_v42, %v13905_v33  ;;  %v9965_v63 = vcombine.high %v9957_v42, %v9957_v42  ;;  %v14687_v42 = vrot.slane %v10082_v7, %v13905_v33 }
0x186f   :  { %13459 = vmatprep.mubr.msk.f32.mxu0 %vm13789_vm3, %v13788_v22 }
0x1870   :  { %v9978_v16 = vrot.slane %v9965_v63, %v13905_v33 }
0x1919   :  { %v13396_v35 = vpop.f32.mrf.mxu1  ;;  %v13401_v13 = vpop.f32.mrf.mxu0 }
0x191a   :  { %v9988_v58 = vadd.f32 %v13396_v35, %v9970_v43  ;;  %v9990_v48 = vadd.f32 %v13401_v13, %v9974_v60 }
0x191b   :  { %v9063_v36 = vpop.f32.mrf.mxu1  ;;  %v9142_v54 = vpop.f32.mrf.mxu0 }
0x191c   :  { %v9987_v23 = vadd.f32 %v9970_v43, %v9063_v36  ;;  %v9996_v5 = vmul.f32 0.35355338, %v9988_v58  ;;  %v9989_v8 = vadd.f32 %v9974_v60, %v9142_v54  ;;  %v9998_v11 = vmul.f32 0.35355338, %v9990_v48 }
0x191d   :  { %v13406_v47 = vpop.f32.mrf.mxu1  ;;  %v10086_v43 = vrot.slane %v10073_v45, %v13905_v33 }
0x191e   :  { %v14652_v44 = vpop.f32.mrf.mxu0  ;;  %v9995_v17 = vmul.f32 0.35355338, %v9987_v23  ;;  %v9992_v19 = vadd.f32 %v13406_v47, %v9978_v16  ;;  %v9997_v31 = vmul.f32 0.35355338, %v9989_v8 }
0x191f   :  { %v9221_v52 = vpop.f32.mrf.mxu1  ;;  %v9994_v37 = vadd.f32 %v14652_v44, %v9982_v61 }
0x1920   :  { %v14656_v57 = vpop.f32.mrf.mxu0  ;;  %v9991_v27 = vadd.f32 %v9978_v16, %v9221_v52  ;;  %v10000_v55 = vmul.f32 0.35355338, %v9992_v19 }
0x1921   :  { %v13416_v0 = vpop.f32.mrf.mxu1  ;;  %v10002_v52 = vmul.f32 0.35355338, %v9994_v37 }
0x1922   :  { %v10050_v41 = vadd.f32 %v13416_v0, %v10032_v50  ;;  %v13421_v46 = vpop.f32.mrf.mxu0  ;;  %v9999_v44 = vmul.f32 0.35355338, %v9991_v27 }
0x1923   :  { %v9379_v14 = vpop.f32.mrf.mxu1  ;;  %v10052_v34 = vadd.f32 %v13421_v46, %v10036_v1 }
0x1924   :  { %v10049_v15 = vadd.f32 %v10032_v50, %v9379_v14  ;;  %v9458_v4 = vpop.f32.mrf.mxu0  ;;  %13458 = vmatpush3.xpose.msk.msra.mxu0 %vm1242_vm4, %v10050_v41  ;;  %v9993_v50 = vadd.f32 %v9982_v61, %v14656_v57 }
0x1925   :  { %v13426_v6 = vpop.f32.mrf.mxu1  ;;  %13467 = vmatprep.subr.mxu0 %v13788_v22  ;;  %v10051_v10 = vadd.f32 %v10036_v1, %v9458_v4 }
0x1926   :  { %v13431_v62 = vpop.f32.mrf.mxu0  ;;  %13453 = vmatpush3.xpose.msk.msra.mxu1 %vm1242_vm4, %v10049_v15  ;;  %v10054_v24 = vadd.f32 %v13426_v6, %v10040_v53  ;;  %v10001_v57 = vmul.f32 0.35355338, %v9993_v50 }
0x1927   :  { %v9537_v9 = vpop.f32.mrf.mxu1  ;;  %13460 = vmatmul.mubr.msk.f32.vlgmr.msra.gmra.mxu0 %vm1242_vm4, %v9996_v5  ;;  %13462 = vmatprep.subr.mxu1 %v13788_v22  ;;  %v10056_v39 = vadd.f32 %v13431_v62, %v10044_v26 }
0x1928   :  { %v9616_v30 = vpop.f32.mrf.mxu0  ;;  %13468 = vmatpush3.xpose.msk.msra.mxu0 %vm1242_vm4, %v10052_v34  ;;  %13469 = vmatprep.mubr.msk.f32.mxu0 %vm13789_vm3, %v13788_v22  ;;  %v10053_v13 = vadd.f32 %v10040_v53, %v9537_v9 }
0x1929   :  { %v13436_v20 = vpop.f32.mrf.mxu1  ;;  %13455 = vmatmul.mubr.msk.f32.vlgmr.msra.gmra.mxu1 %vm1242_vm4, %v9995_v17  ;;  %13477 = vmatprep.subr.mxu0 %v13788_v22  ;;  %v10055_v33 = vadd.f32 %v10044_v26, %v9616_v30 }
0x192a   :  { %v13441_v25 = vpop.f32.mrf.mxu0  ;;  %13463 = vmatpush3.xpose.msk.msra.mxu1 %vm1242_vm4, %v10051_v10  ;;  %13464 = vmatprep.mubr.msk.f32.mxu1 %vm13789_vm3, %v13788_v22  ;;  %v10104_v49 = vadd.f32 %v13436_v20, %v10086_v43 }
0x192b   :  { %v14683_v38 = vadd.f32 %v13441_v25, %v10090_v28  ;;  %v9695_v35 = vpop.f32.mrf.mxu1  ;;  %13470 = vmatmul.mubr.msk.f32.vlgmr.msra.gmra.mxu0 %vm1242_vm4, %v9998_v11  ;;  %13472 = vmatprep.subr.mxu1 %v13788_v22 }
0x192c   :  { %v9774_v12 = vpop.f32.mrf.mxu0  ;;  %13478 = vmatpush3.xpose.msk.msra.mxu0 %vm1242_vm4, %v10054_v24  ;;  %13479 = vmatprep.mubr.msk.f32.mxu0 %vm13789_vm3, %v13788_v22  ;;  %v10103_v58 = vadd.f32 %v10086_v43, %v9695_v35 }
0x192d   :  { %v14694_v36 = vadd.f32 %v10090_v28, %v9774_v12  ;;  %v13446_v54 = vpop.f32.mrf.mxu1  ;;  %13465 = vmatmul.mubr.msk.f32.vlgmr.msra.gmra.mxu1 %vm1242_vm4, %v9997_v31  ;;  %13487 = vmatprep.subr.mxu0 %v13788_v22 }
0x192e   :  { %v14700_v40 = vadd.f32 %v13446_v54, %v14681_v29  ;;  %v13451_v47 = vpop.f32.mrf.mxu0  ;;  %13473 = vmatpush3.xpose.msk.msra.mxu1 %vm1242_vm4, %v10053_v13  ;;  %13474 = vmatprep.mubr.msk.f32.mxu1 %vm13789_vm3, %v13788_v22 }
0x192f   :  { %v14707_v51 = vadd.f32 %v13451_v47, %v14687_v42  ;;  %13480 = vmatmul.mubr.msk.f32.vlgmr.msra.gmra.mxu0 %vm1242_vm4, %v10000_v55  ;;  %13482 = vmatprep.subr.mxu1 %v13788_v22  ;;  %v14730_v63 = vpop.f32.mrf.mxu1 }
0x1930   :  { %13488 = vmatpush3.xpose.msk.msra.mxu0 %vm1242_vm4, %v10056_v39  ;;  %13489 = vmatprep.mubr.msk.f32.mxu0 %vm13789_vm3, %v13788_v22  ;;  %v14728_v60 = vpop.f32.mrf.mxu0 }
0x1931   :  { %13475 = vmatmul.mubr.msk.f32.vlgmr.msra.gmra.mxu1 %vm1242_vm4, %v9999_v44  ;;  %13497 = vmatprep.subr.mxu0 %v13788_v22 }
0x1932   :  { %13483 = vmatpush3.xpose.msk.msra.mxu1 %vm1242_vm4, %v10055_v33  ;;  %13484 = vmatprep.mubr.msk.f32.mxu1 %vm13789_vm3, %v13788_v22 }
0x1933   :  { %13490 = vmatmul.mubr.msk.f32.vlgmr.msra.gmra.mxu0 %vm1242_vm4, %v10002_v52  ;;  %13492 = vmatprep.subr.mxu1 %v13788_v22 }
0x1934   :  { %13498 = vmatpush3.msra.mxu0 %v10104_v49  ;;  %13499 = vmatprep.mubr.msk.f32.mxu0 %vm13789_vm3, %v13788_v22 }
0x1935   :  { %13485 = vmatmul.mubr.msk.f32.vlgmr.msra.gmra.mxu1 %vm1242_vm4, %v10001_v57  ;;  %13507 = vmatprep.subr.mxu0 %v13788_v22 }
0x1936   :  { %13493 = vmatpush3.msra.mxu1 %v10103_v58  ;;  %13494 = vmatprep.mubr.msk.f32.mxu1 %vm13789_vm3, %v13788_v22 }
0x1937   :  { %13502 = vmatprep.subr.mxu1 %v13788_v22 }
0x19e7   :  { %v10259_v0 = vpop.f32.mrf.mxu0 }
0x19e8   :  { %v10722_v41 = vsel %vm1242_vm4, %v10259_v0, -inf }
0x19e9   :  { %10723 = vmax.xlane.f32.xlu1 %v10722_v41  ;;  %v10183_v46 = vpop.f32.mrf.mxu1  ;;  %v13461_v1 = vpop.f32.mrf.mxu0 }
0x19ea   :  { %v10719_v2 = vsel %vm1242_vm4, %v10183_v46, -inf }
0x19eb   :  { %v10411_v23 = vpop.f32.mrf.mxu0  ;;  %10720 = vmax.xlane.f32.xlu0 %v10719_v2  ;;  %v13456_v14 = vpop.f32.mrf.mxu1 }
0x19ec   :  { %v10728_v3 = vsel %vm1242_vm4, %v10411_v23, -inf }
0x19ed   :  { %10729 = vmax.xlane.f32.xlu1 %v10728_v3  ;;  %v10335_v15 = vpop.f32.mrf.mxu1  ;;  %v13471_v4 = vpop.f32.mrf.mxu0 }
0x19ee   :  { %v10725_v45 = vsel %vm1242_vm4, %v10335_v15, -inf }
0x19ef   :  { %v10563_v5 = vpop.f32.mrf.mxu0  ;;  %10726 = vmax.xlane.f32.xlu0 %v10725_v45  ;;  %v13466_v48 = vpop.f32.mrf.mxu1 }
0x19f0   :  { %v10734_v16 = vsel %vm1242_vm4, %v10563_v5, -inf }
0x19f1   :  { %10735 = vmax.xlane.f32.xlu1 %v10734_v16  ;;  %v10487_v21 = vpop.f32.mrf.mxu1  ;;  %v13481_v6 = vpop.f32.mrf.mxu0 }
0x19f2   :  { %v10731_v34 = vsel %vm1242_vm4, %v10487_v21, -inf }
0x19f3   :  { %v10715_v53 = vpop.f32.mrf.mxu0  ;;  %10732 = vmax.xlane.f32.xlu0 %v10731_v34  ;;  %v13476_v62 = vpop.f32.mrf.mxu1 }
0x19f4   :  { %v10740_v32 = vsel %vm1242_vm4, %v10715_v53, -inf }
0x19f5   :  { %10741 = vmax.xlane.f32.xlu1 %v10740_v32  ;;  %v10639_v56 = vpop.f32.mrf.mxu1  ;;  %v13491_v17 = vpop.f32.mrf.mxu0 }
0x19f6   :  { %v10737_v8 = vsel %vm1242_vm4, %v10639_v56, -inf }
0x19f7   :  { %10738 = vmax.xlane.f32.xlu0 %v10737_v8  ;;  %v13486_v9 = vpop.f32.mrf.mxu1 }
0x1a72   :  { %v10724_v28 = vpop.xlane.xlu1 %10723 }
0x1a73   :  { %v10744_v7 = vsub.f32 %v10259_v0, %v10724_v28 }
0x1a74   :  { %v10721_v10 = vpop.xlane.xlu0 %10720 }
0x1a75   :  { %v10753_v30 = vmul.f32 1.442695, %v10744_v7  ;;  %v10743_v11 = vsub.f32 %v10183_v46, %v10721_v10 }
0x1a76   :  { %v10730_v19 = vpop.xlane.xlu1 %10729 }
0x1a77   :  { %13719 = vpow2.f32 %v10753_v30  ;;  %v10751_v61 = vmul.f32 1.442695, %v10743_v11  ;;  %v10746_v20 = vsub.f32 %v10411_v23, %v10730_v19  ;;  %v10107_v30 = vadd.f32 %v14681_v29, %v14730_v63 }
0x1a78   :  { %v10727_v24 = vpop.xlane.xlu0 %10726 }
0x1a79   :  { %13721 = vpow2.f32 %v10751_v61  ;;  %v10757_v26 = vmul.f32 1.442695, %v10746_v20  ;;  %v10745_v25 = vsub.f32 %v10335_v15, %v10727_v24  ;;  %v11391_v24 = vld [vmem:[#allocation2 + $0x3a8] sm:$0xff] }
0x1a7a   :  { %v10736_v31 = vpop.xlane.xlu1 %10735 }
0x1a7b   :  { %13723 = vpow2.f32 %v10757_v26  ;;  %v10755_v27 = vmul.f32 1.442695, %v10745_v25  ;;  %v10748_v35 = vsub.f32 %v10563_v5, %v10736_v31 }
0x1a7c   :  { %v10733_v13 = vpop.xlane.xlu0 %10732 }
0x1a7d   :  { %13725 = vpow2.f32 %v10755_v27  ;;  %v10761_v12 = vmul.f32 1.442695, %v10748_v35  ;;  %v10747_v55 = vsub.f32 %v10487_v21, %v10733_v13 }
0x1a7e   :  { %v10742_v37 = vpop.xlane.xlu1 %10741 }
0x1a7f   :  { %13727 = vpow2.f32 %v10761_v12  ;;  %v10759_v54 = vmul.f32 1.442695, %v10747_v55  ;;  %v10750_v39 = vsub.f32 %v10715_v53, %v10742_v37 }
0x1a80   :  { %v10739_v43 = vpop.xlane.xlu0 %10738 }
0x1a81   :  { %13729 = vpow2.f32 %v10759_v54  ;;  %v10765_v47 = vmul.f32 1.442695, %v10750_v39  ;;  %v10749_v44 = vsub.f32 %v10639_v56, %v10739_v43 }
0x1a83   :  { %13731 = vpow2.f32 %v10765_v47  ;;  %v10763_v50 = vmul.f32 1.442695, %v10749_v44 }
0x1a84   :  { %v13720_v33 = vpop.eup %13719 }
0x1a85   :  { %13733 = vpow2.f32 %v10763_v50  ;;  %v10770_v52 = vsel %vm1242_vm4, %v13720_v33, 0.0 }
0x1a86   :  { %v13722_v49 = vpop.eup %13721  ;;  %10771 = vadd.xlane.f32.xlu1 %v10770_v52  ;;  %v12443_v52 = vld [vmem:[#allocation2 + $0x3c8] ss:$0 sm:$0xff] }
0x1a87   :  { %v10767_v57 = vsel %vm1242_vm4, %v13722_v49, 0.0 }
0x1a88   :  { %v13724_v58 = vpop.eup %13723  ;;  %10768 = vadd.xlane.f32.xlu0 %v10767_v57 }
0x1a89   :  { %v10776_v0 = vsel %vm1242_vm4, %v13724_v58, 0.0 }
0x1a8a   :  { %v13726_v41 = vpop.eup %13725  ;;  %10777 = vadd.xlane.f32.xlu1 %v10776_v0 }
0x1a8b   :  { %v10773_v46 = vsel %vm1242_vm4, %v13726_v41, 0.0 }
0x1a8c   :  { %v13728_v1 = vpop.eup %13727  ;;  %10774 = vadd.xlane.f32.xlu0 %v10773_v46 }
0x1a8d   :  { %v10782_v2 = vsel %vm1242_vm4, %v13728_v1, 0.0 }
0x1a8e   :  { %v13730_v23 = vpop.eup %13729  ;;  %10783 = vadd.xlane.f32.xlu1 %v10782_v2 }
0x1a8f   :  { %v10779_v14 = vsel %vm1242_vm4, %v13730_v23, 0.0 }
0x1a90   :  { %v13732_v3 = vpop.eup %13731  ;;  %10780 = vadd.xlane.f32.xlu0 %v10779_v14 }
0x1a91   :  { %v10788_v15 = vsel %vm1242_vm4, %v13732_v3, 0.0 }
0x1a92   :  { %v13734_v4 = vpop.eup %13733  ;;  %10789 = vadd.xlane.f32.xlu1 %v10788_v15 }
0x1a93   :  { %v10785_v45 = vsel %vm1242_vm4, %v13734_v4, 0.0 }
0x1a94   :  { %10786 = vadd.xlane.f32.xlu0 %v10785_v45 }
0x1b0f   :  { %v10772_v5 = vpop.xlane.xlu1 %10771 }
0x1b10   :  { %13735 = vrcp.f32 %v10772_v5 }
0x1b11   :  { %v10769_v48 = vpop.xlane.xlu0 %10768 }
0x1b12   :  { %13737 = vrcp.f32 %v10769_v48 }
0x1b13   :  { %v10778_v16 = vpop.xlane.xlu1 %10777 }
0x1b14   :  { %13739 = vrcp.f32 %v10778_v16 }
0x1b15   :  { %v10775_v21 = vpop.xlane.xlu0 %10774 }
0x1b16   :  { %13741 = vrcp.f32 %v10775_v21 }
0x1b17   :  { %v10784_v6 = vpop.xlane.xlu1 %10783 }
0x1b18   :  { %13743 = vrcp.f32 %v10784_v6 }
0x1b19   :  { %v10781_v34 = vpop.xlane.xlu0 %10780 }
0x1b1a   :  { %13745 = vrcp.f32 %v10781_v34 }
0x1b1b   :  { %v10790_v53 = vpop.xlane.xlu1 %10789 }
0x1b1c   :  { %13747 = vrcp.f32 %v10790_v53 }
0x1b1d   :  { %v13736_v62 = vpop.eup %13735  ;;  %v10787_v32 = vpop.xlane.xlu0 %10786 }
0x1b1e   :  { %v10800_v56 = vmul.f32 %v13736_v62, %v13720_v33  ;;  %13749 = vrcp.f32 %v10787_v32 }
0x1b1f   :  { %v13738_v17 = vpop.eup %13737 }
0x1b20   :  { %v10799_v8 = vmul.f32 %v13738_v17, %v13722_v49  ;;  %13500 = vmatmul.mubr.msk.f32.vlgmr.msra.gmra.mxu0 %vm1242_vm4, %v10800_v56 }
0x1b21   :  { %v13740_v9 = vpop.eup %13739  ;;  %13508 = vmatpush3.msra.mxu0 %v14683_v38  ;;  %13509 = vmatprep.mubr.msk.f32.mxu0 %vm13789_vm3, %v13788_v22 }
0x1b22   :  { %v10802_v28 = vmul.f32 %v13740_v9, %v13724_v58  ;;  %13495 = vmatmul.mubr.msk.f32.vlgmr.msra.gmra.mxu1 %vm1242_vm4, %v10799_v8  ;;  %13517 = vmatprep.subr.mxu0 %v13788_v22 }
0x1b23   :  { %v13742_v7 = vpop.eup %13741  ;;  %13503 = vmatpush3.msra.mxu1 %v14694_v36  ;;  %13504 = vmatprep.mubr.msk.f32.mxu1 %vm13789_vm3, %v13788_v22 }
0x1b24   :  { %v10801_v10 = vmul.f32 %v13742_v7, %v13726_v41  ;;  %13510 = vmatmul.mubr.msk.f32.vlgmr.msra.gmra.mxu0 %vm1242_vm4, %v10802_v28  ;;  %13512 = vmatprep.subr.mxu1 %v13788_v22  ;;  %v11775_v7 = vld [vmem:[#allocation2 + $0x3e8] sm:$0xff] }
0x1b25   :  { %v13744_v38 = vpop.eup %13743  ;;  %13518 = vmatpush3.msra.mxu0 %v14700_v40  ;;  %13519 = vmatprep.mubr.msk.f32.mxu0 %vm13789_vm3, %v13788_v22  ;;  %v10109_v40 = vadd.f32 %v14687_v42, %v14728_v60  ;;  %v11478_v42 = vld [vmem:[#allocation2 + $0x3b0] sm:$0xff]  ;;  %v11646_v60 = vld [vmem:[#allocation2 + $0x3c0] sm:$0xff] }
0x1b26   :  { %v10804_v11 = vmul.f32 %v13744_v38, %v13728_v1  ;;  %13505 = vmatmul.mubr.msk.f32.vlgmr.msra.gmra.mxu1 %vm1242_vm4, %v10801_v10  ;;  %13527 = vmatprep.subr.mxu0 %v13788_v22  ;;  %v11773_v10 = vld [vmem:[#allocation2 + $0x3d8] sm:$0xff]  ;;  %v11772_v38 = vld [vmem:[#allocation2 + $0x3d0] sm:$0xff] }
0x1b27   :  { %v13746_v36 = vpop.eup %13745  ;;  %13513 = vmatpush3.msra.mxu1 %v10107_v30  ;;  %13514 = vmatprep.mubr.msk.f32.mxu1 %vm13789_vm3, %v13788_v22  ;;  %v11871_v30 = vld [vmem:[#allocation2 + $0x430] sm:$0xff] }
0x1b28   :  { %v10803_v19 = vmul.f32 %v13746_v36, %v13730_v23  ;;  %13520 = vmatmul.mubr.msk.f32.vlgmr.msra.gmra.mxu0 %vm1242_vm4, %v10804_v11  ;;  %13522 = vmatprep.subr.mxu1 %v13788_v22  ;;  %v11870_v11 = vld [vmem:[#allocation2 + $0x428] sm:$0xff]  ;;  %v11869_v36 = vld [vmem:[#allocation2 + $0x420] sm:$0xff] }
0x1b29   :  { %v13748_v29 = vpop.eup %13747  ;;  %13528 = vmatpush3.msra.mxu0 %v14707_v51  ;;  %13529 = vmatprep.mubr.msk.f32.mxu0 %vm13789_vm3, %v13788_v22  ;;  %v11562_v51 = vld [vmem:[#allocation2 + $0x3b8] sm:$0xff] }
0x1b2a   :  { %v10806_v63 = vmul.f32 %v13748_v29, %v13732_v3  ;;  %13515 = vmatmul.mubr.msk.f32.vlgmr.msra.gmra.mxu1 %vm1242_vm4, %v10803_v19  ;;  %13537 = vmatprep.subr.mxu0 %v11478_v42  ;;  %v11868_v19 = vld [vmem:[#allocation2 + $0x418] sm:$0xff] }
0x1b2b   :  { %v13750_v61 = vpop.eup %13749  ;;  %13523 = vmatpush3.msra.mxu1 %v10109_v40  ;;  %13524 = vmatprep.mubr.msk.f32.mxu1 %vm13789_vm3, %v13788_v22 }
0x1b2c   :  { %v10805_v20 = vmul.f32 %v13750_v61, %v13734_v4  ;;  %13530 = vmatmul.mubr.msk.f32.vlgmr.msra.gmra.mxu0 %vm1242_vm4, %v10806_v63  ;;  %13532 = vmatprep.subr.mxu1 %v11391_v24 }
0x1b2d   :  { %13538 = vmatpush3.msra.mxu0 %v11478_v42 }
0x1b2e   :  { %13525 = vmatmul.mubr.msk.f32.vlgmr.msra.gmra.mxu1 %vm1242_vm4, %v10805_v20  ;;  %13547 = vmatprep.subr.mxu0 %v11646_v60 }
0x1b2f   :  { %13533 = vmatpush3.msra.mxu1 %v11391_v24 }
0x1b30   :  { %13542 = vmatprep.subr.mxu1 %v11562_v51 }
0x1be0   :  { %v10949_v26 = vpop.f32.mrf.mxu0 }
0x1be2   :  { %v10876_v25 = vpop.f32.mrf.mxu1  ;;  %v13501_v31 = vpop.f32.mrf.mxu0 }
0x1be3   :  { %13534 = vmatprep.mubr.msk.f32.mxu1 %vm1242_vm4, %v10876_v25 }
0x1be4   :  { %v13496_v22 = vpop.f32.mrf.mxu1  ;;  %v11095_v27 = vpop.f32.mrf.mxu0  ;;  %13535 = vmatmul.mubr.msk.f32.vlgmr.msra.gmra.mxu1 %vm1242_vm4, %v10949_v26 }
0x1be5   :  { %13543 = vmatpush3.msra.mxu1 %v11562_v51  ;;  %v12452_v51 = vld [vmem:[#allocation2 + $0x450] ss:$0 sm:$0xff]  ;;  %v12453_v22 = vld [vmem:[#allocation2 + $0x458] ss:$0 sm:$0xff] }
0x1be6   :  { %v11022_v35 = vpop.f32.mrf.mxu1  ;;  %v13511_v13 = vpop.f32.mrf.mxu0  ;;  %13552 = vmatprep.subr.mxu1 %v11775_v7 }
0x1be7   :  { %13539 = vmatprep.mubr.msk.f32.mxu0 %vm1242_vm4, %v11022_v35 }
0x1be8   :  { %v13506_v12 = vpop.f32.mrf.mxu1  ;;  %v11241_v55 = vpop.f32.mrf.mxu0  ;;  %13540 = vmatmul.mubr.msk.f32.vlgmr.msra.gmra.mxu0 %vm1242_vm4, %v11095_v27 }
0x1be9   :  { %13548 = vmatpush3.msra.mxu0 %v11646_v60  ;;  %v11867_v12 = vld [vmem:[#allocation2 + $0x410] sm:$0xff] }
0x1bea   :  { %v11168_v37 = vpop.f32.mrf.mxu1  ;;  %v13521_v54 = vpop.f32.mrf.mxu0  ;;  %13563 = vmatprep.subr.mxu0 %v11871_v30 }
0x1beb   :  { %13544 = vmatprep.mubr.msk.f32.mxu1 %vm1242_vm4, %v11168_v37  ;;  %v11865_v37 = vld [vmem:[#allocation2 + $0x400] sm:$0xff]  ;;  %v11864_v54 = vld [vmem:[#allocation2 + $0x3f8] sm:$0xff] }
0x1bec   :  { %v13516_v39 = vpop.f32.mrf.mxu1  ;;  %v11387_v43 = vpop.f32.mrf.mxu0  ;;  %13545 = vmatmul.mubr.msk.f32.vlgmr.msra.gmra.mxu1 %vm1242_vm4, %v11241_v55  ;;  %v11866_v55 = vld [vmem:[#allocation2 + $0x408] sm:$0xff] }
0x1bed   :  { %13553 = vmatpush3.msra.mxu1 %v11775_v7  ;;  %v12454_v39 = vld [vmem:[#allocation2 + $0x3f0] ss:$0 sm:$0xff]  ;;  %v12461_v7 = vld [vmem:[#allocation2 + $0x468] ss:$0 sm:$0xff] }
0x1bee   :  { %v11314_v47 = vpop.f32.mrf.mxu1  ;;  %v13531_v44 = vpop.f32.mrf.mxu0 }
0x1bef   :  { %13549 = vmatprep.mubr.msk.f32.mxu0 %vm1242_vm4, %v11314_v47 }
0x1bf0   :  { %v13526_v50 = vpop.f32.mrf.mxu1  ;;  %13550 = vmatmul.mubr.msk.f32.vlgmr.msra.gmra.mxu0 %vm1242_vm4, %v11387_v43 }
0x1bf1   :  { %13564 = vmatpush3.msra.mxu0 %v11871_v30 }
0x1bf2   :  { %13565 = vmatprep.subr.mxu0 %v11870_v11 }
0x1bf3   :  { %13566 = vmatpush3.msra.mxu0 %v11870_v11 }
0x1bf4   :  { %13567 = vmatprep.subr.mxu0 %v11869_v36 }
0x1bf5   :  { %13568 = vmatpush3.msra.mxu0 %v11869_v36 }
0x1bf6   :  { %13569 = vmatprep.subr.mxu0 %v11868_v19 }
0x1bf7   :  { %13570 = vmatpush3.msra.mxu0 %v11868_v19 }
0x1bf8   :  { %13571 = vmatprep.subr.mxu0 %v11867_v12 }
0x1bf9   :  { %13572 = vmatpush3.msra.mxu0 %v11867_v12 }
0x1bfa   :  { %13573 = vmatprep.subr.mxu0 %v11866_v55 }
0x1bfb   :  { %13574 = vmatpush3.msra.mxu0 %v11866_v55 }
0x1bfc   :  { %13575 = vmatprep.subr.mxu0 %v11865_v37 }
0x1bfd   :  { %13576 = vmatpush3.msra.mxu0 %v11865_v37 }
0x1bfe   :  { %13577 = vmatprep.subr.mxu0 %v11864_v54 }
0x1bff   :  { %13578 = vmatpush3.msra.mxu0 %v11864_v54 }
0x1ca4   :  { %v13536_v33 = vpop.f32.mrf.mxu1 }
0x1ca5   :  { %v11475_v58 = vadd.f32 %v13536_v33, %v12443_v52 }
0x1ca6   :  { %v11469_v57 = vpop.f32.mrf.mxu1 }
0x1ca7   :  { %v11470_v46 = vadd.f32 %v12443_v52, %v11469_v57 }
0x1ca8   :  { %v13541_v49 = vpop.f32.mrf.mxu0 }
0x1ca9   :  { %v11561_v1 = vadd.f32 %v13541_v49, %v11475_v58  ;;  %v12457_v49 = vld [vmem:[#allocation2 + $0x438] ss:$0 sm:$0xff] }
0x1caa   :  { %v11551_v0 = vpop.f32.mrf.mxu0 }
0x1cab   :  { %v11560_v23 = vadd.f32 %v11551_v0, %v11470_v46 }
0x1cac   :  { %v13546_v41 = vpop.f32.mrf.mxu1 }
0x1cad   :  { %v11645_v14 = vadd.f32 %v13546_v41, %v11561_v1 }
0x1cae   :  { %v11635_v2 = vpop.f32.mrf.mxu1 }
0x1caf   :  { %v11644_v15 = vadd.f32 %v11635_v2, %v11560_v23 }
0x1cb0   :  { %v13551_v3 = vpop.f32.mrf.mxu0 }
0x1cb1   :  { %v11729_v4 = vadd.f32 %v13551_v3, %v11645_v14 }
0x1cb2   :  { %v11719_v45 = vpop.f32.mrf.mxu0 }
0x1cb3   :  { %v11728_v5 = vadd.f32 %v11719_v45, %v11644_v15  ;;  %v11731_v48 = vadd.f32 %v11729_v4, %v14574_v18 }
0x1cb5   :  { %v11737_v16 = vsel %vm118_vm2, %v11731_v48, 0.0  ;;  %v11730_v21 = vadd.f32 %v11728_v5, %v14572_v59  ;;  %v11774_v59 = vld [vmem:[#allocation2 + $0x3e0] sm:$0xff] }
0x1cb6   :  { %11738 = vadd.xlane.f32.xlu1 %v11737_v16  ;;  %13554 = vmatprep.subr.mxu1 %v11774_v59 }
0x1cb7   :  { %v11734_v6 = vsel %vm118_vm2, %v11730_v21, 0.0  ;;  %13555 = vmatpush3.msra.mxu1 %v11774_v59 }
0x1cb8   :  { %11735 = vadd.xlane.f32.xlu0 %v11734_v6  ;;  %13556 = vmatprep.subr.mxu1 %v11773_v10 }
0x1cb9   :  { %13557 = vmatpush3.msra.mxu1 %v11773_v10 }
0x1cba   :  { %13558 = vmatprep.subr.mxu1 %v11772_v38 }
0x1cbb   :  { %13559 = vmatpush3.msra.mxu1 %v11772_v38 }
0x1d3f   :  { %v11739_v34 = vpop.xlane.xlu1 %11738 }
0x1d40   :  { %v11741_v53 = vmul.f32 0.03125, %v11739_v34 }
0x1d41   :  { %v11736_v62 = vpop.xlane.xlu0 %11735 }
0x1d42   :  { %v11743_v32 = vsub.f32 %v11731_v48, %v11741_v53  ;;  %v11740_v56 = vmul.f32 0.03125, %v11736_v62 }
0x1d44   :  { %v11742_v17 = vsub.f32 %v11730_v21, %v11740_v56  ;;  %v11745_v8 = vmul.f32 %v11743_v32, %v11743_v32 }
0x1d46   :  { %v11749_v9 = vsel %vm118_vm2, %v11745_v8, 0.0  ;;  %v11744_v28 = vmul.f32 %v11742_v17, %v11742_v17 }
0x1d47   :  { %11750 = vadd.xlane.f32.xlu1 %v11749_v9  ;;  %v12460_v9 = vld [vmem:[#allocation2 + $0x460] ss:$0 sm:$0xff] }
0x1d48   :  { %v11746_v18 = vsel %vm118_vm2, %v11744_v28, 0.0 }
0x1d49   :  { %11747 = vadd.xlane.f32.xlu0 %v11746_v18 }
0x1dd0   :  { %v11751_v29 = vpop.xlane.xlu1 %11750 }
0x1dd1   :  { %v11753_v40 = vmul.f32 0.03125, %v11751_v29 }
0x1dd2   :  { %v11748_v63 = vpop.xlane.xlu0 %11747 }
0x1dd3   :  { %v11755_v61 = vadd.f32 1e-05, %v11753_v40  ;;  %v11752_v20 = vmul.f32 0.03125, %v11748_v63 }
0x1dd5   :  { %13751 = vrsqrt.f32 %v11755_v61  ;;  %v11754_v24 = vadd.f32 1e-05, %v11752_v20 }
0x1dd7   :  { %13753 = vrsqrt.f32 %v11754_v24 }
0x1de2   :  { %v13752_v42 = vpop.eup %13751 }
0x1de3   :  { %v11759_v60 = vmul.f32 %v13752_v42, %v11743_v32 }
0x1de4   :  { %v13754_v26 = vpop.eup %13753 }
0x1de5   :  { %v11758_v25 = vmul.f32 %v13754_v26, %v11742_v17  ;;  %v11765_v31 = vmul.f32 %v12452_v51, %v11759_v60 }
0x1de7   :  { %v11764_v27 = vmul.f32 %v12452_v51, %v11758_v25  ;;  %v11771_v13 = vadd.f32 %v12453_v22, %v11765_v31  ;;  %v12043_v25 = vld [vmem:[#allocation2 + $0x498] sm:$0xff]  ;;  %v12042_v31 = vld [vmem:[#allocation2 + $0x490] sm:$0xff] }
0x1de8   :  { %13582 = vmatprep.subr.mxu1 %v12043_v25 }
0x1de9   :  { %v11770_v35 = vadd.f32 %v12453_v22, %v11764_v27  ;;  %v12041_v22 = vld [vmem:[#allocation2 + $0x488] sm:$0xff]  ;;  %v12040_v27 = vld [vmem:[#allocation2 + $0x480] sm:$0xff] }
0x1deb   :  { %13560 = vmatprep.mubr.msk.f32.mxu1 %vm118_vm2, %v11770_v35 }
0x1dec   :  { %13561 = vmatmul.mubr.msk.f32.vlgmr.msra.gmra.mxu1 %vm118_vm2, %v11771_v13 }
0x1ded   :  { %13583 = vmatpush3.msra.mxu1 %v12043_v25 }
0x1dee   :  { %13584 = vmatprep.subr.mxu1 %v12042_v31 }
0x1def   :  { %13585 = vmatpush3.msra.mxu1 %v12042_v31 }
0x1df0   :  { %13586 = vmatprep.subr.mxu1 %v12041_v22 }
0x1df1   :  { %13587 = vmatpush3.msra.mxu1 %v12041_v22 }
0x1df2   :  { %13588 = vmatprep.subr.mxu1 %v12040_v27 }
0x1df3   :  { %13589 = vmatpush3.msra.mxu1 %v12040_v27 }
0x1eac   :  { %v13562_v43 = vpop.f32.mrf.mxu1 }
0x1ead   :  { %v11859_v47 = vadd.f32 %v13562_v43, %v12454_v39  ;;  %v12462_v43 = vld [vmem:[#allocation2 + $0x470] ss:$0 sm:$0xff] }
0x1eae   :  { %v11853_v44 = vpop.f32.mrf.mxu1 }
0x1eaf   :  { %v11854_v50 = vadd.f32 %v12454_v39, %v11853_v44  ;;  %v11863_v52 = vmax.f32 %v11859_v47, 0.0 }
0x1eb1   :  { %v11862_v33 = vmax.f32 %v11854_v50, 0.0 }
0x1eb3   :  { %13579 = vmatprep.mubr.msk.f32.mxu0 %vm3010_vm5, %v11862_v33 }
0x1eb4   :  { %13580 = vmatmul.mubr.msk.f32.vlgmr.msra.gmra.mxu0 %vm3010_vm5, %v11863_v52  ;;  %v12463_v52 = vld [vmem:[#allocation2 + $0x478] ss:$0 sm:$0xff] }
0x1f74   :  { %v13581_v57 = vpop.f32.mrf.mxu0 }
0x1f75   :  { %v11955_v58 = vadd.f32 %v13581_v57, %v12457_v49 }
0x1f76   :  { %v11949_v0 = vpop.f32.mrf.mxu0 }
0x1f77   :  { %v11950_v41 = vadd.f32 %v12457_v49, %v11949_v0  ;;  %v11959_v46 = vadd.f32 %v11955_v58, %v11771_v13  ;;  %v12464_v0 = vld [vmem:[#allocation2 + $0x4a0] ss:$0 sm:$0xff] }
0x1f79   :  { %v11965_v1 = vsel %vm118_vm2, %v11959_v46, 0.0  ;;  %v11958_v2 = vadd.f32 %v11950_v41, %v11770_v35 }
0x1f7a   :  { %11966 = vadd.xlane.f32.xlu1 %v11965_v1 }
0x1f7b   :  { %v11962_v23 = vsel %vm118_vm2, %v11958_v2, 0.0 }
0x1f7c   :  { %11963 = vadd.xlane.f32.xlu0 %v11962_v23 }
0x2003   :  { %v11967_v14 = vpop.xlane.xlu1 %11966 }
0x2004   :  { %v11969_v3 = vmul.f32 0.03125, %v11967_v14 }
0x2005   :  { %v11964_v15 = vpop.xlane.xlu0 %11963 }
0x2006   :  { %v11971_v4 = vsub.f32 %v11959_v46, %v11969_v3  ;;  %v11968_v45 = vmul.f32 0.03125, %v11964_v15 }
0x2008   :  { %v11970_v5 = vsub.f32 %v11958_v2, %v11968_v45  ;;  %v11973_v48 = vmul.f32 %v11971_v4, %v11971_v4 }
0x200a   :  { %v11977_v16 = vsel %vm118_vm2, %v11973_v48, 0.0  ;;  %v11972_v21 = vmul.f32 %v11970_v5, %v11970_v5 }
0x200b   :  { %11978 = vadd.xlane.f32.xlu1 %v11977_v16 }
0x200c   :  { %v11974_v6 = vsel %vm118_vm2, %v11972_v21, 0.0 }
0x200d   :  { %11975 = vadd.xlane.f32.xlu0 %v11974_v6 }
0x2094   :  { %v11979_v34 = vpop.xlane.xlu1 %11978 }
0x2095   :  { %v11981_v53 = vmul.f32 0.03125, %v11979_v34 }
0x2096   :  { %v11976_v62 = vpop.xlane.xlu0 %11975 }
0x2097   :  { %v11983_v32 = vadd.f32 1e-05, %v11981_v53  ;;  %v11980_v56 = vmul.f32 0.03125, %v11976_v62 }
0x2099   :  { %13755 = vrsqrt.f32 %v11983_v32  ;;  %v11982_v17 = vadd.f32 1e-05, %v11980_v56 }
0x209b   :  { %13757 = vrsqrt.f32 %v11982_v17 }
0x20a6   :  { %v13756_v8 = vpop.eup %13755 }
0x20a7   :  { %v11987_v28 = vmul.f32 %v13756_v8, %v11971_v4 }
0x20a8   :  { %v13758_v18 = vpop.eup %13757 }
0x20a9   :  { %v11993_v59 = vmul.f32 %v12460_v9, %v11987_v28  ;;  %v11986_v10 = vmul.f32 %v13758_v18, %v11970_v5 }
0x20ab   :  { %v11999_v38 = vadd.f32 %v12461_v7, %v11993_v59  ;;  %v11992_v30 = vmul.f32 %v12460_v9, %v11986_v10 }
0x20ad   :  { %v12005_v11 = vsel %vm118_vm2, %v11999_v38, 0.0  ;;  %v11998_v36 = vadd.f32 %v12461_v7, %v11992_v30 }
0x20ae   :  { %12006 = vadd.xlane.f32.xlu1 %v12005_v11 }
0x20af   :  { %v12002_v19 = vsel %vm118_vm2, %v11998_v36, 0.0 }
0x20b0   :  { %12003 = vadd.xlane.f32.xlu0 %v12002_v19 }
0x2137   :  { %v12007_v29 = vpop.xlane.xlu1 %12006 }
0x2138   :  { %v12009_v40 = vmul.f32 0.03125, %v12007_v29 }
0x2139   :  { %v12004_v63 = vpop.xlane.xlu0 %12003 }
0x213a   :  { %v12011_v61 = vsub.f32 %v11999_v38, %v12009_v40  ;;  %v12008_v20 = vmul.f32 0.03125, %v12004_v63 }
0x213c   :  { %v12010_v24 = vsub.f32 %v11998_v36, %v12008_v20  ;;  %v12013_v42 = vmul.f32 %v12011_v61, %v12011_v61 }
0x213e   :  { %v12017_v51 = vsel %vm118_vm2, %v12013_v42, 0.0  ;;  %v12012_v60 = vmul.f32 %v12010_v24, %v12010_v24 }
0x213f   :  { %12018 = vadd.xlane.f32.xlu1 %v12017_v51 }
0x2140   :  { %v12014_v26 = vsel %vm118_vm2, %v12012_v60, 0.0 }
0x2141   :  { %12015 = vadd.xlane.f32.xlu0 %v12014_v26 }
0x21c8   :  { %v12019_v35 = vpop.xlane.xlu1 %12018 }
0x21c9   :  { %v12021_v13 = vmul.f32 0.03125, %v12019_v35 }
0x21ca   :  { %v12016_v12 = vpop.xlane.xlu0 %12015 }
0x21cb   :  { %v12023_v55 = vadd.f32 1e-05, %v12021_v13  ;;  %v12020_v37 = vmul.f32 0.03125, %v12016_v12 }
0x21cd   :  { %13759 = vrsqrt.f32 %v12023_v55  ;;  %v12022_v54 = vadd.f32 1e-05, %v12020_v37 }
0x21cf   :  { %13761 = vrsqrt.f32 %v12022_v54 }
0x21da   :  { %v13760_v39 = vpop.eup %13759 }
0x21db   :  { %v12027_v47 = vmul.f32 %v13760_v39, %v12011_v61 }
0x21dc   :  { %v13762_v44 = vpop.eup %13761 }
0x21dd   :  { %v12026_v50 = vmul.f32 %v13762_v44, %v12010_v24  ;;  %v12033_v33 = vmul.f32 %v12462_v43, %v12027_v47 }
0x21df   :  { %v12032_v49 = vmul.f32 %v12462_v43, %v12026_v50  ;;  %v12039_v58 = vadd.f32 %v12463_v52, %v12033_v33 }
0x21e1   :  { %v12038_v57 = vadd.f32 %v12463_v52, %v12032_v49 }
0x21e3   :  { %13590 = vmatprep.mubr.msk.f32.mxu1 %vm118_vm2, %v12038_v57 }
0x21e4   :  { %13591 = vmatmul.mubr.msk.f32.vlgmr.msra.gmra.mxu1 %vm118_vm2, %v12039_v58 }
0x22a4   :  { %v13592_v41 = vpop.f32.mrf.mxu1 }
0x22a5   :  { %v12127_v46 = vadd.f32 %v13592_v41, %v12464_v0 }
0x22a6   :  { %v12121_v1 = vpop.f32.mrf.mxu1 }
0x22a7   :  { %12131 = vst [vmem:[%s14816_s2 + $0x8] sm:$0xff] %v12127_v46  ;;  %v12122_v2 = vadd.f32 %v12464_v0, %v12121_v1 }
0x22a9   :  { %12130 = vst [vmem:[%s14816_s2] sm:$0xff] %v12122_v2 }
0x22aa   :  { %12136 = vsyncpa [#allocation3], 1 }

</bundles_post_ra>
